<compile_context>
chip_gen: v6e
topology: v6e:2x2x1
jax: 0.10.0
libtpu: 0.0.40
codegen_flags: <defaults>
</compile_context>

<pallas_src>
import functools

import jax
import jax.numpy as jnp
from jax.experimental import pallas as pl
from jax.experimental.pallas import tpu as pltpu


def _layernorm(x, gamma, beta, eps=1e-5):
    x = x.astype(jnp.float32)
    mu = jnp.mean(x, axis=-1, keepdims=True)
    var = jnp.mean((x - mu) ** 2, axis=-1, keepdims=True)
    return (x - mu) * jax.lax.rsqrt(var + eps) * gamma + beta


def _vmem_capacity_bytes():
    """Per-TensorCore VMEM capacity; conservative 64 MiB (v7x) fallback."""
    try:
        cap = getattr(pltpu.get_tpu_info(), "vmem_capacity_bytes", None)
        if cap:
            return int(cap)
    except Exception:
        pass
    return 64 * 1024 * 1024


def gmlp_kernel(valid_ref, x_ref,
                wr_ref, br_ref, wg_ref, bg_ref,
                g1_ref, b1_ref, ws_ref, bs_ref,
                wo_ref, bo_ref, gn_ref, bn_ref,
                out_ref, *, weights_resident):
    """One gMLP block + shared post-LayerNorm + residual for G batch rows.

    Grid = (B // G, n_layers). The layer axis is innermost / "arbitrary" and the
    output block index does not depend on it, so out_ref stays VMEM-resident and
    carries activations from layer l to layer l + 1. Weight refs hold either the
    full layer stack (resident, constant index_map) or one layer (streamed).
    """
    layer = pl.program_id(1)
    widx = layer if weights_resident else 0

    # Layer 0: seed the resident activation block with the embeddings.
    @pl.when(layer == 0)
    def _():
        out_ref[...] = x_ref[...]

    G, N, D = out_ref.shape
    half = wr_ref.shape[-1]

    # Read activations once, cast for the MXU; the f32 block stays in out_ref.
    x2 = out_ref[...].reshape(G * N, D).astype(jnp.bfloat16)
    valid = valid_ref[...]                                  # (G, N, 1) f32

    # ---- proj_in: Linear(D, FF) + GELU, split into res / gate halves --------
    res = jnp.dot(x2, wr_ref[widx], preferred_element_type=jnp.float32) + br_ref[widx]
    res = jax.nn.gelu(res, approximate=True)                # (G*N, half) f32
    gate = jnp.dot(x2, wg_ref[widx], preferred_element_type=jnp.float32) + bg_ref[widx]
    gate = jax.nn.gelu(gate, approximate=True)              # (G*N, half) f32

    # ---- Spatial Gating Unit -------------------------------------------------
    gate = _layernorm(gate, g1_ref[widx], b1_ref[widx])     # (G*N, half) f32

    # Padding mask folded into the gate columns:
    #   (Ws * mask) @ gate == Ws @ (gate * valid)  since mask[i, j] = valid[j].
    # Re-lay out gate to the lane-dense (N, G*half) slab with aligned lane-axis
    # concatenation of per-batch-row (N, half) pieces (no transposes needed),
    # then ONE 2D spatial matmul for all G batch rows.
    gate_cols = jnp.concatenate(
        [gate[g * N:(g + 1) * N, :] * valid[g] for g in range(G)], axis=1
    ).astype(jnp.bfloat16)                                  # (N, G*half) bf16
    sgu = jnp.dot(ws_ref[widx], gate_cols,
                  preferred_element_type=jnp.float32) + bs_ref[widx]   # (N, G*half)
    # Back to (G*N, half), rows ordered batch-major (matches `res`).
    gate = jnp.concatenate(
        [sgu[:, g * half:(g + 1) * half] for g in range(G)], axis=0)   # (G*N, half)

    v = (res * gate).astype(jnp.bfloat16)

    # ---- proj_out: Linear(FF/2, D) -------------------------------------------
    y = jnp.dot(v, wo_ref[widx], preferred_element_type=jnp.float32) + bo_ref[widx]
    y = y.reshape(G, N, D)

    # ---- shared post-LayerNorm + residual (re-read the resident block) -------
    out_ref[...] = out_ref[...] + _layernorm(y, gn_ref[...], bn_ref[...])


def gmlp_layers(x, valid, params, batch_block):
    """Runs all fused gMLP layers: x_{l+1} = x_l + LayerNorm(block_l(x_l, valid))."""
    B, N, D = x.shape
    L, _, half = params["wr"].shape

    # Batch padding instead of a silent G=1 fallback (padded rows are masked
    # out by valid=0 / zero embeddings and sliced off the output).
    G = max(1, int(batch_block))
    pad = (-B) % G
    if pad:
        x = jnp.pad(x, ((0, pad), (0, 0), (0, 0)))
        valid = jnp.pad(valid, ((0, pad), (0, 0), (0, 0)))
    Bp = B + pad
    grid = (Bp // G, L)

    weight_keys = ("wr", "br", "wg", "bg", "g1", "b1", "ws", "bs", "wo", "bo")
    weight_bytes = sum(int(params[k].size) * params[k].dtype.itemsize
                       for k in weight_keys)
    cap = _vmem_capacity_bytes()

    # Hold the full layer stack of weights VMEM-resident (fetched once for the
    # whole grid) when it fits comfortably; otherwise stream one layer at a time
    # (double-buffered by the Pallas pipeline). Factor 2 = default buffer count.
    resident = (2 * weight_bytes) <= int(0.35 * cap)

    batch_map = lambda b, l: (b, 0, 0)
    fixed_map = lambda b, l: (0, 0)
    if resident:
        w_map = lambda b, l: (0, 0, 0)
        wl = L
    else:
        w_map = lambda b, l: (l, 0, 0)
        wl = 1

    in_specs = [
        pl.BlockSpec((G, N, 1), batch_map),        # valid (padding mask vector)
        pl.BlockSpec((G, N, D), batch_map),        # embeddings
        pl.BlockSpec((wl, D, half), w_map),        # Wi (res half, bf16)
        pl.BlockSpec((wl, 1, half), w_map),        # bi (res half)
        pl.BlockSpec((wl, D, half), w_map),        # Wi (gate half, bf16)
        pl.BlockSpec((wl, 1, half), w_map),        # bi (gate half)
        pl.BlockSpec((wl, 1, half), w_map),        # SGU LN gamma
        pl.BlockSpec((wl, 1, half), w_map),        # SGU LN beta
        pl.BlockSpec((wl, N, N), w_map),           # Ws (bf16)
        pl.BlockSpec((wl, N, 1), w_map),           # bs (pre-transposed, (N,1))
        pl.BlockSpec((wl, half, D), w_map),        # Wo (bf16)
        pl.BlockSpec((wl, 1, D), w_map),           # bo
        pl.BlockSpec((1, D), fixed_map),           # shared LN gamma
        pl.BlockSpec((1, D), fixed_map),           # shared LN beta
    ]

    # Generation-aware VMEM budget: double-buffered streamed blocks + dominant
    # f32 live intermediates, clamped to ~85% of the physical per-core VMEM.
    act_block = G * N * D * 4
    step_weight = weight_bytes if resident else -(-weight_bytes // L)
    est = (2 * (2 * act_block + G * N * 4)          # x, out, valid blocks (x2 buffers)
           + 2 * step_weight                        # weight buffers
           + 8 * G * N * half * 4                   # gate/res/sgu/v f32 live values
           + 2 * act_block)                         # y / LN temporaries
    vmem_limit = max(32 * 1024 * 1024, min(int(0.85 * cap), int(1.5 * est)))

    kernel = functools.partial(gmlp_kernel, weights_resident=resident)
    out = pl.pallas_call(
        kernel,
        out_shape=jax.ShapeDtypeStruct((Bp, N, D), jnp.float32),
        grid=grid,
        in_specs=in_specs,
        out_specs=pl.BlockSpec((G, N, D), batch_map),
        compiler_params=pltpu.CompilerParams(
            dimension_semantics=("parallel", "arbitrary"),
            vmem_limit_bytes=vmem_limit),
    )(valid, x,
      params["wr"], params["br"], params["wg"], params["bg"],
      params["g1"], params["b1"], params["ws"], params["bs"],
      params["wo"], params["bo"], params["norm_g"], params["norm_b"])
    return out[:B] if pad else out


def init_params(key, vocab_size, hidden, n_layers, seq_len):
    ff = hidden * 6
    half = ff // 2
    k_emb, k_wi, k_ws, k_wo = jax.random.split(key, 4)

    # Token embedding with padding_idx = 0 (row 0 zeroed).
    emb = 0.02 * jax.random.normal(k_emb, (vocab_size, hidden), jnp.float32)
    emb = emb.at[0].set(0.0)

    # Per-layer weights stacked along a leading layer axis; matmul weights bf16.
    wi = 0.02 * jax.random.normal(k_wi, (n_layers, hidden, ff), jnp.float32)
    wr = wi[:, :, :half].astype(jnp.bfloat16)                # res half of proj_in
    wg = wi[:, :, half:].astype(jnp.bfloat16)                # gate half of proj_in
    br = jnp.zeros((n_layers, 1, half), jnp.float32)
    bg = jnp.zeros((n_layers, 1, half), jnp.float32)
    g1 = jnp.ones((n_layers, 1, half), jnp.float32)
    b1 = jnp.zeros((n_layers, 1, half), jnp.float32)
    # gMLP init: near-zero spatial weight, unit bias (gate ~= 1 at init).
    ws = (1e-3 * jax.random.normal(k_ws, (n_layers, seq_len, seq_len), jnp.float32)
          ).astype(jnp.bfloat16)
    bs = jnp.ones((n_layers, seq_len, 1), jnp.float32)       # (N, 1) pre-transposed
    wo = (0.02 * jax.random.normal(k_wo, (n_layers, half, hidden), jnp.float32)
          ).astype(jnp.bfloat16)
    bo = jnp.zeros((n_layers, 1, hidden), jnp.float32)

    norm_g = jnp.ones((1, hidden), jnp.float32)
    norm_b = jnp.zeros((1, hidden), jnp.float32)
    return dict(emb=emb, wr=wr, br=br, wg=wg, bg=bg, g1=g1, b1=b1,
                ws=ws, bs=bs, wo=wo, bo=bo, norm_g=norm_g, norm_b=norm_b)


@functools.partial(jax.jit, static_argnames=("batch_block",))
def gmlp_forward(tokens, params, *, batch_block=16):
    # mask[b, i, j] = (tokens[b, j] > 0) is row-independent -> keep only (B, N, 1).
    valid = (tokens > 0).astype(jnp.float32)[:, :, None]     # (B, N, 1)
    # Embedding lookup (gather) kept in plain-JAX glue.
    x = params["emb"][tokens]                                # (B, N, D) f32
    return gmlp_layers(x, valid, params, batch_block)


if __name__ == "__main__":
    VOCAB = 100
    HIDDEN = 128      # lane-dense: multiple of 128
    N_LAYERS = 2
    SEQ_LEN = 8       # sublane-aligned: multiple of 8
    BATCH = 32
    BATCH_BLOCK = 16  # G*N = 128 MXU rows; grid = (2, 2): 2 parallel steps

    key = jax.random.PRNGKey(0)
    k_param, k_tok = jax.random.split(key)
    params = init_params(k_param, VOCAB, HIDDEN, N_LAYERS, SEQ_LEN)

    # Deterministic token ids; include some 0s so the padding mask is exercised.
    tokens = jax.random.randint(k_tok, (BATCH, SEQ_LEN), 0, VOCAB, dtype=jnp.int32)
    tokens = tokens.at[0, -2:].set(0)

    out = gmlp_forward(tokens, params, batch_block=BATCH_BLOCK)
    jax.block_until_ready(out)
    assert out.shape == (BATCH, SEQ_LEN, HIDDEN)
    assert jnp.all(jnp.isfinite(out))
    print("KERNEL_OK")
</pallas_src>

<mosaic_0001>
module attributes {stable_mosaic.version = 11 : i64} {
  func.func @gmlp_kernel(%arg0: i32, %arg1: i32, %arg2: memref<16x8x1xf32, #tpu.memory_space<vmem>>, %arg3: memref<16x8x128xf32, #tpu.memory_space<vmem>>, %arg4: memref<2x128x384xbf16, #tpu.memory_space<vmem>>, %arg5: memref<2x1x384xf32, #tpu.memory_space<vmem>>, %arg6: memref<2x128x384xbf16, #tpu.memory_space<vmem>>, %arg7: memref<2x1x384xf32, #tpu.memory_space<vmem>>, %arg8: memref<2x1x384xf32, #tpu.memory_space<vmem>>, %arg9: memref<2x1x384xf32, #tpu.memory_space<vmem>>, %arg10: memref<2x8x8xbf16, #tpu.memory_space<vmem>>, %arg11: memref<2x8x1xf32, #tpu.memory_space<vmem>>, %arg12: memref<2x384x128xbf16, #tpu.memory_space<vmem>>, %arg13: memref<2x1x128xf32, #tpu.memory_space<vmem>>, %arg14: memref<1x128xf32, #tpu.memory_space<vmem>>, %arg15: memref<1x128xf32, #tpu.memory_space<vmem>>, %arg16: memref<16x8x128xf32, #tpu.memory_space<vmem>>) attributes {dimension_semantics = [#tpu.dimension_semantics<parallel>, #tpu.dimension_semantics<arbitrary>], iteration_bounds = array<i64: 2, 2>, scalar_prefetch = 0 : i64, scratch_operands = 0 : i64, tpu.core_type = #tpu.core_type<tc>, window_params = [{transform_indices = @transform_0, window_bounds = array<i64: 16, 8, 1>}, {transform_indices = @transform_1, window_bounds = array<i64: 16, 8, 128>}, {pipeline_mode = #tpu.pipeline_mode<synchronous>, transform_indices = @transform_2, window_bounds = array<i64: 2, 128, 384>}, {pipeline_mode = #tpu.pipeline_mode<synchronous>, transform_indices = @transform_3, window_bounds = array<i64: 2, 1, 384>}, {pipeline_mode = #tpu.pipeline_mode<synchronous>, transform_indices = @transform_4, window_bounds = array<i64: 2, 128, 384>}, {pipeline_mode = #tpu.pipeline_mode<synchronous>, transform_indices = @transform_5, window_bounds = array<i64: 2, 1, 384>}, {pipeline_mode = #tpu.pipeline_mode<synchronous>, transform_indices = @transform_6, window_bounds = array<i64: 2, 1, 384>}, {pipeline_mode = #tpu.pipeline_mode<synchronous>, transform_indices = @transform_7, window_bounds = array<i64: 2, 1, 384>}, {pipeline_mode = #tpu.pipeline_mode<synchronous>, transform_indices = @transform_8, window_bounds = array<i64: 2, 8, 8>}, {pipeline_mode = #tpu.pipeline_mode<synchronous>, transform_indices = @transform_9, window_bounds = array<i64: 2, 8, 1>}, {pipeline_mode = #tpu.pipeline_mode<synchronous>, transform_indices = @transform_10, window_bounds = array<i64: 2, 384, 128>}, {pipeline_mode = #tpu.pipeline_mode<synchronous>, transform_indices = @transform_11, window_bounds = array<i64: 2, 1, 128>}, {pipeline_mode = #tpu.pipeline_mode<synchronous>, transform_indices = @transform_12, window_bounds = array<i64: 1, 128>}, {pipeline_mode = #tpu.pipeline_mode<synchronous>, transform_indices = @transform_13, window_bounds = array<i64: 1, 128>}, {transform_indices = @transform_14, window_bounds = array<i64: 16, 8, 128>}]} {
    %c0_i32 = arith.constant 0 : i32
    %0 = arith.cmpi eq, %arg1, %c0_i32 : i32
    %1 = arith.extui %0 : i1 to i32
    %c0_i32_0 = arith.constant 0 : i32
    %2 = arith.cmpi ne, %1, %c0_i32_0 : i32
    scf.if %2 {
      %c0_57 = arith.constant 0 : index
      %c0_58 = arith.constant 0 : index
      %c0_59 = arith.constant 0 : index
      %228 = vector.load %arg3[%c0_57, %c0_58, %c0_59] : memref<16x8x128xf32, #tpu.memory_space<vmem>>, vector<16x8x128xf32>
      %c0_60 = arith.constant 0 : index
      %c0_61 = arith.constant 0 : index
      %c0_62 = arith.constant 0 : index
      %229 = vector.load %arg16[%c0_60, %c0_61, %c0_62] : memref<16x8x128xf32, #tpu.memory_space<vmem>>, vector<16x8x128xf32>
      tpu.vector_store %arg16[%c0_60, %c0_61, %c0_62], %228 {strides = array<i32>} : memref<16x8x128xf32, #tpu.memory_space<vmem>>, vector<16x8x128xf32>,
    } else {
    }
    %c0 = arith.constant 0 : index
    %c0_1 = arith.constant 0 : index
    %c0_2 = arith.constant 0 : index
    %3 = vector.load %arg16[%c0, %c0_1, %c0_2] : memref<16x8x128xf32, #tpu.memory_space<vmem>>, vector<16x8x128xf32>
    %4 = vector.shape_cast %3 : vector<16x8x128xf32> to vector<128x128xf32>
    %5 = arith.truncf %4 : vector<128x128xf32> to vector<128x128xbf16>
    %c0_3 = arith.constant 0 : index
    %c0_4 = arith.constant 0 : index
    %c0_5 = arith.constant 0 : index
    %6 = vector.load %arg2[%c0_3, %c0_4, %c0_5] : memref<16x8x1xf32, #tpu.memory_space<vmem>>, vector<16x8x1xf32>
    %7 = arith.index_cast %arg1 : i32 to index
    %c0_6 = arith.constant 0 : index
    %c0_7 = arith.constant 0 : index
    %8 = vector.load %arg4[%7, %c0_6, %c0_7] : memref<2x128x384xbf16, #tpu.memory_space<vmem>>, vector<1x128x384xbf16>
    %9 = vector.shape_cast %8 : vector<1x128x384xbf16> to vector<128x384xbf16>
    %cst = arith.constant dense<0.000000e+00> : vector<128x384xf32>
    %10 = tpu.matmul %5, %9, %cst {dimension_numbers = #tpu.dot_dimension_numbers<[1], [0], [0], [1], [0, 0, 1, 1], [], []>} : vector<128x128xbf16>, vector<128x384xbf16>, vector<128x384xf32> -> vector<128x384xf32>
    %11 = arith.index_cast %arg1 : i32 to index
    %c0_8 = arith.constant 0 : index
    %c0_9 = arith.constant 0 : index
    %12 = vector.load %arg5[%11, %c0_8, %c0_9] : memref<2x1x384xf32, #tpu.memory_space<vmem>>, vector<1x1x384xf32>
    %13 = vector.shape_cast %12 : vector<1x1x384xf32> to vector<1x384xf32>
    %14 = vector.broadcast %13 : vector<1x384xf32> to vector<128x384xf32>
    %15 = arith.addf %10, %14 : vector<128x384xf32>
    %16 = arith.mulf %15, %15 : vector<128x384xf32>
    %17 = arith.mulf %15, %16 : vector<128x384xf32>
    %cst_10 = arith.constant 4.471500e-02 : f32
    %18 = vector.broadcast %cst_10 : f32 to vector<128x384xf32>
    %19 = arith.mulf %18, %17 : vector<128x384xf32>
    %20 = arith.addf %15, %19 : vector<128x384xf32>
    %cst_11 = arith.constant 0.797884583 : f32
    %21 = vector.broadcast %cst_11 : f32 to vector<128x384xf32>
    %22 = arith.mulf %21, %20 : vector<128x384xf32>
    %23 = math.tanh %22 : vector<128x384xf32>
    %cst_12 = arith.constant 1.000000e+00 : f32
    %24 = vector.broadcast %cst_12 : f32 to vector<128x384xf32>
    %25 = arith.addf %24, %23 : vector<128x384xf32>
    %cst_13 = arith.constant 5.000000e-01 : f32
    %26 = vector.broadcast %cst_13 : f32 to vector<128x384xf32>
    %27 = arith.mulf %26, %25 : vector<128x384xf32>
    %28 = arith.mulf %15, %27 : vector<128x384xf32>
    %29 = arith.index_cast %arg1 : i32 to index
    %c0_14 = arith.constant 0 : index
    %c0_15 = arith.constant 0 : index
    %30 = vector.load %arg6[%29, %c0_14, %c0_15] : memref<2x128x384xbf16, #tpu.memory_space<vmem>>, vector<1x128x384xbf16>
    %31 = vector.shape_cast %30 : vector<1x128x384xbf16> to vector<128x384xbf16>
    %cst_16 = arith.constant dense<0.000000e+00> : vector<128x384xf32>
    %32 = tpu.matmul %5, %31, %cst_16 {dimension_numbers = #tpu.dot_dimension_numbers<[1], [0], [0], [1], [0, 0, 1, 1], [], []>} : vector<128x128xbf16>, vector<128x384xbf16>, vector<128x384xf32> -> vector<128x384xf32>
    %33 = arith.index_cast %arg1 : i32 to index
    %c0_17 = arith.constant 0 : index
    %c0_18 = arith.constant 0 : index
    %34 = vector.load %arg7[%33, %c0_17, %c0_18] : memref<2x1x384xf32, #tpu.memory_space<vmem>>, vector<1x1x384xf32>
    %35 = vector.shape_cast %34 : vector<1x1x384xf32> to vector<1x384xf32>
    %36 = vector.broadcast %35 : vector<1x384xf32> to vector<128x384xf32>
    %37 = arith.addf %32, %36 : vector<128x384xf32>
    %38 = arith.mulf %37, %37 : vector<128x384xf32>
    %39 = arith.mulf %37, %38 : vector<128x384xf32>
    %cst_19 = arith.constant 4.471500e-02 : f32
    %40 = vector.broadcast %cst_19 : f32 to vector<128x384xf32>
    %41 = arith.mulf %40, %39 : vector<128x384xf32>
    %42 = arith.addf %37, %41 : vector<128x384xf32>
    %cst_20 = arith.constant 0.797884583 : f32
    %43 = vector.broadcast %cst_20 : f32 to vector<128x384xf32>
    %44 = arith.mulf %43, %42 : vector<128x384xf32>
    %45 = math.tanh %44 : vector<128x384xf32>
    %cst_21 = arith.constant 1.000000e+00 : f32
    %46 = vector.broadcast %cst_21 : f32 to vector<128x384xf32>
    %47 = arith.addf %46, %45 : vector<128x384xf32>
    %cst_22 = arith.constant 5.000000e-01 : f32
    %48 = vector.broadcast %cst_22 : f32 to vector<128x384xf32>
    %49 = arith.mulf %48, %47 : vector<128x384xf32>
    %50 = arith.mulf %37, %49 : vector<128x384xf32>
    %51 = arith.index_cast %arg1 : i32 to index
    %c0_23 = arith.constant 0 : index
    %c0_24 = arith.constant 0 : index
    %52 = vector.load %arg8[%51, %c0_23, %c0_24] : memref<2x1x384xf32, #tpu.memory_space<vmem>>, vector<1x1x384xf32>
    %53 = vector.shape_cast %52 : vector<1x1x384xf32> to vector<1x384xf32>
    %54 = arith.index_cast %arg1 : i32 to index
    %c0_25 = arith.constant 0 : index
    %c0_26 = arith.constant 0 : index
    %55 = vector.load %arg9[%54, %c0_25, %c0_26] : memref<2x1x384xf32, #tpu.memory_space<vmem>>, vector<1x1x384xf32>
    %56 = vector.shape_cast %55 : vector<1x1x384xf32> to vector<1x384xf32>
    %cst_27 = arith.constant dense<0.000000e+00> : vector<128xf32>
    %57 = vector.multi_reduction <add>, %50, %cst_27 [1] : vector<128x384xf32> to vector<128xf32>
    %58 = vector.shape_cast %57 : vector<128xf32> to vector<128x1xf32>
    %cst_28 = arith.constant 3.840000e+02 : f32
    %59 = vector.broadcast %cst_28 : f32 to vector<128x1xf32>
    %60 = arith.divf %58, %59 : vector<128x1xf32>
    %61 = vector.broadcast %60 : vector<128x1xf32> to vector<128x384xf32>
    %62 = arith.subf %50, %61 : vector<128x384xf32>
    %63 = arith.mulf %62, %62 : vector<128x384xf32>
    %cst_29 = arith.constant dense<0.000000e+00> : vector<128xf32>
    %64 = vector.multi_reduction <add>, %63, %cst_29 [1] : vector<128x384xf32> to vector<128xf32>
    %65 = vector.shape_cast %64 : vector<128xf32> to vector<128x1xf32>
    %cst_30 = arith.constant 3.840000e+02 : f32
    %66 = vector.broadcast %cst_30 : f32 to vector<128x1xf32>
    %67 = arith.divf %65, %66 : vector<128x1xf32>
    %68 = vector.broadcast %60 : vector<128x1xf32> to vector<128x384xf32>
    %69 = arith.subf %50, %68 : vector<128x384xf32>
    %cst_31 = arith.constant 9.99999974E-6 : f32
    %70 = vector.broadcast %cst_31 : f32 to vector<128x1xf32>
    %71 = arith.addf %67, %70 : vector<128x1xf32>
    %72 = math.rsqrt %71 : vector<128x1xf32>
    %73 = vector.broadcast %72 : vector<128x1xf32> to vector<128x384xf32>
    %74 = arith.mulf %69, %73 : vector<128x384xf32>
    %75 = vector.broadcast %53 : vector<1x384xf32> to vector<128x384xf32>
    %76 = arith.mulf %74, %75 : vector<128x384xf32>
    %77 = vector.broadcast %56 : vector<1x384xf32> to vector<128x384xf32>
    %78 = arith.addf %76, %77 : vector<128x384xf32>
    %79 = vector.extract_strided_slice %78 {offsets = [0, 0], sizes = [8, 384], strides = [1, 1]} : vector<128x384xf32> to vector<8x384xf32>
    %80 = vector.extract_strided_slice %6 {offsets = [0, 0, 0], sizes = [1, 8, 1], strides = [1, 1, 1]} : vector<16x8x1xf32> to vector<1x8x1xf32>
    %81 = vector.shape_cast %80 : vector<1x8x1xf32> to vector<8x1xf32>
    %82 = vector.broadcast %81 : vector<8x1xf32> to vector<8x384xf32>
    %83 = arith.mulf %79, %82 : vector<8x384xf32>
    %84 = vector.extract_strided_slice %78 {offsets = [8, 0], sizes = [8, 384], strides = [1, 1]} : vector<128x384xf32> to vector<8x384xf32>
    %85 = vector.extract_strided_slice %6 {offsets = [1, 0, 0], sizes = [1, 8, 1], strides = [1, 1, 1]} : vector<16x8x1xf32> to vector<1x8x1xf32>
    %86 = vector.shape_cast %85 : vector<1x8x1xf32> to vector<8x1xf32>
    %87 = vector.broadcast %86 : vector<8x1xf32> to vector<8x384xf32>
    %88 = arith.mulf %84, %87 : vector<8x384xf32>
    %89 = vector.extract_strided_slice %78 {offsets = [16, 0], sizes = [8, 384], strides = [1, 1]} : vector<128x384xf32> to vector<8x384xf32>
    %90 = vector.extract_strided_slice %6 {offsets = [2, 0, 0], sizes = [1, 8, 1], strides = [1, 1, 1]} : vector<16x8x1xf32> to vector<1x8x1xf32>
    %91 = vector.shape_cast %90 : vector<1x8x1xf32> to vector<8x1xf32>
    %92 = vector.broadcast %91 : vector<8x1xf32> to vector<8x384xf32>
    %93 = arith.mulf %89, %92 : vector<8x384xf32>
    %94 = vector.extract_strided_slice %78 {offsets = [24, 0], sizes = [8, 384], strides = [1, 1]} : vector<128x384xf32> to vector<8x384xf32>
    %95 = vector.extract_strided_slice %6 {offsets = [3, 0, 0], sizes = [1, 8, 1], strides = [1, 1, 1]} : vector<16x8x1xf32> to vector<1x8x1xf32>
    %96 = vector.shape_cast %95 : vector<1x8x1xf32> to vector<8x1xf32>
    %97 = vector.broadcast %96 : vector<8x1xf32> to vector<8x384xf32>
    %98 = arith.mulf %94, %97 : vector<8x384xf32>
    %99 = vector.extract_strided_slice %78 {offsets = [32, 0], sizes = [8, 384], strides = [1, 1]} : vector<128x384xf32> to vector<8x384xf32>
    %100 = vector.extract_strided_slice %6 {offsets = [4, 0, 0], sizes = [1, 8, 1], strides = [1, 1, 1]} : vector<16x8x1xf32> to vector<1x8x1xf32>
    %101 = vector.shape_cast %100 : vector<1x8x1xf32> to vector<8x1xf32>
    %102 = vector.broadcast %101 : vector<8x1xf32> to vector<8x384xf32>
    %103 = arith.mulf %99, %102 : vector<8x384xf32>
    %104 = vector.extract_strided_slice %78 {offsets = [40, 0], sizes = [8, 384], strides = [1, 1]} : vector<128x384xf32> to vector<8x384xf32>
    %105 = vector.extract_strided_slice %6 {offsets = [5, 0, 0], sizes = [1, 8, 1], strides = [1, 1, 1]} : vector<16x8x1xf32> to vector<1x8x1xf32>
    %106 = vector.shape_cast %105 : vector<1x8x1xf32> to vector<8x1xf32>
    %107 = vector.broadcast %106 : vector<8x1xf32> to vector<8x384xf32>
    %108 = arith.mulf %104, %107 : vector<8x384xf32>
    %109 = vector.extract_strided_slice %78 {offsets = [48, 0], sizes = [8, 384], strides = [1, 1]} : vector<128x384xf32> to vector<8x384xf32>
    %110 = vector.extract_strided_slice %6 {offsets = [6, 0, 0], sizes = [1, 8, 1], strides = [1, 1, 1]} : vector<16x8x1xf32> to vector<1x8x1xf32>
    %111 = vector.shape_cast %110 : vector<1x8x1xf32> to vector<8x1xf32>
    %112 = vector.broadcast %111 : vector<8x1xf32> to vector<8x384xf32>
    %113 = arith.mulf %109, %112 : vector<8x384xf32>
    %114 = vector.extract_strided_slice %78 {offsets = [56, 0], sizes = [8, 384], strides = [1, 1]} : vector<128x384xf32> to vector<8x384xf32>
    %115 = vector.extract_strided_slice %6 {offsets = [7, 0, 0], sizes = [1, 8, 1], strides = [1, 1, 1]} : vector<16x8x1xf32> to vector<1x8x1xf32>
    %116 = vector.shape_cast %115 : vector<1x8x1xf32> to vector<8x1xf32>
    %117 = vector.broadcast %116 : vector<8x1xf32> to vector<8x384xf32>
    %118 = arith.mulf %114, %117 : vector<8x384xf32>
    %119 = vector.extract_strided_slice %78 {offsets = [64, 0], sizes = [8, 384], strides = [1, 1]} : vector<128x384xf32> to vector<8x384xf32>
    %120 = vector.extract_strided_slice %6 {offsets = [8, 0, 0], sizes = [1, 8, 1], strides = [1, 1, 1]} : vector<16x8x1xf32> to vector<1x8x1xf32>
    %121 = vector.shape_cast %120 : vector<1x8x1xf32> to vector<8x1xf32>
    %122 = vector.broadcast %121 : vector<8x1xf32> to vector<8x384xf32>
    %123 = arith.mulf %119, %122 : vector<8x384xf32>
    %124 = vector.extract_strided_slice %78 {offsets = [72, 0], sizes = [8, 384], strides = [1, 1]} : vector<128x384xf32> to vector<8x384xf32>
    %125 = vector.extract_strided_slice %6 {offsets = [9, 0, 0], sizes = [1, 8, 1], strides = [1, 1, 1]} : vector<16x8x1xf32> to vector<1x8x1xf32>
    %126 = vector.shape_cast %125 : vector<1x8x1xf32> to vector<8x1xf32>
    %127 = vector.broadcast %126 : vector<8x1xf32> to vector<8x384xf32>
    %128 = arith.mulf %124, %127 : vector<8x384xf32>
    %129 = vector.extract_strided_slice %78 {offsets = [80, 0], sizes = [8, 384], strides = [1, 1]} : vector<128x384xf32> to vector<8x384xf32>
    %130 = vector.extract_strided_slice %6 {offsets = [10, 0, 0], sizes = [1, 8, 1], strides = [1, 1, 1]} : vector<16x8x1xf32> to vector<1x8x1xf32>
    %131 = vector.shape_cast %130 : vector<1x8x1xf32> to vector<8x1xf32>
    %132 = vector.broadcast %131 : vector<8x1xf32> to vector<8x384xf32>
    %133 = arith.mulf %129, %132 : vector<8x384xf32>
    %134 = vector.extract_strided_slice %78 {offsets = [88, 0], sizes = [8, 384], strides = [1, 1]} : vector<128x384xf32> to vector<8x384xf32>
    %135 = vector.extract_strided_slice %6 {offsets = [11, 0, 0], sizes = [1, 8, 1], strides = [1, 1, 1]} : vector<16x8x1xf32> to vector<1x8x1xf32>
    %136 = vector.shape_cast %135 : vector<1x8x1xf32> to vector<8x1xf32>
    %137 = vector.broadcast %136 : vector<8x1xf32> to vector<8x384xf32>
    %138 = arith.mulf %134, %137 : vector<8x384xf32>
    %139 = vector.extract_strided_slice %78 {offsets = [96, 0], sizes = [8, 384], strides = [1, 1]} : vector<128x384xf32> to vector<8x384xf32>
    %140 = vector.extract_strided_slice %6 {offsets = [12, 0, 0], sizes = [1, 8, 1], strides = [1, 1, 1]} : vector<16x8x1xf32> to vector<1x8x1xf32>
    %141 = vector.shape_cast %140 : vector<1x8x1xf32> to vector<8x1xf32>
    %142 = vector.broadcast %141 : vector<8x1xf32> to vector<8x384xf32>
    %143 = arith.mulf %139, %142 : vector<8x384xf32>
    %144 = vector.extract_strided_slice %78 {offsets = [104, 0], sizes = [8, 384], strides = [1, 1]} : vector<128x384xf32> to vector<8x384xf32>
    %145 = vector.extract_strided_slice %6 {offsets = [13, 0, 0], sizes = [1, 8, 1], strides = [1, 1, 1]} : vector<16x8x1xf32> to vector<1x8x1xf32>
    %146 = vector.shape_cast %145 : vector<1x8x1xf32> to vector<8x1xf32>
    %147 = vector.broadcast %146 : vector<8x1xf32> to vector<8x384xf32>
    %148 = arith.mulf %144, %147 : vector<8x384xf32>
    %149 = vector.extract_strided_slice %78 {offsets = [112, 0], sizes = [8, 384], strides = [1, 1]} : vector<128x384xf32> to vector<8x384xf32>
    %150 = vector.extract_strided_slice %6 {offsets = [14, 0, 0], sizes = [1, 8, 1], strides = [1, 1, 1]} : vector<16x8x1xf32> to vector<1x8x1xf32>
    %151 = vector.shape_cast %150 : vector<1x8x1xf32> to vector<8x1xf32>
    %152 = vector.broadcast %151 : vector<8x1xf32> to vector<8x384xf32>
    %153 = arith.mulf %149, %152 : vector<8x384xf32>
    %154 = vector.extract_strided_slice %78 {offsets = [120, 0], sizes = [8, 384], strides = [1, 1]} : vector<128x384xf32> to vector<8x384xf32>
    %155 = vector.extract_strided_slice %6 {offsets = [15, 0, 0], sizes = [1, 8, 1], strides = [1, 1, 1]} : vector<16x8x1xf32> to vector<1x8x1xf32>
    %156 = vector.shape_cast %155 : vector<1x8x1xf32> to vector<8x1xf32>
    %157 = vector.broadcast %156 : vector<8x1xf32> to vector<8x384xf32>
    %158 = arith.mulf %154, %157 : vector<8x384xf32>
    %159 = tpu.concatenate %83, %88, %93, %98, %103, %108, %113, %118, %123, %128, %133, %138, %143, %148, %153, %158 in 1 : vector<8x384xf32>, vector<8x384xf32>, vector<8x384xf32>, vector<8x384xf32>, vector<8x384xf32>, vector<8x384xf32>, vector<8x384xf32>, vector<8x384xf32>, vector<8x384xf32>, vector<8x384xf32>, vector<8x384xf32>, vector<8x384xf32>, vector<8x384xf32>, vector<8x384xf32>, vector<8x384xf32>, vector<8x384xf32> -> vector<8x6144xf32>
    %160 = arith.truncf %159 : vector<8x6144xf32> to vector<8x6144xbf16>
    %161 = arith.index_cast %arg1 : i32 to index
    %c0_32 = arith.constant 0 : index
    %c0_33 = arith.constant 0 : index
    %162 = vector.load %arg10[%161, %c0_32, %c0_33] : memref<2x8x8xbf16, #tpu.memory_space<vmem>>, vector<1x8x8xbf16>
    %163 = vector.shape_cast %162 : vector<1x8x8xbf16> to vector<8x8xbf16>
    %cst_34 = arith.constant dense<0.000000e+00> : vector<8x6144xf32>
    %164 = tpu.matmul %163, %160, %cst_34 {dimension_numbers = #tpu.dot_dimension_numbers<[1], [0], [0], [1], [0, 0, 1, 1], [], []>} : vector<8x8xbf16>, vector<8x6144xbf16>, vector<8x6144xf32> -> vector<8x6144xf32>
    %165 = arith.index_cast %arg1 : i32 to index
    %c0_35 = arith.constant 0 : index
    %c0_36 = arith.constant 0 : index
    %166 = vector.load %arg11[%165, %c0_35, %c0_36] : memref<2x8x1xf32, #tpu.memory_space<vmem>>, vector<1x8x1xf32>
    %167 = vector.shape_cast %166 : vector<1x8x1xf32> to vector<8x1xf32>
    %168 = vector.broadcast %167 : vector<8x1xf32> to vector<8x6144xf32>
    %169 = arith.addf %164, %168 : vector<8x6144xf32>
    %170 = vector.extract_strided_slice %169 {offsets = [0, 0], sizes = [8, 384], strides = [1, 1]} : vector<8x6144xf32> to vector<8x384xf32>
    %171 = vector.extract_strided_slice %169 {offsets = [0, 384], sizes = [8, 384], strides = [1, 1]} : vector<8x6144xf32> to vector<8x384xf32>
    %172 = vector.extract_strided_slice %169 {offsets = [0, 768], sizes = [8, 384], strides = [1, 1]} : vector<8x6144xf32> to vector<8x384xf32>
    %173 = vector.extract_strided_slice %169 {offsets = [0, 1152], sizes = [8, 384], strides = [1, 1]} : vector<8x6144xf32> to vector<8x384xf32>
    %174 = vector.extract_strided_slice %169 {offsets = [0, 1536], sizes = [8, 384], strides = [1, 1]} : vector<8x6144xf32> to vector<8x384xf32>
    %175 = vector.extract_strided_slice %169 {offsets = [0, 1920], sizes = [8, 384], strides = [1, 1]} : vector<8x6144xf32> to vector<8x384xf32>
    %176 = vector.extract_strided_slice %169 {offsets = [0, 2304], sizes = [8, 384], strides = [1, 1]} : vector<8x6144xf32> to vector<8x384xf32>
    %177 = vector.extract_strided_slice %169 {offsets = [0, 2688], sizes = [8, 384], strides = [1, 1]} : vector<8x6144xf32> to vector<8x384xf32>
    %178 = vector.extract_strided_slice %169 {offsets = [0, 3072], sizes = [8, 384], strides = [1, 1]} : vector<8x6144xf32> to vector<8x384xf32>
    %179 = vector.extract_strided_slice %169 {offsets = [0, 3456], sizes = [8, 384], strides = [1, 1]} : vector<8x6144xf32> to vector<8x384xf32>
    %180 = vector.extract_strided_slice %169 {offsets = [0, 3840], sizes = [8, 384], strides = [1, 1]} : vector<8x6144xf32> to vector<8x384xf32>
    %181 = vector.extract_strided_slice %169 {offsets = [0, 4224], sizes = [8, 384], strides = [1, 1]} : vector<8x6144xf32> to vector<8x384xf32>
    %182 = vector.extract_strided_slice %169 {offsets = [0, 4608], sizes = [8, 384], strides = [1, 1]} : vector<8x6144xf32> to vector<8x384xf32>
    %183 = vector.extract_strided_slice %169 {offsets = [0, 4992], sizes = [8, 384], strides = [1, 1]} : vector<8x6144xf32> to vector<8x384xf32>
    %184 = vector.extract_strided_slice %169 {offsets = [0, 5376], sizes = [8, 384], strides = [1, 1]} : vector<8x6144xf32> to vector<8x384xf32>
    %185 = vector.extract_strided_slice %169 {offsets = [0, 5760], sizes = [8, 384], strides = [1, 1]} : vector<8x6144xf32> to vector<8x384xf32>
    %186 = tpu.concatenate %170, %171, %172, %173, %174, %175, %176, %177, %178, %179, %180, %181, %182, %183, %184, %185 in 0 : vector<8x384xf32>, vector<8x384xf32>, vector<8x384xf32>, vector<8x384xf32>, vector<8x384xf32>, vector<8x384xf32>, vector<8x384xf32>, vector<8x384xf32>, vector<8x384xf32>, vector<8x384xf32>, vector<8x384xf32>, vector<8x384xf32>, vector<8x384xf32>, vector<8x384xf32>, vector<8x384xf32>, vector<8x384xf32> -> vector<128x384xf32>
    %187 = arith.mulf %28, %186 : vector<128x384xf32>
    %188 = arith.truncf %187 : vector<128x384xf32> to vector<128x384xbf16>
    %189 = arith.index_cast %arg1 : i32 to index
    %c0_37 = arith.constant 0 : index
    %c0_38 = arith.constant 0 : index
    %190 = vector.load %arg12[%189, %c0_37, %c0_38] : memref<2x384x128xbf16, #tpu.memory_space<vmem>>, vector<1x384x128xbf16>
    %191 = vector.shape_cast %190 : vector<1x384x128xbf16> to vector<384x128xbf16>
    %cst_39 = arith.constant dense<0.000000e+00> : vector<128x128xf32>
    %192 = tpu.matmul %188, %191, %cst_39 {dimension_numbers = #tpu.dot_dimension_numbers<[1], [0], [0], [1], [0, 0, 1, 1], [], []>} : vector<128x384xbf16>, vector<384x128xbf16>, vector<128x128xf32> -> vector<128x128xf32>
    %193 = arith.index_cast %arg1 : i32 to index
    %c0_40 = arith.constant 0 : index
    %c0_41 = arith.constant 0 : index
    %194 = vector.load %arg13[%193, %c0_40, %c0_41] : memref<2x1x128xf32, #tpu.memory_space<vmem>>, vector<1x1x128xf32>
    %195 = vector.shape_cast %194 : vector<1x1x128xf32> to vector<1x128xf32>
    %196 = vector.broadcast %195 : vector<1x128xf32> to vector<128x128xf32>
    %197 = arith.addf %192, %196 : vector<128x128xf32>
    %198 = vector.shape_cast %197 : vector<128x128xf32> to vector<16x8x128xf32>
    %c0_42 = arith.constant 0 : index
    %c0_43 = arith.constant 0 : index
    %c0_44 = arith.constant 0 : index
    %199 = vector.load %arg16[%c0_42, %c0_43, %c0_44] : memref<16x8x128xf32, #tpu.memory_space<vmem>>, vector<16x8x128xf32>
    %c0_45 = arith.constant 0 : index
    %c0_46 = arith.constant 0 : index
    %200 = vector.load %arg14[%c0_45, %c0_46] : memref<1x128xf32, #tpu.memory_space<vmem>>, vector<1x128xf32>
    %c0_47 = arith.constant 0 : index
    %c0_48 = arith.constant 0 : index
    %201 = vector.load %arg15[%c0_47, %c0_48] : memref<1x128xf32, #tpu.memory_space<vmem>>, vector<1x128xf32>
    %cst_49 = arith.constant dense<0.000000e+00> : vector<16x8xf32>
    %202 = vector.multi_reduction <add>, %198, %cst_49 [2] : vector<16x8x128xf32> to vector<16x8xf32>
    %203 = vector.shape_cast %202 : vector<16x8xf32> to vector<16x8x1xf32>
    %cst_50 = arith.constant 1.280000e+02 : f32
    %204 = vector.broadcast %cst_50 : f32 to vector<16x8x1xf32>
    %205 = arith.divf %203, %204 : vector<16x8x1xf32>
    %206 = vector.broadcast %205 : vector<16x8x1xf32> to vector<16x8x128xf32>
    %207 = arith.subf %198, %206 : vector<16x8x128xf32>
    %208 = arith.mulf %207, %207 : vector<16x8x128xf32>
    %cst_51 = arith.constant dense<0.000000e+00> : vector<16x8xf32>
    %209 = vector.multi_reduction <add>, %208, %cst_51 [2] : vector<16x8x128xf32> to vector<16x8xf32>
    %210 = vector.shape_cast %209 : vector<16x8xf32> to vector<16x8x1xf32>
    %cst_52 = arith.constant 1.280000e+02 : f32
    %211 = vector.broadcast %cst_52 : f32 to vector<16x8x1xf32>
    %212 = arith.divf %210, %211 : vector<16x8x1xf32>
    %213 = vector.broadcast %205 : vector<16x8x1xf32> to vector<16x8x128xf32>
    %214 = arith.subf %198, %213 : vector<16x8x128xf32>
    %cst_53 = arith.constant 9.99999974E-6 : f32
    %215 = vector.broadcast %cst_53 : f32 to vector<16x8x1xf32>
    %216 = arith.addf %212, %215 : vector<16x8x1xf32>
    %217 = math.rsqrt %216 : vector<16x8x1xf32>
    %218 = vector.broadcast %217 : vector<16x8x1xf32> to vector<16x8x128xf32>
    %219 = arith.mulf %214, %218 : vector<16x8x128xf32>
    %220 = vector.shape_cast %200 : vector<1x128xf32> to vector<1x1x128xf32>
    %221 = vector.broadcast %220 : vector<1x1x128xf32> to vector<16x8x128xf32>
    %222 = arith.mulf %219, %221 : vector<16x8x128xf32>
    %223 = vector.shape_cast %201 : vector<1x128xf32> to vector<1x1x128xf32>
    %224 = vector.broadcast %223 : vector<1x1x128xf32> to vector<16x8x128xf32>
    %225 = arith.addf %222, %224 : vector<16x8x128xf32>
    %226 = arith.addf %199, %225 : vector<16x8x128xf32>
    %c0_54 = arith.constant 0 : index
    %c0_55 = arith.constant 0 : index
    %c0_56 = arith.constant 0 : index
    %227 = vector.load %arg16[%c0_54, %c0_55, %c0_56] : memref<16x8x128xf32, #tpu.memory_space<vmem>>, vector<16x8x128xf32>
    tpu.vector_store %arg16[%c0_54, %c0_55, %c0_56], %226 {strides = array<i32>} : memref<16x8x128xf32, #tpu.memory_space<vmem>>, vector<16x8x128xf32>,
    return
  }
  func.func @transform_0(%arg0: i32, %arg1: i32) -> (i32, i32, i32) {
    %c0_i32 = arith.constant 0 : i32
    %c0_i32_0 = arith.constant 0 : i32
    %c0_i32_1 = arith.constant 0 : i32
    return %arg0, %c0_i32, %c0_i32_0 : i32, i32, i32
  }
  func.func @transform_1(%arg0: i32, %arg1: i32) -> (i32, i32, i32) {
    %c0_i32 = arith.constant 0 : i32
    %c0_i32_0 = arith.constant 0 : i32
    %c0_i32_1 = arith.constant 0 : i32
    return %arg0, %c0_i32, %c0_i32_0 : i32, i32, i32
  }
  func.func @transform_2(%arg0: i32, %arg1: i32) -> (i32, i32, i32) {
    %c0_i32 = arith.constant 0 : i32
    %c0_i32_0 = arith.constant 0 : i32
    %c0_i32_1 = arith.constant 0 : i32
    %c0_i32_2 = arith.constant 0 : i32
    return %c0_i32, %c0_i32_0, %c0_i32_1 : i32, i32, i32
  }
  func.func @transform_3(%arg0: i32, %arg1: i32) -> (i32, i32, i32) {
    %c0_i32 = arith.constant 0 : i32
    %c0_i32_0 = arith.constant 0 : i32
    %c0_i32_1 = arith.constant 0 : i32
    %c0_i32_2 = arith.constant 0 : i32
    return %c0_i32, %c0_i32_0, %c0_i32_1 : i32, i32, i32
  }
  func.func @transform_4(%arg0: i32, %arg1: i32) -> (i32, i32, i32) {
    %c0_i32 = arith.constant 0 : i32
    %c0_i32_0 = arith.constant 0 : i32
    %c0_i32_1 = arith.constant 0 : i32
    %c0_i32_2 = arith.constant 0 : i32
    return %c0_i32, %c0_i32_0, %c0_i32_1 : i32, i32, i32
  }
  func.func @transform_5(%arg0: i32, %arg1: i32) -> (i32, i32, i32) {
    %c0_i32 = arith.constant 0 : i32
    %c0_i32_0 = arith.constant 0 : i32
    %c0_i32_1 = arith.constant 0 : i32
    %c0_i32_2 = arith.constant 0 : i32
    return %c0_i32, %c0_i32_0, %c0_i32_1 : i32, i32, i32
  }
  func.func @transform_6(%arg0: i32, %arg1: i32) -> (i32, i32, i32) {
    %c0_i32 = arith.constant 0 : i32
    %c0_i32_0 = arith.constant 0 : i32
    %c0_i32_1 = arith.constant 0 : i32
    %c0_i32_2 = arith.constant 0 : i32
    return %c0_i32, %c0_i32_0, %c0_i32_1 : i32, i32, i32
  }
  func.func @transform_7(%arg0: i32, %arg1: i32) -> (i32, i32, i32) {
    %c0_i32 = arith.constant 0 : i32
    %c0_i32_0 = arith.constant 0 : i32
    %c0_i32_1 = arith.constant 0 : i32
    %c0_i32_2 = arith.constant 0 : i32
    return %c0_i32, %c0_i32_0, %c0_i32_1 : i32, i32, i32
  }
  func.func @transform_8(%arg0: i32, %arg1: i32) -> (i32, i32, i32) {
    %c0_i32 = arith.constant 0 : i32
    %c0_i32_0 = arith.constant 0 : i32
    %c0_i32_1 = arith.constant 0 : i32
    %c0_i32_2 = arith.constant 0 : i32
    return %c0_i32, %c0_i32_0, %c0_i32_1 : i32, i32, i32
  }
  func.func @transform_9(%arg0: i32, %arg1: i32) -> (i32, i32, i32) {
    %c0_i32 = arith.constant 0 : i32
    %c0_i32_0 = arith.constant 0 : i32
    %c0_i32_1 = arith.constant 0 : i32
    %c0_i32_2 = arith.constant 0 : i32
    return %c0_i32, %c0_i32_0, %c0_i32_1 : i32, i32, i32
  }
  func.func @transform_10(%arg0: i32, %arg1: i32) -> (i32, i32, i32) {
    %c0_i32 = arith.constant 0 : i32
    %c0_i32_0 = arith.constant 0 : i32
    %c0_i32_1 = arith.constant 0 : i32
    %c0_i32_2 = arith.constant 0 : i32
    return %c0_i32, %c0_i32_0, %c0_i32_1 : i32, i32, i32
  }
  func.func @transform_11(%arg0: i32, %arg1: i32) -> (i32, i32, i32) {
    %c0_i32 = arith.constant 0 : i32
    %c0_i32_0 = arith.constant 0 : i32
    %c0_i32_1 = arith.constant 0 : i32
    %c0_i32_2 = arith.constant 0 : i32
    return %c0_i32, %c0_i32_0, %c0_i32_1 : i32, i32, i32
  }
  func.func @transform_12(%arg0: i32, %arg1: i32) -> (i32, i32) {
    %c0_i32 = arith.constant 0 : i32
    %c0_i32_0 = arith.constant 0 : i32
    %c0_i32_1 = arith.constant 0 : i32
    return %c0_i32, %c0_i32_0 : i32, i32
  }
  func.func @transform_13(%arg0: i32, %arg1: i32) -> (i32, i32) {
    %c0_i32 = arith.constant 0 : i32
    %c0_i32_0 = arith.constant 0 : i32
    %c0_i32_1 = arith.constant 0 : i32
    return %c0_i32, %c0_i32_0 : i32, i32
  }
  func.func @transform_14(%arg0: i32, %arg1: i32) -> (i32, i32, i32) {
    %c0_i32 = arith.constant 0 : i32
    %c0_i32_0 = arith.constant 0 : i32
    %c0_i32_1 = arith.constant 0 : i32
    return %arg0, %c0_i32, %c0_i32_0 : i32, i32, i32
  }
}

</mosaic_0001>

<bundles_post_ra>
// kernel: gmlp_forward.1
= control target key start
LH: loop header
LB: loop body
LE: loop exit
PB: predicated region body
PF: predicated region fallthrough
CT: control target
= control target key end

     0   :  { %s8475_s0 = inlined_call_operand.vmem [shape: f32[32,8,1], index: 0, kind: input, shape index: {}]   ;;  %s8476_s1 = inlined_call_operand.vmem [shape: f32[32,8,128], index: 1, kind: input, shape index: {}]   ;;  %s8477_s2 = inlined_call_operand.vmem [shape: bf16[2,128,384], index: 2, kind: input, shape index: {}]   ;;  %s8478_s3 = inlined_call_operand.vmem [shape: f32[2,1,384], index: 3, kind: input, shape index: {}]   ;;  %s8479_s4 = inlined_call_operand.vmem [shape: bf16[2,128,384], index: 4, kind: input, shape index: {}]   ;;  %s8480_s5 = inlined_call_operand.vmem [shape: f32[2,1,384], index: 5, kind: input, shape index: {}]   ;;  %s8481_s6 = inlined_call_operand.vmem [shape: f32[2,1,384], index: 6, kind: input, shape index: {}]   ;;  %s8482_s7 = inlined_call_operand.vmem [shape: f32[2,1,384], index: 7, kind: input, shape index: {}]   ;;  %s8483_s8 = inlined_call_operand.vmem [shape: bf16[2,8,8], index: 8, kind: input, shape index: {}]   ;;  %s8484_s9 = inlined_call_operand.vmem [shape: f32[2,8,1], index: 9, kind: input, shape index: {}]   ;;  %s8485_s10 = inlined_call_operand.vmem [shape: bf16[2,384,128], index: 10, kind: input, shape index: {}]   ;;  %s8486_s11 = inlined_call_operand.vmem [shape: f32[2,1,128], index: 11, kind: input, shape index: {}]   ;;  %s8487_s12 = inlined_call_operand.vmem [shape: f32[1,128], index: 12, kind: input, shape index: {}]   ;;  %s8488_s13 = inlined_call_operand.vmem [shape: f32[1,128], index: 13, kind: input, shape index: {}]   ;;  %s8489_s14 = inlined_call_operand.hbm [shape: f32[32,8,128], index: 14, kind: output, shape index: {}]  }
   0x1   :  { %8565 = sst [smem:[#allocation87_spill]] %s8475_s0 }
   0x2   :  { %8566 = sst [smem:[#allocation88_spill]] %s8489_s14 }
   0x3   :  { %19 = vsyncpa [#allocation3], 0 }
   0x4   :  { %21 = vsyncpa [#allocation3 + $0x1], 0  ;;  %s5838_s29 = smov 0   ;;  %s5840_s30 = smov 0  }
   0x5   :  { %s5842_s15 = smov 0   ;;  %s5844_s16 = smov 0  }
   0x6   :  { %s5846_s17 = smov 0   ;;  %s5848_s18 = smov 0  }
   0x7   :  { %s5850_s19 = smov 0   ;;  %s5852_s20 = smov 0  }
   0x8 LB: > { %8567 = sst [smem:[#allocation5_spill]] %s5729_s29  ;;  %s4856_s21 = sadd.s32 4294967295, %s5757_s20   ;;  %s5757_s20 = sphi %s5852_s20, %s27_s20   ;;  %s5753_s19 = sphi %s5850_s19, %s8819_s19   ;;  %s5749_s18 = sphi %s5848_s18, %s8818_s18   ;;  %s5745_s17 = sphi %s5846_s17, %s8817_s17   ;;  %s5741_s16 = sphi %s5844_s16, %s8816_s16   ;;  %s5737_s15 = sphi %s5842_s15, %s8822_s15   ;;  %s5733_s30 = sphi %s5840_s30, %s8821_s30   ;;  %s5729_s29 = sphi %s5838_s29, %s8820_s29  }
   0x9   : > { %8568 = sst [smem:[#allocation6_spill]] %s5749_s18  ;;  %s4857_s22 = sadd.s32 4294967294, %s5757_s20  }
   0xa   : > { %8569 = sst [smem:[#allocation7_spill]] %s5753_s19  ;;  %s36_s23 = sadd.s32 1, %s5749_s18 }
   0xb   : > { %8570 = sst [smem:[#allocation8_spill]] %s5757_s20  ;;  %p37_p0 = scmp.ge.s32.totalorder %s36_s23, 2 }
   0xc   : > { %s39_s24 = sadd.s32 1, %s5753_s19  ;;  %p360_p1 = scmp.ne.s32.totalorder %s5737_s15, %s5733_s30 }
   0xd   : > { %p361_p2 = scmp.eq.s32.totalorder %s4856_s21, 3  ;;  %s8824_s23 = smov (%p37_p0, %s36_s23), 0 }
   0xe   : > { %8571 = sst [smem:[#allocation9_spill]] %s8824_s23  ;;  %s8826_s24 = smov (!%p37_p0, %s39_s24), %s5753_s19 }
   0xf   : > { %p5887_p3 = por %p361_p2, %p360_p1  ;;  %p366_p4 = scmp.ne.s32.totalorder %s5733_s30, %s5729_s29 }
  0x10   : > { %p41_p5 = scmp.ge.s32.totalorder %s8826_s24, 2  ;;  %p367_p6 = scmp.eq.s32.totalorder %s4857_s22, 3 }
  0x11   : > { %p4860_p7 = scmp.ge.s32.totalorder %s5757_s20, 1  ;;  %p439_p8 = scmp.lt.s32.totalorder %s5757_s20, 5 }
  0x12   : > { %s8828_s24 = smov (%p41_p5, %s8826_s24), 0  ;;  %p5897_p9 = por %p367_p6, %p366_p4 }
  0x13   : > { %8573 = sst [smem:[#allocation10_spill]] %s8828_s24  ;;  %p440_p10 = pnand %p4860_p7, %p439_p8 }
  0x14   : > { %s8574_s26 = scalar_select %p5897_p9, 1, 0 }
  0x15   : > { %s347_s27 = ssub.s32 %s5753_s19, %s8828_s24  ;;  %s350_s28 = sadd.s32 1, %s5737_s15 }
  0x16   : > { %8575 = sst [smem:[#allocation11_spill]] %s8574_s26  ;;  %p348_p11 = scmp.eq.s32.totalorder %s347_s27, 0 }
  0x17   : > { %443 = sbr.rel (%p440_p10) target bundleno = 1558 (0x616), region = 76 }
  0x18   : > { %s5905_s21 = scalar_select %p348_p11, %s5737_s15, %s350_s28  }
  0x1c   : > { %s487_s22 = sand.u32 1, %s5733_s30   ;;  %s4862_s23 = sshll.u32 %s5745_s17, 4 }
  0x1d   : > { %s4861_s18 = sshll.u32 %s487_s22, 7  ;;  %p491_p12 = scmp.lt.s32.totalorder %s4862_s23, 31 }
  0x1e   : > { %s8576_s0 = sld [smem:[#allocation87_spill]]  ;;  %s5921_s19 = scalar_lea.vmem [#allocation2], %s4861_s18 }
  0x1f   : > { %s8830_s23 = smov (!%p491_p12, %s4862_s23), 31  ;;  %p4866_p13 = scmp.ne.s32.totalorder %s5741_s16, 0 }
  0x20   : > { %s4863_s29 = sshll.u32 %s8830_s23, 3 }
  0x21   : > { %s5919_s28 = scalar_lea.vmem %s8476_s1, %s4863_s29  ;;  %507 = sbr.rel (%p4866_p13) target bundleno = 47 (0x2f), region = 80 }
  0x24   : > { %s5914_s26 = scalar_lea.vmem %s8576_s0, %s4863_s29 }
  0x26   : > { %v508_v0 = vld [vmem:[%s5919_s28] sm:$0xff]  ;;  %v509_v1 = vld [vmem:[%s5919_s28 + $0x8] sm:$0xff]  ;;  %v510_v2 = vld [vmem:[%s5919_s28 + $0x10] sm:$0xff] }
  0x27   : > { %524 = vst [vmem:[%s5921_s19] sm:$0xff] %v508_v0  ;;  %525 = vst [vmem:[%s5921_s19 + $0x8] sm:$0xff] %v509_v1  ;;  %v511_v3 = vld [vmem:[%s5919_s28 + $0x18] sm:$0xff]  ;;  %v512_v4 = vld [vmem:[%s5919_s28 + $0x20] sm:$0xff] }
  0x28   : > { %526 = vst [vmem:[%s5921_s19 + $0x10] sm:$0xff] %v510_v2  ;;  %v513_v5 = vld [vmem:[%s5919_s28 + $0x28] sm:$0xff]  ;;  %527 = vst [vmem:[%s5921_s19 + $0x18] sm:$0xff] %v511_v3  ;;  %v514_v6 = vld [vmem:[%s5919_s28 + $0x30] sm:$0xff] }
  0x29   : > { %528 = vst [vmem:[%s5921_s19 + $0x20] sm:$0xff] %v512_v4  ;;  %529 = vst [vmem:[%s5921_s19 + $0x28] sm:$0xff] %v513_v5  ;;  %v515_v7 = vld [vmem:[%s5919_s28 + $0x38] sm:$0xff]  ;;  %v516_v8 = vld [vmem:[%s5919_s28 + $0x40] sm:$0xff] }
  0x2a   : > { %530 = vst [vmem:[%s5921_s19 + $0x30] sm:$0xff] %v514_v6  ;;  %531 = vst [vmem:[%s5921_s19 + $0x38] sm:$0xff] %v515_v7  ;;  %v517_v9 = vld [vmem:[%s5919_s28 + $0x48] sm:$0xff]  ;;  %v518_v10 = vld [vmem:[%s5919_s28 + $0x50] sm:$0xff] }
  0x2b   : > { %532 = vst [vmem:[%s5921_s19 + $0x40] sm:$0xff] %v516_v8  ;;  %v519_v11 = vld [vmem:[%s5919_s28 + $0x58] sm:$0xff]  ;;  %533 = vst [vmem:[%s5921_s19 + $0x48] sm:$0xff] %v517_v9  ;;  %v520_v12 = vld [vmem:[%s5919_s28 + $0x60] sm:$0xff] }
  0x2c   : > { %534 = vst [vmem:[%s5921_s19 + $0x50] sm:$0xff] %v518_v10  ;;  %535 = vst [vmem:[%s5921_s19 + $0x58] sm:$0xff] %v519_v11  ;;  %v521_v13 = vld [vmem:[%s5919_s28 + $0x68] sm:$0xff]  ;;  %v522_v14 = vld [vmem:[%s5919_s28 + $0x70] sm:$0xff] }
  0x2d   : > { %536 = vst [vmem:[%s5921_s19 + $0x60] sm:$0xff] %v520_v12  ;;  %537 = vst [vmem:[%s5921_s19 + $0x68] sm:$0xff] %v521_v13  ;;  %v523_v15 = vld [vmem:[%s5919_s28 + $0x78] sm:$0xff] }
  0x2e   : > { %538 = vst [vmem:[%s5921_s19 + $0x70] sm:$0xff] %v522_v14  ;;  %539 = vst [vmem:[%s5921_s19 + $0x78] sm:$0xff] %v523_v15 }
  0x2f PF: > { %s5957_s14 = smul.u32 192, %s5741_s16  ;;  %v540_v16 = vld [vmem:[%s5921_s19] sm:$0xff]  ;;  %v541_v17 = vld [vmem:[%s5921_s19 + $0x8] sm:$0xff]  ;;  %v8498_v18 = vmov 0   ;;  %v542_v44 = vld [vmem:[%s5921_s19 + $0x10] sm:$0xff]  ;;  %vm2886_vm0 = vcmask 1043456   ;;  %s4137_s23 = scalar_lea.vmem %s8486_s11, %s5741_s16 }
  0x30   : > { %794 = vmatprep.mubr.bf16.mxu0 %v8498_v18  ;;  %v5962_v19 = vpack.c.bf16 %v541_v17, %v540_v16  ;;  %5303 = vset.pattern.permute.xlu1 %v8498_v18  ;;  %v543_v45 = vld [vmem:[%s5921_s19 + $0x18] sm:$0xff]  ;;  %v544_v47 = vld [vmem:[%s5921_s19 + $0x20] sm:$0xff]  ;;  %v545_v49 = vld [vmem:[%s5921_s19 + $0x28] sm:$0xff]  ;;  %vm2882_vm1 = vcmask 64512  }
  0x31   : > { %s5969_s20 = scalar_lea.vmem %s8477_s2, %s5957_s14  ;;  %5302 = vset.pattern.permute.xlu0 %v8498_v18  ;;  %s5994_s27 = scalar_lea.vmem %s8479_s4, %s5957_s14  ;;  %v6011_v50 = vpack.c.bf16 %v543_v45, %v542_v44  ;;  %v6015_v53 = vpack.c.bf16 %v545_v49, %v544_v47  ;;  %v546_v54 = vld [vmem:[%s5921_s19 + $0x30] sm:$0xff]  ;;  %v547_v55 = vld [vmem:[%s5921_s19 + $0x38] sm:$0xff] }
  0x32   : > { %v5304_v20 = vld [vmem:[%s5969_s20 + $0xac] ss:$12 sps:$4 sm:$0xff]   ;;  %5132 = vmatprep.mubr.bf16.mxu1 %v5962_v19  ;;  %v5306_v21 = vld [vmem:[%s5969_s20 + $0xb0] ss:$12 sps:$4 sm:$0xff]   ;;  %v5307_v22 = vld [vmem:[%s5969_s20 + $0xa8] ss:$12 sps:$4 sm:$0xff]   ;;  %s6036_s18 = scalar_lea.vmem %s8485_s10, %s5957_s14  ;;  %v6038_v61 = vpack.c.bf16 %v547_v55, %v546_v54 }
  0x33   : > { %762 = vmatprep.subr.bf16.mxu0 %v5304_v20  ;;  %5116 = vmatprep.subr.bf16.mxu1 %v5306_v21  ;;  %v5308_v23 = vld [vmem:[%s5969_s20 + $0x94] ss:$12 sps:$4 sm:$0xff]   ;;  %v5310_v24 = vld [vmem:[%s5969_s20 + $0x98] ss:$12 sps:$4 sm:$0xff]   ;;  %v5311_v25 = vld [vmem:[%s5969_s20 + $0x90] ss:$12 sps:$4 sm:$0xff]  }
  0x34   : > { %763 = vmatpush1.bf16.msra.mxu0 %v5307_v22  ;;  %5117 = vmatpush3.bf16.msra.mxu1 %v5306_v21  ;;  %v5312_v26 = vld [vmem:[%s5969_s20 + $0x7c] ss:$12 sps:$4 sm:$0xff]   ;;  %v5314_v27 = vld [vmem:[%s5969_s20 + $0x80] ss:$12 sps:$4 sm:$0xff]   ;;  %v5315_v28 = vld [vmem:[%s5969_s20 + $0x78] ss:$12 sps:$4 sm:$0xff]  }
  0x35   : > { %764 = vmatprep.subr.bf16.mxu0 %v5308_v23  ;;  %5118 = vmatprep.subr.bf16.mxu1 %v5310_v24  ;;  %v5316_v29 = vld [vmem:[%s5969_s20 + $0x64] ss:$12 sps:$4 sm:$0xff]   ;;  %v5318_v30 = vld [vmem:[%s5969_s20 + $0x68] ss:$12 sps:$4 sm:$0xff]   ;;  %v5319_v31 = vld [vmem:[%s5969_s20 + $0x60] ss:$12 sps:$4 sm:$0xff]  }
  0x36   : > { %v5320_v32 = vld [vmem:[%s5969_s20 + $0x4c] ss:$12 sps:$4 sm:$0xff]   ;;  %v5322_v33 = vld [vmem:[%s5969_s20 + $0x50] ss:$12 sps:$4 sm:$0xff]   ;;  %v5323_v34 = vld [vmem:[%s5969_s20 + $0x48] ss:$12 sps:$4 sm:$0xff]  }
  0x37   : > { %v5324_v35 = vld [vmem:[%s5969_s20 + $0x34] ss:$12 sps:$4 sm:$0xff]   ;;  %v5326_v36 = vld [vmem:[%s5969_s20 + $0x38] ss:$12 sps:$4 sm:$0xff]   ;;  %v5327_v37 = vld [vmem:[%s5969_s20 + $0x30] ss:$12 sps:$4 sm:$0xff]  }
  0x38   : > { %765 = vmatpush1.bf16.msra.mxu0 %v5311_v25  ;;  %5119 = vmatpush3.bf16.msra.mxu1 %v5310_v24  ;;  %v5328_v38 = vld [vmem:[%s5969_s20 + $0x1c] ss:$12 sps:$4 sm:$0xff]   ;;  %v5330_v39 = vld [vmem:[%s5969_s20 + $0x20] ss:$12 sps:$4 sm:$0xff]   ;;  %v5331_v40 = vld [vmem:[%s5969_s20 + $0x18] ss:$12 sps:$4 sm:$0xff]  }
  0x39   : > { %766 = vmatprep.subr.bf16.mxu0 %v5312_v26  ;;  %5120 = vmatprep.subr.bf16.mxu1 %v5314_v27  ;;  %v5332_v41 = vld [vmem:[%s5969_s20 + $0x4] ss:$12 sps:$4 sm:$0xff]   ;;  %v5334_v42 = vld [vmem:[%s5969_s20 + $0x8] ss:$12 sps:$4 sm:$0xff]   ;;  %v5335_v43 = vld [vmem:[%s5969_s20] ss:$12 sps:$4 sm:$0xff]  }
  0x3a   : > { %v5338_v46 = vld [vmem:[%s5994_s27 + $0xac] ss:$12 sps:$4 sm:$0xff]   ;;  %v6008_v48 = vld [vmem:[%s5994_s27 + $0xb0] ss:$12 sps:$4 sm:$0xff]   ;;  %v5336_v51 = vld [vmem:[%s5994_s27 + $0xa8] ss:$12 sps:$4 sm:$0xff]  }
  0x3b   : > { %v5341_v52 = vld [vmem:[%s5994_s27 + $0x94] ss:$12 sps:$4 sm:$0xff]   ;;  %v6023_v56 = vld [vmem:[%s5994_s27 + $0x98] ss:$12 sps:$4 sm:$0xff]   ;;  %v5339_v57 = vld [vmem:[%s5994_s27 + $0x90] ss:$12 sps:$4 sm:$0xff]  }
  0x3c   : > { %767 = vmatpush1.bf16.msra.mxu0 %v5315_v28  ;;  %5121 = vmatpush3.bf16.msra.mxu1 %v5314_v27  ;;  %v548_v58 = vld [vmem:[%s5921_s19 + $0x40] sm:$0xff]  ;;  %v5344_v59 = vld [vmem:[%s5994_s27 + $0x7c] ss:$12 sps:$4 sm:$0xff]   ;;  %v550_v3 = vld [vmem:[%s5921_s19 + $0x50] sm:$0xff]  ;;  %s6185_s14 = smul.u32 3, %s5741_s16  ;;  %s4918_s20 = sshll.u32 %s5741_s16, 3 }
  0x3d   : > { %768 = vmatprep.subr.bf16.mxu0 %v5316_v29  ;;  %5122 = vmatprep.subr.bf16.mxu1 %v5318_v30  ;;  %v549_v60 = vld [vmem:[%s5921_s19 + $0x48] sm:$0xff]  ;;  %v5342_v62 = vld [vmem:[%s5994_s27 + $0x78] ss:$12 sps:$4 sm:$0xff]   ;;  %v5354_v11 = vld [vmem:[%s5994_s27 + $0x34] ss:$12 sps:$4 sm:$0xff]   ;;  %s2875_s28 = scalar_lea.vmem %s8484_s9, %s4918_s20 }
  0x3e   : > { %v5347_v63 = vld [vmem:[%s5994_s27 + $0x64] ss:$12 sps:$4 sm:$0xff]   ;;  %v6044_v0 = vld [vmem:[%s5994_s27 + $0x80] ss:$12 sps:$4 sm:$0xff]   ;;  %v6046_v1 = vpack.c.bf16 %v549_v60, %v548_v58  ;;  %v551_v4 = vld [vmem:[%s5921_s19 + $0x58] sm:$0xff]  ;;  %s6193_s24 = scalar_lea.vmem %s8478_s3, %s6185_s14  ;;  %s1438_s29 = scalar_lea.vmem %s8480_s5, %s6185_s14 }
  0x3f   : > { %v5345_v2 = vld [vmem:[%s5994_s27 + $0x60] ss:$12 sps:$4 sm:$0xff]   ;;  %v6053_v5 = vld [vmem:[%s5994_s27 + $0x68] ss:$12 sps:$4 sm:$0xff]   ;;  %v6064_v10 = vpack.c.bf16 %v551_v4, %v550_v3  ;;  %v5364_v13 = vld [vmem:[%s5994_s27 + $0x50] ss:$12 sps:$4 sm:$0xff]   ;;  %s2226_s20 = scalar_lea.vmem %s8481_s6, %s6185_s14 }
  0x40   : > { %769 = vmatpush1.bf16.msra.mxu0 %v5319_v31  ;;  %5123 = vmatpush3.bf16.msra.mxu1 %v5318_v30  ;;  %v5350_v6 = vld [vmem:[%s5994_s27 + $0x4c] ss:$12 sps:$4 sm:$0xff]   ;;  %v552_v7 = vld [vmem:[%s5921_s19 + $0x60] sm:$0xff]  ;;  %v5348_v9 = vld [vmem:[%s5994_s27 + $0x48] ss:$12 sps:$4 sm:$0xff]  }
  0x41   : > { %770 = vmatprep.subr.bf16.mxu0 %v5320_v32  ;;  %5124 = vmatprep.subr.bf16.mxu1 %v5322_v33  ;;  %v553_v8 = vld [vmem:[%s5921_s19 + $0x68] sm:$0xff]  ;;  %v5352_v14 = vld [vmem:[%s5994_s27 + $0x30] ss:$12 sps:$4 sm:$0xff]   ;;  %v5355_v21 = vld [vmem:[%s5994_s27 + $0x18] ss:$12 sps:$4 sm:$0xff]  }
  0x42   : > { %v6069_v12 = vpack.c.bf16 %v553_v8, %v552_v7  ;;  %v554_v15 = vld [vmem:[%s5921_s19 + $0x70] sm:$0xff]  ;;  %v555_v16 = vld [vmem:[%s5921_s19 + $0x78] sm:$0xff]  ;;  %v5359_v24 = vld [vmem:[%s5994_s27] ss:$12 sps:$4 sm:$0xff]  }
  0x43   : > { %v5357_v17 = vld [vmem:[%s5994_s27 + $0x1c] ss:$12 sps:$4 sm:$0xff]   ;;  %v6081_v20 = vpack.c.bf16 %v555_v16, %v554_v15  ;;  %v5361_v22 = vld [vmem:[%s5994_s27 + $0x4] ss:$12 sps:$4 sm:$0xff]   ;;  %v5366_v25 = vld [vmem:[%s5994_s27 + $0x20] ss:$12 sps:$4 sm:$0xff]  }
  0x44   : > { %771 = vmatpush1.bf16.msra.mxu0 %v5323_v34  ;;  %5125 = vmatpush3.bf16.msra.mxu1 %v5322_v33  ;;  %v5365_v23 = vld [vmem:[%s5994_s27 + $0x38] ss:$12 sps:$4 sm:$0xff]   ;;  %v5367_v26 = vld [vmem:[%s5994_s27 + $0x8] ss:$12 sps:$4 sm:$0xff]   ;;  %v617_v3 = vld [vmem:[%s6193_s24] sm:$0x7] }
  0x45   : > { %772 = vmatprep.subr.bf16.mxu0 %v5324_v35  ;;  %5126 = vmatprep.subr.bf16.mxu1 %v5326_v36  ;;  %v566_v27 = vld [vmem:[%s5914_s26 + $0x10] sm:$0xff]  ;;  %v567_v28 = vld [vmem:[%s5914_s26 + $0x18] sm:$0xff]  ;;  %v564_v29 = vld [vmem:[%s5914_s26] sm:$0xff]  ;;  %s5760_s27 = smov [#allocation2]  }
  0x46   : > { %2697 = vperm.xlu0 %5302, %v564_v29   ;;  %v570_v30 = vld [vmem:[%s5914_s26 + $0x30] sm:$0xff]  ;;  %v568_v31 = vld [vmem:[%s5914_s26 + $0x20] sm:$0xff]  ;;  %v569_v32 = vld [vmem:[%s5914_s26 + $0x28] sm:$0xff] }
  0x48   : > { %773 = vmatpush1.bf16.msra.mxu0 %v5327_v37  ;;  %5127 = vmatpush3.bf16.msra.mxu1 %v5326_v36 }
  0x49   : > { %774 = vmatprep.subr.bf16.mxu0 %v5328_v38  ;;  %5128 = vmatprep.subr.bf16.mxu1 %v5330_v39 }
  0x4a   : > { %2729 = vperm.xlu0 %5302, %v568_v31  }
  0x4c   : > { %775 = vmatpush1.bf16.msra.mxu0 %v5331_v40  ;;  %5129 = vmatpush3.bf16.msra.mxu1 %v5330_v39 }
  0x4d   : > { %776 = vmatprep.subr.bf16.mxu0 %v5332_v41  ;;  %5130 = vmatprep.subr.bf16.mxu1 %v5334_v42 }
  0x4e   : > { %2737 = vperm.xlu0 %5302, %v569_v32  }
  0x50   : > { %777 = vmatpush1.bf16.msra.mxu0 %v5335_v43  ;;  %5131 = vmatpush3.bf16.msra.mxu1 %v5334_v42 }
  0x51   : > { %1584 = vmatprep.subr.bf16.mxu1 %v5338_v46  ;;  %5148 = vmatprep.subr.bf16.mxu0 %v6008_v48 }
  0x53   : > { %795 = vmatmul.mubr.bf16.vlgmr.msra.gmra.mxu0 %v5962_v19  ;;  %5133 = vmatmul.mubr.bf16.vlgmr.msra.gmra.mxu1 %v6011_v50 }
  0x54   : > { %1585 = vmatpush1.bf16.msra.mxu1 %v5336_v51  ;;  %804 = vmatprep.mubr.bf16.mxu0 %v8498_v18 }
  0x55   : > { %1586 = vmatprep.subr.bf16.mxu1 %v5341_v52  ;;  %5136 = vmatprep.mubr.bf16.mxu1 %v6015_v53 }
  0x56   : > { %5149 = vmatpush3.bf16.msra.mxu0 %v6008_v48 }
  0x57   : > { %5150 = vmatprep.subr.bf16.mxu0 %v6023_v56 }
  0x58   : > { %1587 = vmatpush1.bf16.msra.mxu1 %v5339_v57  ;;  %v619_v57 = vlaneseq }
  0x59   : > { %1588 = vmatprep.subr.bf16.mxu1 %v5344_v59 }
  0x5a   : > { %5151 = vmatpush3.bf16.msra.mxu0 %v6023_v56 }
  0x5b   : > { %805 = vmatmul.mubr.bf16.gmra.mxu0 %v6011_v50  ;;  %5137 = vmatmul.mubr.bf16.gmra.mxu1 %v6038_v61 }
  0x5c   : > { %1589 = vmatpush1.bf16.msra.mxu1 %v5342_v62  ;;  %814 = vmatprep.mubr.bf16.mxu0 %v8498_v18 }
  0x5d   : > { %1590 = vmatprep.subr.bf16.mxu1 %v5347_v63  ;;  %5140 = vmatprep.mubr.bf16.mxu1 %v6046_v1 }
  0x5e   : > { %5152 = vmatprep.subr.bf16.mxu0 %v6044_v0 }
  0x5f   : > { %5153 = vmatpush3.bf16.msra.mxu0 %v6044_v0 }
  0x60   : > { %1591 = vmatpush1.bf16.msra.mxu1 %v5345_v2  ;;  %5154 = vmatprep.subr.bf16.mxu0 %v6053_v5 }
  0x61   : > { %1592 = vmatprep.subr.bf16.mxu1 %v5350_v6 }
  0x63   : > { %815 = vmatmul.mubr.bf16.gmra.mxu0 %v6015_v53  ;;  %5141 = vmatmul.mubr.bf16.gmra.mxu1 %v6064_v10 }
  0x64   : > { %1593 = vmatpush1.bf16.msra.mxu1 %v5348_v9  ;;  %824 = vmatprep.mubr.bf16.mxu0 %v8498_v18 }
  0x65   : > { %1594 = vmatprep.subr.bf16.mxu1 %v5354_v11  ;;  %5144 = vmatprep.mubr.bf16.mxu1 %v6069_v12 }
  0x66   : > { %5155 = vmatpush3.bf16.msra.mxu0 %v6053_v5 }
  0x67   : > { %5156 = vmatprep.subr.bf16.mxu0 %v5364_v13 }
  0x68   : > { %1595 = vmatpush1.bf16.msra.mxu1 %v5352_v14 }
  0x69   : > { %1596 = vmatprep.subr.bf16.mxu1 %v5357_v17 }
  0x6a   : > { %5157 = vmatpush3.bf16.msra.mxu0 %v5364_v13 }
  0x6b   : > { %825 = vmatmul.mubr.bf16.gmra.mxu0 %v6038_v61  ;;  %5145 = vmatmul.mubr.bf16.gmra.mxu1 %v6081_v20 }
  0x6c   : > { %1597 = vmatpush1.bf16.msra.mxu1 %v5355_v21  ;;  %834 = vmatprep.mubr.bf16.mxu0 %v8498_v18 }
  0x6d   : > { %1598 = vmatprep.subr.bf16.mxu1 %v5361_v22  ;;  %1616 = vmatprep.mubr.bf16.mxu1 %v8498_v18 }
  0x6e   : > { %5158 = vmatprep.subr.bf16.mxu0 %v5365_v23 }
  0x6f   : > { %5159 = vmatpush3.bf16.msra.mxu0 %v5365_v23 }
  0x70   : > { %1599 = vmatpush1.bf16.msra.mxu1 %v5359_v24  ;;  %5160 = vmatprep.subr.bf16.mxu0 %v5366_v25 }
  0x71   : > { %5212 = vmatprep.subr.bf16.mxu1 %v6008_v48 }
  0x73   : > { %835 = vmatmul.mubr.bf16.gmra.mxu0 %v6046_v1  ;;  %1617 = vmatmul.mubr.bf16.vlgmr.msra.gmra.mxu1 %v5962_v19 }
  0x74   : > { %5220 = vmatpush3.bf16.msra.mxu1 %v6008_v48  ;;  %844 = vmatprep.mubr.bf16.mxu0 %v8498_v18 }
  0x75   : > { %1626 = vmatprep.mubr.bf16.mxu1 %v8498_v18  ;;  %5213 = vmatprep.subr.bf16.mxu1 %v6023_v56 }
  0x76   : > { %5161 = vmatpush3.bf16.msra.mxu0 %v5366_v25 }
  0x77   : > { %5162 = vmatprep.subr.bf16.mxu0 %v5367_v26 }
  0x78   : > { %5221 = vmatpush3.bf16.msra.mxu1 %v6023_v56 }
  0x79   : > { %5214 = vmatprep.subr.bf16.mxu1 %v6044_v0 }
  0x7a   : > { %5163 = vmatpush3.bf16.msra.mxu0 %v5367_v26 }
  0x7b   : > { %845 = vmatmul.mubr.bf16.gmra.mxu0 %v6064_v10  ;;  %1627 = vmatmul.mubr.bf16.gmra.mxu1 %v6011_v50 }
  0x7c   : > { %854 = vmatprep.mubr.bf16.mxu0 %v8498_v18  ;;  %1636 = vmatprep.mubr.bf16.mxu1 %v8498_v18 }
  0x7d   : > { %5222 = vmatpush3.bf16.msra.mxu1 %v6044_v0 }
  0x7e   : > { %5215 = vmatprep.subr.bf16.mxu1 %v6053_v5 }
  0x81   : > { %5223 = vmatpush3.bf16.msra.mxu1 %v6053_v5 }
  0x82   : > { %5216 = vmatprep.subr.bf16.mxu1 %v5364_v13 }
  0x83   : > { %855 = vmatmul.mubr.bf16.gmra.mxu0 %v6069_v12  ;;  %1637 = vmatmul.mubr.bf16.gmra.mxu1 %v6015_v53 }
  0x84   : > { %864 = vmatprep.mubr.bf16.mxu0 %v8498_v18  ;;  %1646 = vmatprep.mubr.bf16.mxu1 %v8498_v18 }
  0x85   : > { %5224 = vmatpush3.bf16.msra.mxu1 %v5364_v13 }
  0x86   : > { %5217 = vmatprep.subr.bf16.mxu1 %v5365_v23 }
  0x89   : > { %5225 = vmatpush3.bf16.msra.mxu1 %v5365_v23 }
  0x8a   : > { %5218 = vmatprep.subr.bf16.mxu1 %v5366_v25 }
  0x8b   : > { %865 = vmatmul.mubr.bf16.gmra.mxu0 %v6081_v20  ;;  %1647 = vmatmul.mubr.bf16.gmra.mxu1 %v6038_v61 }
  0x8c   : > { %1656 = vmatprep.mubr.bf16.mxu1 %v8498_v18  ;;  %5164 = vmatprep.mubr.bf16.mxu0 %v5962_v19  ;;  %v565_v19 = vld [vmem:[%s5914_s26 + $0x8] sm:$0xff] }
  0x8d   : > { %5226 = vmatpush3.bf16.msra.mxu1 %v5366_v25  ;;  %2705 = vperm.xlu1 %5303, %v565_v19  }
  0x8e   : > { %5219 = vmatprep.subr.bf16.mxu1 %v5367_v26 }
  0x91   : > { %5227 = vmatpush3.bf16.msra.mxu1 %v5367_v26  ;;  %2713 = vperm.xlu1 %5303, %v566_v27  }
  0x93   : > { %1657 = vmatmul.mubr.bf16.gmra.mxu1 %v6046_v1  ;;  %5165 = vmatmul.mubr.bf16.vlgmr.msra.gmra.mxu0 %v6011_v50 }
  0x94   : > { %1666 = vmatprep.mubr.bf16.mxu1 %v8498_v18  ;;  %5168 = vmatprep.mubr.bf16.mxu0 %v6015_v53 }
  0x95   : > { %2721 = vperm.xlu1 %5303, %v567_v28  }
  0x99   : > { %2745 = vperm.xlu1 %5303, %v570_v30  }
  0x9b   : > { %1667 = vmatmul.mubr.bf16.gmra.mxu1 %v6064_v10  ;;  %5169 = vmatmul.mubr.bf16.gmra.mxu0 %v6038_v61  ;;  %v620_v61 = vshrl.u32 %v619_v57, 7 }
  0x9c   : > { %1676 = vmatprep.mubr.bf16.mxu1 %v8498_v18  ;;  %3063 = vmatprep.mubr.bf16.mxu0 %v8498_v18 }
  0xa3   : > { %1677 = vmatmul.mubr.bf16.gmra.mxu1 %v6069_v12 }
  0xa4   : > { %1686 = vmatprep.mubr.bf16.mxu1 %v8498_v18 }
  0xab   : > { %1687 = vmatmul.mubr.bf16.gmra.mxu1 %v6081_v20 }
  0xac   : > { %5172 = vmatprep.mubr.bf16.mxu1 %v6046_v1  ;;  %v6197_v1 = vsub.s32 2, %v620_v61 }
  0xae   : > { %8601 = vst [vmem:[#allocation36_spill] sm:$0xff] %v6197_v1  ;;  %v6203_v6 = vrot.slane %v617_v3, %v6197_v1 }
  0xb0   : > { %8603 = vst [vmem:[#allocation38_spill] sm:$0xff] %v6203_v6 }
  0xb3   : > { %5173 = vmatmul.mubr.bf16.vlgmr.msra.gmra.mxu1 %v6064_v10 }
  0xb4   : > { %5176 = vmatprep.mubr.bf16.mxu1 %v6069_v12 }
  0xbb   : > { %5177 = vmatmul.mubr.bf16.gmra.mxu1 %v6081_v20 }
  0xbc   : > { %3104 = vmatprep.mubr.bf16.mxu1 %v8498_v18 }
 0x113   : > { %v6140_v33 = vpop.f32.mrf.mxu0  ;;  %v6142_v34 = vpop.f32.mrf.mxu1 }
 0x114   : > { %8577 = vst [vmem:[#allocation12_spill] sm:$0xff] %v6140_v33  ;;  %8578 = vst [vmem:[#allocation13_spill] sm:$0xff] %v6142_v34 }
 0x115   : > { %v6144_v35 = vpop.f32.mrf.mxu0  ;;  %v6146_v36 = vpop.f32.mrf.mxu1 }
 0x116   : > { %8579 = vst [vmem:[#allocation14_spill] sm:$0xff] %v6144_v35  ;;  %8580 = vst [vmem:[#allocation15_spill] sm:$0xff] %v6146_v36 }
 0x117   : > { %v6148_v37 = vpop.f32.mrf.mxu0  ;;  %v6150_v38 = vpop.f32.mrf.mxu1 }
 0x118   : > { %8581 = vst [vmem:[#allocation16_spill] sm:$0xff] %v6148_v37  ;;  %8582 = vst [vmem:[#allocation17_spill] sm:$0xff] %v6150_v38 }
 0x119   : > { %v6152_v39 = vpop.f32.mrf.mxu0  ;;  %v6154_v40 = vpop.f32.mrf.mxu1 }
 0x11a   : > { %8583 = vst [vmem:[#allocation18_spill] sm:$0xff] %v6152_v39  ;;  %8584 = vst [vmem:[#allocation19_spill] sm:$0xff] %v6154_v40 }
 0x11b   : > { %v6156_v41 = vpop.f32.mrf.mxu0  ;;  %v6158_v42 = vpop.f32.mrf.mxu1 }
 0x11c   : > { %8585 = vst [vmem:[#allocation20_spill] sm:$0xff] %v6156_v41  ;;  %8586 = vst [vmem:[#allocation21_spill] sm:$0xff] %v6158_v42 }
 0x11d   : > { %v6160_v43 = vpop.f32.mrf.mxu1  ;;  %v6162_v44 = vpop.f32.mrf.mxu0 }
 0x11e   : > { %8587 = vst [vmem:[#allocation22_spill] sm:$0xff] %v6160_v43  ;;  %8588 = vst [vmem:[#allocation23_spill] sm:$0xff] %v6162_v44 }
 0x11f   : > { %v6164_v45 = vpop.f32.mrf.mxu1  ;;  %v6168_v47 = vpop.f32.mrf.mxu0 }
 0x120   : > { %8589 = vst [vmem:[#allocation24_spill] sm:$0xff] %v6164_v45  ;;  %8591 = vst [vmem:[#allocation26_spill] sm:$0xff] %v6168_v47 }
 0x121   : > { %v6166_v46 = vpop.f32.mrf.mxu1  ;;  %v6174_v50 = vpop.f32.mrf.mxu0 }
 0x122   : > { %8590 = vst [vmem:[#allocation25_spill] sm:$0xff] %v6166_v46  ;;  %8594 = vst [vmem:[#allocation29_spill] sm:$0xff] %v6174_v50 }
 0x123   : > { %v6170_v48 = vpop.f32.mrf.mxu1  ;;  %v6180_v53 = vpop.f32.mrf.mxu0 }
 0x124   : > { %8592 = vst [vmem:[#allocation27_spill] sm:$0xff] %v6170_v48  ;;  %8597 = vst [vmem:[#allocation32_spill] sm:$0xff] %v6180_v53 }
 0x125   : > { %v6172_v49 = vpop.f32.mrf.mxu1  ;;  %v6182_v56 = vpop.f32.mrf.mxu0 }
 0x126   : > { %8593 = vst [vmem:[#allocation28_spill] sm:$0xff] %v6172_v49  ;;  %8598 = vst [vmem:[#allocation33_spill] sm:$0xff] %v6182_v56 }
 0x127   : > { %v6176_v51 = vpop.f32.mrf.mxu1  ;;  %v6187_v60 = vpop.f32.mrf.mxu0 }
 0x128   : > { %8595 = vst [vmem:[#allocation30_spill] sm:$0xff] %v6176_v51  ;;  %8599 = vst [vmem:[#allocation34_spill] sm:$0xff] %v6187_v60 }
 0x129   : > { %v6178_v52 = vpop.f32.mrf.mxu1  ;;  %v6195_v0 = vpop.f32.mrf.mxu0 }
 0x12a   : > { %8596 = vst [vmem:[#allocation31_spill] sm:$0xff] %v6178_v52  ;;  %8600 = vst [vmem:[#allocation35_spill] sm:$0xff] %v6195_v0 }
 0x12b   : > { %v5146_v54 = vpop.f32.mrf.mxu1  ;;  %v6200_v5 = vpop.f32.mrf.mxu0 }
 0x12c   : > { %8602 = vst [vmem:[#allocation37_spill] sm:$0xff] %v6200_v5  ;;  %v6206_v8 = vadd.f32 %v5146_v54, %v6203_v6 }
 0x12d   : > { %v957_v55 = vpop.f32.mrf.mxu1  ;;  %v6208_v10 = vpop.f32.mrf.mxu0 }
 0x12e   : > { %8604 = vst [vmem:[#allocation39_spill] sm:$0xff] %v6206_v8  ;;  %8605 = vst [vmem:[#allocation40_spill] sm:$0xff] %v6208_v10  ;;  %v6211_v12 = vadd.f32 %v957_v55, %v6203_v6 }
 0x12f   : > { %v5147_v58 = vpop.f32.mrf.mxu1  ;;  %v6213_v13 = vpop.f32.mrf.mxu0 }
 0x130   : > { %8606 = vst [vmem:[#allocation41_spill] sm:$0xff] %v6211_v12  ;;  %8607 = vst [vmem:[#allocation42_spill] sm:$0xff] %v6213_v13  ;;  %v6216_v15 = vadd.f32 %v5147_v58, %v6203_v6 }
 0x131   : > { %v960_v59 = vpop.f32.mrf.mxu1  ;;  %v6221_v17 = vpop.f32.mrf.mxu0 }
 0x132   : > { %8608 = vst [vmem:[#allocation43_spill] sm:$0xff] %v6216_v15  ;;  %v6219_v16 = vadd.f32 %v960_v59, %v6203_v6  ;;  %8610 = vst [vmem:[#allocation45_spill] sm:$0xff] %v6221_v17 }
 0x133   : > { %v1618_v62 = vpop.f32.mrf.mxu1  ;;  %v6223_v21 = vpop.f32.mrf.mxu0 }
 0x134   : > { %8609 = vst [vmem:[#allocation44_spill] sm:$0xff] %v6219_v16  ;;  %8611 = vst [vmem:[#allocation46_spill] sm:$0xff] %v6223_v21  ;;  %v6263_v16 = vld [vmem:[%s1438_s29] sm:$0x7]  ;;  %s4752_s29 = sshll.u32 %s5921_s19, 4  ;;  %s8418_s29 = int_to_ptr.vmem [resolvable:$true] %s4752_s29 }
 0x135   : > { %v1620_v63 = vpop.f32.mrf.mxu1  ;;  %v6225_v23 = vpop.f32.mrf.mxu0 }
 0x136   : > { %8612 = vst [vmem:[#allocation47_spill] sm:$0xff] %v6225_v23 }
 0x137   : > { %v1622_v2 = vpop.f32.mrf.mxu1  ;;  %v6227_v25 = vpop.f32.mrf.mxu0 }
 0x138   : > { %8613 = vst [vmem:[#allocation48_spill] sm:$0xff] %v6227_v25 }
 0x139   : > { %v1624_v4 = vpop.f32.mrf.mxu1  ;;  %v6231_v19 = vpop.f32.mrf.mxu0 }
 0x13a   : > { %8614 = vst [vmem:[#allocation49_spill] sm:$0xff] %v6231_v19 }
 0x13b   : > { %v1628_v7 = vpop.f32.mrf.mxu1  ;;  %v6235_v28 = vpop.f32.mrf.mxu0 }
 0x13c   : > { %8615 = vst [vmem:[#allocation50_spill] sm:$0xff] %v6235_v28  ;;  %v6275_v28 = vsub.s32 1, %v620_v61 }
 0x13d   : > { %v1630_v9 = vpop.f32.mrf.mxu1  ;;  %v6239_v30 = vpop.f32.mrf.mxu0 }
 0x13e   : > { %8616 = vst [vmem:[#allocation51_spill] sm:$0xff] %v6239_v30  ;;  %8624 = vst [vmem:[#allocation59_spill] sm:$0xff] %v6275_v28  ;;  %v6279_v15 = vrot.slane %v6263_v16, %v6275_v28 }
 0x13f   : > { %v1632_v11 = vpop.f32.mrf.mxu1  ;;  %v6243_v32 = vpop.f32.mrf.mxu0 }
 0x140   : > { %8617 = vst [vmem:[#allocation52_spill] sm:$0xff] %v6243_v32  ;;  %v6265_v32 = vsub.s32 0, %v620_v61  ;;  %8625 = vst [vmem:[#allocation60_spill] sm:$0xff] %v6279_v15  ;;  %v6289_v25 = vadd.f32 %v1620_v63, %v6279_v15 }
 0x141   : > { %v1634_v14 = vpop.f32.mrf.mxu1  ;;  %v6247_v55 = vpop.f32.mrf.mxu0 }
 0x142   : > { %8618 = vst [vmem:[#allocation53_spill] sm:$0xff] %v6247_v55  ;;  %8621 = vst [vmem:[#allocation56_spill] sm:$0xff] %v6265_v32  ;;  %v6269_v55 = vrot.slane %v6263_v16, %v6265_v32  ;;  %v6327_v5 = vadd.f32 %v1634_v14, %v6279_v15 }
 0x143   : > { %v1638_v20 = vpop.f32.mrf.mxu1  ;;  %v6251_v58 = vpop.f32.mrf.mxu0 }
 0x144   : > { %8619 = vst [vmem:[#allocation54_spill] sm:$0xff] %v6251_v58  ;;  %8622 = vst [vmem:[#allocation57_spill] sm:$0xff] %v6269_v55  ;;  %v6294_v61 = vadd.f32 %v1622_v2, %v6269_v55  ;;  %v6306_v21 = vadd.f32 %v1628_v7, %v6269_v55  ;;  %v6321_v10 = vadd.f32 %v1632_v11, %v6269_v55 }
 0x145   : > { %v1640_v22 = vpop.f32.mrf.mxu1  ;;  %v6259_v3 = vpop.f32.mrf.mxu0 }
 0x146   : > { %8620 = vst [vmem:[#allocation55_spill] sm:$0xff] %v6259_v3  ;;  %v6282_v3 = vadd.f32 %v1618_v62, %v6269_v55  ;;  %v6301_v62 = vadd.f32 %v1624_v4, %v6279_v15  ;;  %v1797_v17 = vmul.f32 %v6294_v61, %v6294_v61  ;;  %v6318_v4 = vadd.f32 %v1630_v9, %v6279_v15 }
 0x147   : > { %v1642_v24 = vpop.f32.mrf.mxu1  ;;  %v6271_v30 = vpop.f32.mrf.mxu0  ;;  %v1803_v60 = vmul.f32 %v6321_v10, %v6321_v10  ;;  %v6343_v14 = vadd.f32 %v1640_v22, %v6279_v15 }
 0x148   : > { %8623 = vst [vmem:[#allocation58_spill] sm:$0xff] %v6271_v30  ;;  %v1794_v30 = vmul.f32 %v6282_v3, %v6282_v3  ;;  %v1845_v52 = vmul.f32 %v1797_v17, %v6294_v61  ;;  %v1801_v11 = vmul.f32 %v6318_v4, %v6318_v4  ;;  %v6350_v56 = vadd.f32 %v1642_v24, %v6269_v55 }
 0x149   : > { %v6229_v26 = vpop.f32.mrf.mxu1  ;;  %v6284_v19 = vpop.f32.mrf.mxu0  ;;  %8631 = vst [vmem:[#allocation66_spill] sm:$0xff] %v6343_v14 }
 0x14a   : > { %8626 = vst [vmem:[#allocation61_spill] sm:$0xff] %v6284_v19  ;;  %v1795_v19 = vmul.f32 %v6289_v25, %v6289_v25  ;;  %v1842_v63 = vmul.f32 %v1794_v30, %v6282_v3  ;;  %v1800_v30 = vmul.f32 %v6306_v21, %v6306_v21  ;;  %v1893_v49 = vmul.f32 0.044715, %v1845_v52  ;;  %8632 = vst [vmem:[#allocation67_spill] sm:$0xff] %v6350_v56 }
 0x14b   : > { %v6233_v27 = vpop.f32.mrf.mxu1  ;;  %v6296_v23 = vpop.f32.mrf.mxu0  ;;  %v1849_v22 = vmul.f32 %v1801_v11, %v6318_v4  ;;  %v1807_v52 = vmul.f32 %v6343_v14, %v6343_v14 }
 0x14c   : > { %8627 = vst [vmem:[#allocation62_spill] sm:$0xff] %v6296_v23  ;;  %v1798_v23 = vmul.f32 %v6301_v62, %v6301_v62  ;;  %v1843_v7 = vmul.f32 %v1795_v19, %v6289_v25  ;;  %v6338_v19 = vadd.f32 %v1638_v20, %v6269_v55  ;;  %v1848_v17 = vmul.f32 %v1800_v30, %v6306_v21 }
 0x14d   : > { %v6237_v29 = vpop.f32.mrf.mxu1  ;;  %v6311_v2 = vpop.f32.mrf.mxu0  ;;  %v6361_v30 = vadd.f32 %v6229_v26, %v6279_v15  ;;  %v6368_v24 = vadd.f32 %v6233_v27, %v6269_v55  ;;  %v1941_v50 = vadd.f32 %v1893_v49, %v6294_v61  ;;  %v1809_v26 = vmul.f32 %v6350_v56, %v6350_v56 }
 0x14e   : > { %8628 = vst [vmem:[#allocation63_spill] sm:$0xff] %v6311_v2  ;;  %v1890_v2 = vmul.f32 0.044715, %v1842_v63  ;;  %v1846_v9 = vmul.f32 %v1798_v23, %v6301_v62  ;;  %8630 = vst [vmem:[#allocation65_spill] sm:$0xff] %v6338_v19  ;;  %v1891_v63 = vmul.f32 0.044715, %v1843_v7  ;;  %v1806_v7 = vmul.f32 %v6338_v19, %v6338_v19 }
 0x14f   : > { %v6241_v31 = vpop.f32.mrf.mxu1  ;;  %v6330_v0 = vpop.f32.mrf.mxu0  ;;  %8635 = vst [vmem:[#allocation70_spill] sm:$0xff] %v6361_v30  ;;  %v1812_v43 = vmul.f32 %v6368_v24, %v6368_v24 }
 0x150   : > { %8629 = vst [vmem:[#allocation64_spill] sm:$0xff] %v6330_v0  ;;  %v1804_v0 = vmul.f32 %v6327_v5, %v6327_v5  ;;  %v1938_v23 = vadd.f32 %v1890_v2, %v6282_v3  ;;  %v1894_v53 = vmul.f32 0.044715, %v1846_v9  ;;  %v1851_v2 = vmul.f32 %v1803_v60, %v6321_v10 }
 0x151   : > { %v6245_v54 = vpop.f32.mrf.mxu1  ;;  %v6352_v20 = vpop.f32.mrf.mxu0  ;;  %v1939_v9 = vadd.f32 %v1891_v63, %v6289_v25  ;;  %v6377_v60 = vadd.f32 %v6237_v29, %v6279_v15  ;;  %v1897_v63 = vmul.f32 0.044715, %v1849_v22  ;;  %v6392_v29 = vadd.f32 %v6241_v31, %v6269_v55 }
 0x152   : > { %8633 = vst [vmem:[#allocation68_spill] sm:$0xff] %v6352_v20  ;;  %v1896_v20 = vmul.f32 0.044715, %v1848_v17  ;;  %v1852_v11 = vmul.f32 %v1804_v0, %v6327_v5  ;;  %v1986_v46 = vmul.f32 0.7978846, %v1938_v23  ;;  %v1942_v27 = vadd.f32 %v1894_v53, %v6301_v62 }
 0x153   : > { %v6249_v57 = vpop.f32.mrf.mxu1  ;;  %v6379_v45 = vpop.f32.mrf.mxu0  ;;  %v1854_v17 = vmul.f32 %v1806_v7, %v6338_v19  ;;  %v1810_v0 = vmul.f32 %v6361_v30, %v6361_v30  ;;  %v1899_v49 = vmul.f32 0.044715, %v1851_v2  ;;  %v1855_v23 = vmul.f32 %v1807_v52, %v6343_v14  ;;  %8637 = vst [vmem:[#allocation72_spill] sm:$0xff] %v6392_v29 }
 0x154   : > { %v1987_v44 = vmul.f32 0.7978846, %v1939_v9  ;;  %v1944_v42 = vadd.f32 %v1896_v20, %v6306_v21  ;;  %v1900_v53 = vmul.f32 0.044715, %v1852_v11  ;;  %v6397_v22 = vadd.f32 %v6245_v54, %v6279_v15 }
 0x155   : > { %v6253_v59 = vpop.f32.mrf.mxu1  ;;  %5392 = vtanh.f32 %v1986_v46  ;;  %v1989_v7 = vmul.f32 0.7978846, %v1941_v50  ;;  %v1857_v2 = vmul.f32 %v1809_v26, %v6350_v56  ;;  %v1813_v52 = vmul.f32 %v6377_v60, %v6377_v60  ;;  %v1731_v40 = vpop.f32.mrf.mxu0 }
 0x156   : > { %8638 = vst [vmem:[#allocation73_spill] sm:$0xff] %v6397_v22  ;;  %v1990_v31 = vmul.f32 0.7978846, %v1942_v27  ;;  %v1945_v9 = vadd.f32 %v1897_v63, %v6318_v4  ;;  %v1902_v41 = vmul.f32 0.044715, %v1854_v17  ;;  %v1858_v20 = vmul.f32 %v1810_v0, %v6361_v30 }
 0x157   : > { %v6261_v18 = vpop.f32.mrf.mxu1  ;;  %v1947_v11 = vadd.f32 %v1899_v49, %v6321_v10  ;;  %v1903_v54 = vmul.f32 0.044715, %v1855_v23  ;;  %v1860_v46 = vmul.f32 %v1812_v43, %v6368_v24  ;;  %v1815_v50 = vmul.f32 %v6392_v29, %v6392_v29  ;;  %v5167_v49 = vpop.f32.mrf.mxu0 }
 0x158   : > { %5394 = vtanh.f32 %v1987_v44  ;;  %v1992_v26 = vmul.f32 0.7978846, %v1944_v42  ;;  %v1948_v38 = vadd.f32 %v1900_v53, %v6327_v5  ;;  %v1816_v27 = vmul.f32 %v6397_v22, %v6397_v22 }
 0x159   : > { %v6273_v58 = vpop.f32.mrf.mxu1  ;;  %5396 = vtanh.f32 %v1989_v7  ;;  %v1905_v63 = vmul.f32 0.044715, %v1857_v2  ;;  %v1861_v17 = vmul.f32 %v1813_v52, %v6377_v60  ;;  %v6416_v0 = vadd.f32 %v6249_v57, %v6269_v55 }
 0x15a   : > { %5398 = vtanh.f32 %v1990_v31  ;;  %v1993_v23 = vmul.f32 0.7978846, %v1945_v9  ;;  %v1950_v42 = vadd.f32 %v1902_v41, %v6338_v19  ;;  %v1906_v44 = vmul.f32 0.044715, %v1858_v20 }
 0x15b   : > { %v6286_v12 = vpop.f32.mrf.mxu1  ;;  %8640 = vst [vmem:[#allocation75_spill] sm:$0xff] %v6416_v0  ;;  %v1995_v53 = vmul.f32 0.7978846, %v1947_v11  ;;  %v1951_v37 = vadd.f32 %v1903_v54, %v6343_v14  ;;  %v1908_v36 = vmul.f32 0.044715, %v1860_v46  ;;  %v1863_v7 = vmul.f32 %v1815_v50, %v6392_v29  ;;  %v1734_v11 = vpop.f32.mrf.mxu0 }
 0x15c   : > { %5400 = vtanh.f32 %v1992_v26  ;;  %v1996_v2 = vmul.f32 0.7978846, %v1948_v38  ;;  %v1864_v52 = vmul.f32 %v1816_v27, %v6397_v22  ;;  %v6426_v57 = vrot.slane %v6263_v16, %v6197_v1 }
 0x15d   : > { %v6298_v8 = vpop.f32.mrf.mxu1  ;;  %v1953_v31 = vadd.f32 %v1905_v63, %v6350_v56  ;;  %v1909_v9 = vmul.f32 0.044715, %v1861_v17  ;;  %v1818_v41 = vmul.f32 %v6416_v0, %v6416_v0  ;;  %v6433_v20 = vadd.f32 %v6253_v59, %v6279_v15 }
 0x15e   : > { %5402 = vtanh.f32 %v1993_v23  ;;  %v1998_v38 = vmul.f32 0.7978846, %v1950_v42  ;;  %v1954_v46 = vadd.f32 %v1906_v44, %v6361_v30  ;;  %v1999_v16 = vmul.f32 0.7978846, %v1951_v37 }
 0x15f   : > { %v6313_v13 = vpop.f32.mrf.mxu1  ;;  %8642 = vst [vmem:[#allocation77_spill] sm:$0xff] %v6433_v20  ;;  %5404 = vtanh.f32 %v1995_v53  ;;  %v1956_v50 = vadd.f32 %v1908_v36, %v6368_v24  ;;  %v1911_v26 = vmul.f32 0.044715, %v1863_v7  ;;  %v1912_v27 = vmul.f32 0.044715, %v1864_v52  ;;  %v5170_v36 = vpop.f32.mrf.mxu0 }
 0x160   : > { %5406 = vtanh.f32 %v1996_v2  ;;  %v6441_v63 = vadd.f32 %v6379_v45, %v6426_v57  ;;  %v6445_v59 = vadd.f32 %v6273_v58, %v6279_v15  ;;  %v2001_v17 = vmul.f32 0.7978846, %v1953_v31 }
 0x161   : > { %v6332_v51 = vpop.f32.mrf.mxu1  ;;  %v1957_v23 = vadd.f32 %v1909_v9, %v6377_v60  ;;  %v1866_v42 = vmul.f32 %v1818_v41, %v6416_v0  ;;  %v1819_v37 = vmul.f32 %v6433_v20, %v6433_v20  ;;  %5408 = vtanh.f32 %v1998_v38 }
 0x162   : > { %8644 = vst [vmem:[#allocation79_spill] sm:$0xff] %v6445_v59  ;;  %v6453_v53 = vpop.eup %5392  ;;  %v2002_v45 = vmul.f32 0.7978846, %v1954_v46  ;;  %v6456_v7 = vadd.f32 %v1731_v40, %v6426_v57  ;;  %v6459_v58 = vadd.f32 %v5167_v49, %v6426_v57  ;;  %5410 = vtanh.f32 %v1999_v16 }
 0x163   : > { %v6354_v48 = vpop.f32.mrf.mxu1  ;;  %v2004_v2 = vmul.f32 0.7978846, %v1956_v50  ;;  %v1959_v52 = vadd.f32 %v1911_v26, %v6392_v29  ;;  %v6464_v31 = vadd.f32 %v6286_v12, %v6269_v55  ;;  %v1960_v9 = vadd.f32 %v1912_v27, %v6397_v22  ;;  %v1747_v12 = vpop.f32.mrf.mxu0 }
 0x164   : > { %8634 = vst [vmem:[#allocation69_spill] sm:$0xff] %v6354_v48  ;;  %v1802_v41 = vmul.f32 %v6441_v63, %v6441_v63  ;;  %v1822_v40 = vmul.f32 %v6445_v59, %v6445_v59  ;;  %v6472_v38 = vadd.f32 %v1734_v11, %v6426_v57  ;;  %5412 = vtanh.f32 %v2001_v17 }
 0x165   : > { %v6381_v47 = vpop.f32.mrf.mxu1  ;;  %8646 = vst [vmem:[#allocation81_spill] sm:$0xff] %v6464_v31  ;;  %v6474_v49 = vpop.eup %5394  ;;  %v2005_v46 = vmul.f32 0.7978846, %v1957_v23  ;;  %v1914_v16 = vmul.f32 0.044715, %v1866_v42  ;;  %v1867_v50 = vmul.f32 %v1819_v37, %v6433_v20  ;;  %5414 = vtanh.f32 %v2002_v45 }
 0x166   : > { %8636 = vst [vmem:[#allocation71_spill] sm:$0xff] %v6381_v47  ;;  %v6479_v27 = vpop.eup %5396  ;;  %v1796_v35 = vmul.f32 %v6456_v7, %v6456_v7  ;;  %v6485_v11 = vadd.f32 %v6261_v18, %v6269_v55  ;;  %v1805_v17 = vmul.f32 %v6459_v58, %v6459_v58  ;;  %5416 = vtanh.f32 %v2004_v2 }
 0x167   : > { %v6402_v39 = vpop.f32.mrf.mxu1  ;;  %v6489_v23 = vpop.eup %5398  ;;  %v2007_v42 = vmul.f32 0.7978846, %v1959_v52  ;;  %v1824_v37 = vmul.f32 %v6464_v31, %v6464_v31  ;;  %v6495_v45 = vadd.f32 %v6298_v8, %v6279_v15  ;;  %v2008_v34 = vmul.f32 0.7978846, %v1960_v9 }
 0x168   : > { %8639 = vst [vmem:[#allocation74_spill] sm:$0xff] %v6402_v39  ;;  %v1850_v6 = vmul.f32 %v1802_v41, %v6441_v63  ;;  %v1870_v18 = vmul.f32 %v1822_v40, %v6445_v59  ;;  %v1799_v33 = vmul.f32 %v6472_v38, %v6472_v38  ;;  %5418 = vtanh.f32 %v2005_v46  ;;  %v5171_v8 = vpop.f32.mrf.mxu0 }
 0x169   : > { %v6418_v43 = vpop.f32.mrf.mxu1  ;;  %v6501_v1 = vpop.eup %5400  ;;  %v1962_v2 = vadd.f32 %v1914_v16, %v6416_v0  ;;  %v1915_v52 = vmul.f32 0.044715, %v1867_v50  ;;  %v6506_v32 = vadd.f32 %v6313_v13, %v6269_v55  ;;  %v1844_v9 = vmul.f32 %v1796_v35, %v6456_v7 }
 0x16a   : > { %8641 = vst [vmem:[#allocation76_spill] sm:$0xff] %v6418_v43  ;;  %v1821_v41 = vmul.f32 %v6485_v11, %v6485_v11  ;;  %v1853_v40 = vmul.f32 %v1805_v17, %v6459_v58  ;;  %v6515_v39 = vadd.f32 %v5170_v36, %v6426_v57  ;;  %5420 = vtanh.f32 %v2007_v42 }
 0x16b   : > { %v6435_v54 = vpop.f32.mrf.mxu1  ;;  %v6517_v46 = vpop.eup %5402  ;;  %v1872_v16 = vmul.f32 %v1824_v37, %v6464_v31  ;;  %v1825_v13 = vmul.f32 %v6495_v45, %v6495_v45  ;;  %v6523_v50 = vadd.f32 %v1747_v12, %v6426_v57  ;;  %5422 = vtanh.f32 %v2008_v34 }
 0x16c   : > { %8643 = vst [vmem:[#allocation78_spill] sm:$0xff] %v6435_v54  ;;  %v6525_v35 = vpop.eup %5404  ;;  %v1898_v43 = vmul.f32 0.044715, %v1850_v6  ;;  %v1847_v17 = vmul.f32 %v1799_v33, %v6472_v38  ;;  %v1963_v42 = vadd.f32 %v1915_v52, %v6433_v20  ;;  %v1827_v37 = vmul.f32 %v6506_v32, %v6506_v32  ;;  %v1750_v12 = vpop.f32.mrf.mxu0 }
 0x16d   : > { %v6451_v44 = vpop.f32.mrf.mxu1  ;;  %v6528_v36 = vpop.eup %5406  ;;  %v6535_v54 = vadd.f32 %v6332_v51, %v6279_v15  ;;  %v1892_v48 = vmul.f32 0.044715, %v1844_v9  ;;  %v1869_v34 = vmul.f32 %v1821_v41, %v6485_v11  ;;  %v1901_v6 = vmul.f32 0.044715, %v1853_v40 }
 0x16e   : > { %8645 = vst [vmem:[#allocation80_spill] sm:$0xff] %v6451_v44  ;;  %v1814_v33 = vmul.f32 %v6515_v39, %v6515_v39  ;;  %v1873_v52 = vmul.f32 %v1825_v13, %v6495_v45  ;;  %v1808_v55 = vmul.f32 %v6523_v50, %v6523_v50  ;;  %v6546_v51 = vadd.f32 %v5171_v8, %v6426_v57 }
 0x16f   : > { %v6477_v26 = vpop.f32.mrf.mxu1  ;;  %v1946_v9 = vadd.f32 %v1898_v43, %v6441_v63  ;;  %v1895_v40 = vmul.f32 0.044715, %v1847_v17  ;;  %v6553_v15 = vadd.f32 %v1750_v12, %v6426_v57  ;;  %v1875_v13 = vmul.f32 %v1827_v37, %v6506_v32 }
 0x170   : > { %8647 = vst [vmem:[#allocation82_spill] sm:$0xff] %v6477_v26  ;;  %v1918_v26 = vmul.f32 0.044715, %v1870_v18  ;;  %v6540_v18 = vpop.eup %5408  ;;  %v1828_v0 = vmul.f32 %v6535_v54, %v6535_v54  ;;  %v1940_v56 = vadd.f32 %v1892_v48, %v6456_v7  ;;  %v1917_v30 = vmul.f32 0.044715, %v1869_v34 }
 0x171   : > { %v6508_v28 = vpop.f32.mrf.mxu1  ;;  %v6548_v47 = vpop.eup %5410  ;;  %v1949_v43 = vadd.f32 %v1901_v6, %v6459_v58  ;;  %v1856_v37 = vmul.f32 %v1808_v55, %v6523_v50  ;;  %v1817_v12 = vmul.f32 %v6546_v51, %v6546_v51  ;;  %v1994_v19 = vmul.f32 0.7978846, %v1946_v9 }
 0x172   : > { %8648 = vst [vmem:[#allocation83_spill] sm:$0xff] %v6508_v28  ;;  %v2010_v28 = vmul.f32 0.7978846, %v1962_v2  ;;  %v1920_v2 = vmul.f32 0.044715, %v1872_v16  ;;  %v1966_v41 = vadd.f32 %v1918_v26, %v6445_v59  ;;  %v6558_v8 = vpop.eup %5412  ;;  %v1862_v26 = vmul.f32 %v1814_v33, %v6515_v39 }
 0x173   : > { %v5174_v44 = vpop.f32.mrf.mxu1  ;;  %v2011_v16 = vmul.f32 0.7978846, %v1963_v42  ;;  %8649 = vst [vmem:[#allocation84_spill] sm:$0xff] %v6558_v8  ;;  %v6563_v17 = vpop.eup %5414  ;;  %v1921_v42 = vmul.f32 0.044715, %v1873_v52  ;;  %v1943_v48 = vadd.f32 %v1895_v40, %v6472_v38  ;;  %v1811_v34 = vmul.f32 %v6553_v15, %v6553_v15 }
 0x174   : > { %5424 = vtanh.f32 %v2010_v28  ;;  %8650 = vst [vmem:[#allocation85_spill] sm:$0xff] %v6563_v17  ;;  %v1968_v28 = vadd.f32 %v1920_v2, %v6464_v31  ;;  %v6569_v59 = vpop.eup %5416  ;;  %v2014_v14 = vmul.f32 0.7978846, %v1966_v41  ;;  %v1923_v6 = vmul.f32 0.044715, %v1875_v13 }
 0x175   : > { %v1763_v20 = vpop.f32.mrf.mxu1  ;;  %5426 = vtanh.f32 %v2011_v16  ;;  %v1876_v33 = vmul.f32 %v1828_v0, %v6535_v54  ;;  %v6576_v2 = vadd.f32 %v5174_v44, %v6426_v57  ;;  %v6578_v52 = vpop.eup %5418  ;;  %v1988_v31 = vmul.f32 0.7978846, %v1940_v56 }
 0x176   : > { %v1965_v29 = vadd.f32 %v1917_v30, %v6485_v11  ;;  %v1997_v9 = vmul.f32 0.7978846, %v1949_v43  ;;  %v1910_v41 = vmul.f32 0.044715, %v1862_v26  ;;  %v2016_v22 = vmul.f32 0.7978846, %v1968_v28 }
 0x177   : > { %v5175_v55 = vpop.f32.mrf.mxu1  ;;  %v1969_v40 = vadd.f32 %v1921_v42, %v6495_v45  ;;  %v1904_v8 = vmul.f32 0.044715, %v1856_v37  ;;  %v1865_v16 = vmul.f32 %v1817_v12, %v6546_v51  ;;  %v6583_v13 = vpop.eup %5420  ;;  %5428 = vtanh.f32 %v2014_v14 }
 0x178   : > { %v1991_v0 = vmul.f32 0.7978846, %v1943_v48  ;;  %v1859_v44 = vmul.f32 %v1811_v34, %v6553_v15  ;;  %v6587_v17 = vadd.f32 %v5175_v55, %v6426_v57  ;;  %v6589_v56 = vpop.eup %5422  ;;  %v1971_v30 = vadd.f32 %v1923_v6, %v6506_v32 }
 0x179   : > { %v1924_v43 = vmul.f32 0.044715, %v1876_v33  ;;  %v1826_v26 = vmul.f32 %v6576_v2, %v6576_v2  ;;  %5430 = vtanh.f32 %v1994_v19  ;;  %v1958_v28 = vadd.f32 %v1910_v41, %v6515_v39 }
 0x17a   : > { %v6596_v42 = vadd.f32 %v1763_v20, %v6426_v57  ;;  %v2089_v14 = vadd.f32 1.0, %v6517_v46  ;;  %5432 = vtanh.f32 %v1988_v31  ;;  %v2017_v37 = vmul.f32 0.7978846, %v1969_v40  ;;  %v1766_v31 = vpop.f32.mrf.mxu1 }
 0x17b   : > { %5434 = vtanh.f32 %v2016_v22  ;;  %v1952_v12 = vadd.f32 %v1904_v8, %v6523_v50  ;;  %v1913_v48 = vmul.f32 0.044715, %v1865_v16  ;;  %v6600_v34 = vmul.f32 0.7978846, %v1965_v29 }
 0x17c   : > { %v2088_v6 = vadd.f32 1.0, %v6501_v1  ;;  %v1829_v19 = vmul.f32 %v6587_v17, %v6587_v17  ;;  %5436 = vtanh.f32 %v1997_v9  ;;  %v2019_v33 = vmul.f32 0.7978846, %v1971_v30 }
 0x17d   : > { %v1972_v20 = vadd.f32 %v1924_v43, %v6535_v54  ;;  %v1907_v55 = vmul.f32 0.044715, %v1859_v44  ;;  %v1874_v46 = vmul.f32 %v1826_v26, %v6576_v2  ;;  %v1820_v8 = vmul.f32 %v6596_v42, %v6596_v42 }
 0x17e   : > { %v2137_v29 = vmul.f32 0.5, %v2089_v14  ;;  %v2083_v41 = vadd.f32 1.0, %v6474_v49  ;;  %5438 = vtanh.f32 %v1991_v0  ;;  %v2006_v1 = vmul.f32 0.7978846, %v1958_v28 }
 0x17f   : > { %5440 = vtanh.f32 %v2017_v37  ;;  %v6612_v40 = vmul.f32 0.7978846, %v1952_v12  ;;  %v1961_v9 = vadd.f32 %v1913_v48, %v6546_v51  ;;  %v2136_v16 = vmul.f32 0.5, %v2088_v6 }
 0x180   : > { %v1877_v44 = vmul.f32 %v1829_v19, %v6587_v17  ;;  %v2082_v30 = vadd.f32 1.0, %v6453_v53  ;;  %v6618_v43 = vadd.f32 %v1766_v31, %v6426_v57  ;;  %5442 = vtanh.f32 %v2019_v33 }
 0x181   : > { %v6607_v22 = vpop.eup %5424  ;;  %v2020_v26 = vmul.f32 0.7978846, %v1972_v20  ;;  %v1955_v14 = vadd.f32 %v1907_v55, %v6553_v15  ;;  %v2092_v49 = vadd.f32 1.0, %v6528_v36  ;;  %v1922_v28 = vmul.f32 0.044715, %v1874_v46 }
 0x182   : > { %v6622_v0 = vpop.eup %5426  ;;  %v1868_v37 = vmul.f32 %v1820_v8, %v6596_v42  ;;  %v6626_v12 = vmul.f32 %v2137_v29, %v6318_v4  ;;  %v2131_v48 = vmul.f32 0.5, %v2083_v41  ;;  %v2009_v6 = vmul.f32 0.7978846, %v1961_v9 }
 0x183   : > { %v2091_v53 = vadd.f32 1.0, %v6525_v35  ;;  %v2086_v19 = vadd.f32 1.0, %v6489_v23  ;;  %5444 = vtanh.f32 %v2006_v1  ;;  %v6631_v33 = vmul.f32 %v2136_v16, %v6306_v21 }
 0x184   : > { %8651 = vst [vmem:[#allocation86_spill] sm:$0xff] %v6626_v12  ;;  %v1925_v20 = vmul.f32 0.044715, %v1877_v44  ;;  %v2130_v36 = vmul.f32 0.5, %v2082_v30  ;;  %v1823_v55 = vmul.f32 %v6618_v43, %v6618_v43  ;;  %v6635_v46 = vpop.eup %5428  ;;  %5446 = vtanh.f32 %v2020_v26 }
 0x185   : > { %v2003_v4 = vmul.f32 0.7978846, %v1955_v14  ;;  %v2140_v31 = vmul.f32 0.5, %v2092_v49  ;;  %v2085_v8 = vadd.f32 1.0, %v6479_v27  ;;  %v1970_v35 = vadd.f32 %v1922_v28, %v6576_v2 }
 0x186   : > { %v5431_v29 = vpop.eup %5430  ;;  %v1916_v23 = vmul.f32 0.044715, %v1868_v37  ;;  %v2238_v21 = vadd.f32 %v6626_v12, %v6631_v33  ;;  %v6642_v41 = vmul.f32 %v2131_v48, %v6289_v25  ;;  %v2139_v16 = vmul.f32 0.5, %v2091_v53 }
 0x187   : > { %v5433_v1 = vpop.eup %5432  ;;  %v2090_v9 = vadd.f32 1.0, %v5431_v29  ;;  %v2134_v44 = vmul.f32 0.5, %v2086_v19  ;;  %v2101_v30 = vadd.f32 1.0, %v6578_v52  ;;  %v1973_v27 = vadd.f32 %v1925_v20, %v6587_v17 }
 0x188   : > { %v6645_v26 = vpop.eup %5434  ;;  %v2084_v14 = vadd.f32 1.0, %v5433_v1  ;;  %v6649_v49 = vmul.f32 %v2130_v36, %v6282_v3  ;;  %v1871_v28 = vmul.f32 %v1823_v55, %v6618_v43  ;;  %v6653_v25 = vmul.f32 %v2140_v31, %v6327_v5 }
 0x189   : > { %v5437_v37 = vpop.eup %5436  ;;  %v2138_v12 = vmul.f32 0.5, %v2090_v9  ;;  %v2133_v48 = vmul.f32 0.5, %v2085_v8  ;;  %v2100_v53 = vadd.f32 1.0, %v6569_v59  ;;  %5448 = vtanh.f32 %v2009_v6 }
 0x18a   : > { %v2132_v19 = vmul.f32 0.5, %v2084_v14  ;;  %v2230_v52 = vadd.f32 %v6642_v41, %v6649_v49  ;;  %v2093_v29 = vadd.f32 1.0, %v5437_v37  ;;  %v6662_v36 = vmul.f32 %v2139_v16, %v6321_v10 }
 0x18b   : > { %v5439_v20 = vpop.eup %5438  ;;  %v6659_v3 = vmul.f32 %v2138_v12, %v6441_v63  ;;  %v6665_v55 = vmul.f32 %v2134_v44, %v6301_v62  ;;  %v2149_v5 = vmul.f32 0.5, %v2101_v30  ;;  %v1919_v8 = vmul.f32 0.044715, %v1871_v28 }
 0x18c   : > { %v5441_v31 = vpop.eup %5440  ;;  %v6668_v59 = vmul.f32 %v2132_v19, %v6456_v7  ;;  %v2141_v1 = vmul.f32 0.5, %v2093_v29  ;;  %v2087_v9 = vadd.f32 1.0, %v5439_v20  ;;  %v2242_v63 = vadd.f32 %v6653_v25, %v6662_v36 }
 0x18d   : > { %v2239_v6 = vadd.f32 %v2238_v21, %v6659_v3  ;;  %v6674_v12 = vmul.f32 %v2133_v48, %v6294_v61  ;;  %v2148_v10 = vmul.f32 0.5, %v2100_v53  ;;  %v6676_v16 = vpop.eup %5442  ;;  %5450 = vtanh.f32 %v6612_v40 }
 0x18e   : > { %v2231_v62 = vadd.f32 %v2230_v52, %v6668_v59  ;;  %v6680_v44 = vmul.f32 %v2141_v1, %v6459_v58  ;;  %v2135_v7 = vmul.f32 0.5, %v2087_v9  ;;  %v2018_v30 = vmul.f32 0.7978846, %v1970_v35 }
 0x18f   : > { %v1964_v21 = vadd.f32 %v1916_v23, %v6596_v42  ;;  %2240 = vadd.xlane.f32.xlu1 %v2239_v6  ;;  %v2234_v14 = vadd.f32 %v6665_v55, %v6674_v12  ;;  %v6687_v61 = vmul.f32 %v2149_v5, %v6377_v60  ;;  %v2104_v48 = vadd.f32 1.0, %v6589_v56  ;;  %v8653_v6 = vld [vmem:[#allocation84_spill] sm:$0xff] }
 0x190   : > { %v5445_v28 = vpop.eup %5444  ;;  %2232 = vadd.xlane.f32.xlu0 %v2231_v62  ;;  %v2243_v37 = vadd.f32 %v2242_v63, %v6680_v44  ;;  %v6691_v58 = vmul.f32 %v2135_v7, %v6472_v38  ;;  %5452 = vtanh.f32 %v2003_v4  ;;  %v2021_v40 = vmul.f32 0.7978846, %v1973_v27  ;;  %v8654_v62 = vld [vmem:[#allocation73_spill] sm:$0xff] }
 0x191   : > { %5454 = vtanh.f32 %v6600_v34  ;;  %v2102_v35 = vadd.f32 1.0, %v5445_v28  ;;  %v5447_v23 = vpop.eup %5446  ;;  %v1967_v53 = vadd.f32 %v1919_v8, %v6618_v43  ;;  %v6698_v19 = vmul.f32 %v2148_v10, %v6368_v24  ;;  %v8652_v24 = vld [vmem:[#allocation85_spill] sm:$0xff] }
 0x192   : > { %v2235_v60 = vadd.f32 %v2234_v14, %v6691_v58  ;;  %v2103_v52 = vadd.f32 1.0, %v6583_v13  ;;  %v2095_v29 = vadd.f32 1.0, %v6548_v47  ;;  %5456 = vtanh.f32 %v2018_v30  ;;  %v8655_v14 = vld [vmem:[#allocation72_spill] sm:$0xff] }
 0x193   : > { %2244 = vadd.xlane.f32.xlu1 %v2243_v37  ;;  %v2150_v38 = vmul.f32 0.5, %v2102_v35  ;;  %v2012_v56 = vmul.f32 0.7978846, %v1964_v21  ;;  %v2254_v34 = vadd.f32 %v6687_v61, %v6698_v19  ;;  %v2152_v4 = vmul.f32 0.5, %v2104_v48  ;;  %v8656_v48 = vld [vmem:[#allocation66_spill] sm:$0xff] }
 0x194   : > { %2236 = vadd.xlane.f32.xlu0 %v2235_v60  ;;  %v2094_v20 = vadd.f32 1.0, %v6540_v18  ;;  %v2098_v5 = vadd.f32 1.0, %v8652_v24  ;;  %5458 = vtanh.f32 %v2021_v40  ;;  %v2015_v13 = vmul.f32 0.7978846, %v1967_v53 }
 0x195   : > { %v6705_v27 = vmul.f32 %v2150_v38, %v6515_v39  ;;  %v2151_v8 = vmul.f32 0.5, %v2103_v52  ;;  %v2143_v9 = vmul.f32 0.5, %v2095_v29  ;;  %v2097_v63 = vadd.f32 1.0, %v8653_v6 }
 0x196   : > { %v5449_v1 = vpop.eup %5448  ;;  %v6712_v7 = vmul.f32 %v2152_v4, %v8654_v62  ;;  %5460 = vtanh.f32 %v2012_v56  ;;  %v2142_v39 = vmul.f32 0.5, %v2094_v20  ;;  %v2146_v30 = vmul.f32 0.5, %v2098_v5  ;;  %v8657_v56 = vld [vmem:[#allocation65_spill] sm:$0xff]  ;;  %v8658_v4 = vld [vmem:[#allocation70_spill] sm:$0xff] }
 0x197   : > { %v2255_v47 = vadd.f32 %v2254_v34, %v6705_v27  ;;  %v2105_v10 = vadd.f32 1.0, %v5449_v1  ;;  %v2113_v18 = vadd.f32 1.0, %v5441_v31  ;;  %v6715_v28 = vmul.f32 %v2151_v8, %v8655_v14 }
 0x198   : > { %5462 = vtanh.f32 %v2015_v13  ;;  %v6718_v40 = vmul.f32 %v2143_v9, %v8656_v48  ;;  %v2145_v35 = vmul.f32 0.5, %v2097_v63  ;;  %v2112_v53 = vadd.f32 1.0, %v6645_v26 }
 0x199   : > { %2256 = vadd.xlane.f32.xlu0 %v2255_v47  ;;  %v2153_v21 = vmul.f32 0.5, %v2105_v10  ;;  %v2116_v60 = vadd.f32 1.0, %v5447_v23  ;;  %v2258_v38 = vadd.f32 %v6712_v7, %v6715_v28  ;;  %v6727_v34 = vmul.f32 %v2142_v39, %v8657_v56  ;;  %v8659_v47 = vld [vmem:[#allocation67_spill] sm:$0xff] }
 0x19a   : > { %v5451_v37 = vpop.eup %5450  ;;  %v6730_v20 = vmul.f32 %v2146_v30, %v8658_v4  ;;  %v2161_v24 = vmul.f32 0.5, %v2113_v18  ;;  %v2115_v5 = vadd.f32 1.0, %v6676_v16  ;;  %v2107_v8 = vadd.f32 1.0, %v6622_v0 }
 0x19b   : > { %v6722_v52 = vmul.f32 %v2153_v21, %v6546_v51  ;;  %v2096_v31 = vadd.f32 1.0, %v5451_v37  ;;  %v2246_v1 = vadd.f32 %v6718_v40, %v6727_v34  ;;  %v6738_v9 = vmul.f32 %v2145_v35, %v8659_v47 }
 0x19c   : > { %v2160_v6 = vmul.f32 0.5, %v2112_v53  ;;  %v2164_v63 = vmul.f32 0.5, %v2116_v60  ;;  %v2106_v39 = vadd.f32 1.0, %v6607_v22  ;;  %v2110_v30 = vadd.f32 1.0, %v6635_v46  ;;  %v8660_v22 = vld [vmem:[#allocation81_spill] sm:$0xff] }
 0x19d   : > { %v5453_v29 = vpop.eup %5452  ;;  %v2259_v26 = vadd.f32 %v2258_v38, %v6722_v52  ;;  %v2144_v23 = vmul.f32 0.5, %v2096_v31  ;;  %v2250_v0 = vadd.f32 %v6730_v20, %v6738_v9  ;;  %v6748_v21 = vmul.f32 %v2161_v24, %v6495_v45 }
 0x19e   : > { %v5455_v13 = vpop.eup %5454  ;;  %v2099_v51 = vadd.f32 1.0, %v5453_v29  ;;  %v2163_v14 = vmul.f32 0.5, %v2115_v5  ;;  %v6755_v38 = vmul.f32 %v2160_v6, %v8660_v22  ;;  %v6758_v31 = vmul.f32 %v2164_v63, %v6535_v54  ;;  %v8674_v22 = vld [vmem:[#allocation57_spill] sm:$0xff] }
 0x19f   : > { %v5457_v10 = vpop.eup %5456  ;;  %2260 = vadd.xlane.f32.xlu1 %v2259_v26  ;;  %v6741_v62 = vmul.f32 %v2144_v23, %v6523_v50  ;;  %v2155_v50 = vmul.f32 0.5, %v2107_v8  ;;  %v2109_v53 = vadd.f32 1.0, %v5455_v13  ;;  %v2154_v29 = vmul.f32 0.5, %v2106_v39  ;;  %v5178_v26 = vpop.f32.mrf.mxu1  ;;  %v8663_v23 = vld [vmem:[#allocation77_spill] sm:$0xff]  ;;  %v8668_v39 = vld [vmem:[#allocation79_spill] sm:$0xff] }
 0x1a0   : > { %v2147_v16 = vmul.f32 0.5, %v2099_v51  ;;  %v2114_v18 = vadd.f32 1.0, %v5457_v10  ;;  %8661 = vst [vmem:[#allocation85_spill] sm:$0xff] %v6758_v31  ;;  %v2158_v56 = vmul.f32 0.5, %v2110_v30  ;;  %v6767_v13 = vmul.f32 %v2163_v14, %v6506_v32  ;;  %v8666_v10 = vld [vmem:[#allocation75_spill] sm:$0xff] }
 0x1a1   : > { %v5459_v37 = vpop.eup %5458  ;;  %v2247_v48 = vadd.f32 %v2246_v1, %v6741_v62  ;;  %v6770_v51 = vmul.f32 %v2155_v50, %v8663_v23  ;;  %v2157_v8 = vmul.f32 0.5, %v2109_v53  ;;  %v6779_v32 = vmul.f32 %v2154_v29, %v8666_v10  ;;  %v8676_v29 = vld [vmem:[#allocation80_spill] sm:$0xff] }
 0x1a2   : > { %v6752_v35 = vmul.f32 %v2147_v16, %v6553_v15  ;;  %v2162_v60 = vmul.f32 0.5, %v2114_v18  ;;  %v2117_v46 = vadd.f32 1.0, %v5459_v37  ;;  %v2270_v15 = vadd.f32 %v6748_v21, %v6755_v38  ;;  %8662 = vst [vmem:[#allocation84_spill] sm:$0xff] %v6767_v13  ;;  %v8671_v18 = vld [vmem:[#allocation71_spill] sm:$0xff] }
 0x1a3   : > { %2248 = vadd.xlane.f32.xlu0 %v2247_v48  ;;  %v5461_v4 = vpop.eup %5460  ;;  %8664 = vst [vmem:[#allocation73_spill] sm:$0xff] %v6770_v51  ;;  %v2274_v6 = vadd.f32 %v6758_v31, %v6767_v13  ;;  %8667 = vst [vmem:[#allocation66_spill] sm:$0xff] %v6779_v32  ;;  %v6782_v30 = vmul.f32 %v2158_v56, %v8668_v39  ;;  %v2262_v50 = vadd.f32 %v6770_v51, %v6779_v32 }
 0x1a4   : > { %v2251_v45 = vadd.f32 %v2250_v0, %v6752_v35  ;;  %v6762_v24 = vmul.f32 %v2162_v60, %v6576_v2  ;;  %v2165_v5 = vmul.f32 0.5, %v2117_v46  ;;  %v2108_v54 = vadd.f32 1.0, %v5461_v4  ;;  %v8670_v0 = vld [vmem:[#allocation60_spill] sm:$0xff]  ;;  %v8675_v46 = vld [vmem:[#allocation69_spill] sm:$0xff] }
 0x1a5   : > { %v5463_v1 = vpop.eup %5462  ;;  %8669 = vst [vmem:[#allocation65_spill] sm:$0xff] %v6782_v30  ;;  %v6786_v14 = vadd.f32 %v8671_v18, %v8670_v0  ;;  %v6795_v60 = vmul.f32 %v2157_v8, %v6485_v11  ;;  %v6803_v56 = vadd.f32 %v8676_v29, %v8670_v0 }
 0x1a6   : > { %2252 = vadd.xlane.f32.xlu1 %v2251_v45  ;;  %v2271_v47 = vadd.f32 %v2270_v15, %v6762_v24  ;;  %v6774_v2 = vmul.f32 %v2165_v5, %v6587_v17  ;;  %v2156_v63 = vmul.f32 0.5, %v2108_v54  ;;  %v2111_v16 = vadd.f32 1.0, %v5463_v1  ;;  %v1779_v17 = vpop.f32.mrf.mxu1  ;;  %v8678_v54 = vld [vmem:[#allocation78_spill] sm:$0xff] }
 0x1a7   : > { %8673 = vst [vmem:[#allocation67_spill] sm:$0xff] %v6795_v60  ;;  %v6799_v45 = vadd.f32 %v8675_v46, %v8674_v22  ;;  %v2266_v15 = vadd.f32 %v6782_v30, %v6795_v60  ;;  %v6812_v11 = vadd.f32 %v1779_v17, %v6426_v57  ;;  %v1831_v5 = vmul.f32 %v6786_v14, %v6786_v14 }
 0x1a8   : > { %8665 = vst [vmem:[#allocation72_spill] sm:$0xff] %v6774_v2  ;;  %2272 = vadd.xlane.f32.xlu0 %v2271_v47  ;;  %v2275_v37 = vadd.f32 %v2274_v6, %v6774_v2  ;;  %v6790_v48 = vmul.f32 %v2156_v63, %v6596_v42  ;;  %v2159_v53 = vmul.f32 0.5, %v2111_v16  ;;  %v6818_v23 = vadd.f32 %v8678_v54, %v8674_v22  ;;  %v5179_v6 = vpop.f32.mrf.mxu1  ;;  %v8679_v63 = vld [vmem:[#allocation83_spill] sm:$0xff] }
 0x1a9   : > { %v6824_v1 = vadd.f32 %v5178_v26, %v6426_v57  ;;  %v1837_v47 = vmul.f32 %v6803_v56, %v6803_v56  ;;  %v6830_v10 = vadd.f32 %v8679_v63, %v8670_v0  ;;  %v1832_v16 = vmul.f32 %v6812_v11, %v6812_v11  ;;  %v8680_v26 = vld [vmem:[#allocation82_spill] sm:$0xff] }
 0x1aa   : > { %8672 = vst [vmem:[#allocation70_spill] sm:$0xff] %v6790_v48  ;;  %2276 = vadd.xlane.f32.xlu1 %v2275_v37  ;;  %v2263_v4 = vadd.f32 %v2262_v50, %v6790_v48  ;;  %v6807_v42 = vmul.f32 %v2159_v53, %v6618_v43  ;;  %v1830_v43 = vmul.f32 %v6799_v45, %v6799_v45  ;;  %v1782_v29 = vpop.f32.mrf.mxu1 }
 0x1ab   : > { %v1879_v39 = vmul.f32 %v1831_v5, %v6786_v14  ;;  %v1836_v18 = vmul.f32 %v6818_v23, %v6818_v23  ;;  %v6839_v37 = vadd.f32 %v8680_v26, %v8674_v22  ;;  %v1838_v50 = vmul.f32 %v6824_v1, %v6824_v1 }
 0x1ac   : > { %8677 = vst [vmem:[#allocation81_spill] sm:$0xff] %v6807_v42  ;;  %2264 = vadd.xlane.f32.xlu0 %v2263_v4  ;;  %v2267_v8 = vadd.f32 %v2266_v15, %v6807_v42  ;;  %v1878_v17 = vmul.f32 %v1830_v43, %v6799_v45  ;;  %v6845_v53 = vadd.f32 %v5179_v6, %v6426_v57  ;;  %v8681_v4 = vld [vmem:[#allocation76_spill] sm:$0xff]  ;;  %v8682_v43 = vld [vmem:[#allocation74_spill] sm:$0xff] }
 0x1ad   : > { %v1885_v46 = vmul.f32 %v1837_v47, %v6803_v56  ;;  %v6850_v15 = vadd.f32 %v8681_v4, %v8670_v0  ;;  %v1840_v5 = vmul.f32 %v6830_v10, %v6830_v10  ;;  %v1880_v54 = vmul.f32 %v1832_v16, %v6812_v11 }
 0x1ae   : > { %2268 = vadd.xlane.f32.xlu1 %v2267_v8  ;;  %v1927_v8 = vmul.f32 0.044715, %v1879_v39  ;;  %v6857_v63 = vadd.f32 %v8682_v43, %v8674_v22  ;;  %v1884_v6 = vmul.f32 %v1836_v18, %v6818_v23  ;;  %v1839_v47 = vmul.f32 %v6839_v37, %v6839_v37 }
 0x1af   : > { %v1926_v26 = vmul.f32 0.044715, %v1878_v17  ;;  %v1886_v2 = vmul.f32 %v1838_v50, %v6824_v1  ;;  %v1841_v0 = vmul.f32 %v6845_v53, %v6845_v53  ;;  %v6866_v4 = vadd.f32 %v1782_v29, %v6426_v57 }
 0x1b0   : > { %v1933_v16 = vmul.f32 0.044715, %v1885_v46  ;;  %v1834_v39 = vmul.f32 %v6850_v15, %v6850_v15  ;;  %v1888_v22 = vmul.f32 %v1840_v5, %v6830_v10  ;;  %v1928_v43 = vmul.f32 0.044715, %v1880_v54 }
 0x1b1   : > { %v1975_v18 = vadd.f32 %v1927_v8, %v6786_v14  ;;  %v1833_v17 = vmul.f32 %v6857_v63, %v6857_v63  ;;  %v1932_v50 = vmul.f32 0.044715, %v1884_v6  ;;  %v1887_v42 = vmul.f32 %v1839_v47, %v6839_v37 }
 0x1b2   : > { %v1974_v30 = vadd.f32 %v1926_v26, %v6799_v45  ;;  %v1934_v57 = vmul.f32 0.044715, %v1886_v2  ;;  %v1889_v46 = vmul.f32 %v1841_v0, %v6845_v53  ;;  %v1835_v29 = vmul.f32 %v6866_v4, %v6866_v4  ;;  %v571_v2 = vld [vmem:[%s5914_s26 + $0x38] sm:$0xff] }
 0x1b3   : > { %v1981_v5 = vadd.f32 %v1933_v16, %v6803_v56  ;;  %v1882_v54 = vmul.f32 %v1834_v39, %v6850_v15  ;;  %v1936_v8 = vmul.f32 0.044715, %v1888_v22  ;;  %v1976_v60 = vadd.f32 %v1928_v43, %v6812_v11  ;;  %v572_v43 = vld [vmem:[%s5914_s26 + $0x40] sm:$0xff] }
 0x1b4   : > { %v2023_v48 = vmul.f32 0.7978846, %v1975_v18  ;;  %v1881_v6 = vmul.f32 %v1833_v17, %v6857_v63  ;;  %v1980_v47 = vadd.f32 %v1932_v50, %v6818_v23  ;;  %v1935_v26 = vmul.f32 0.044715, %v1887_v42 }
 0x1b5   : > { %v2022_v51 = vmul.f32 0.7978846, %v1974_v30  ;;  %v1982_v0 = vadd.f32 %v1934_v57, %v6824_v1  ;;  %v1937_v32 = vmul.f32 0.044715, %v1889_v46  ;;  %v1883_v31 = vmul.f32 %v1835_v29, %v6866_v4 }
 0x1b6   : > { %v2029_v16 = vmul.f32 0.7978846, %v1981_v5  ;;  %v1930_v13 = vmul.f32 0.044715, %v1882_v54  ;;  %v1984_v39 = vadd.f32 %v1936_v8, %v6830_v10  ;;  %v2024_v22 = vmul.f32 0.7978846, %v1976_v60 }
 0x1b7   : > { %5464 = vtanh.f32 %v2023_v48  ;;  %v1929_v18 = vmul.f32 0.044715, %v1881_v6  ;;  %v2028_v17 = vmul.f32 0.7978846, %v1980_v47  ;;  %v1983_v50 = vadd.f32 %v1935_v26, %v6839_v37 }
 0x1b8   : > { %5466 = vtanh.f32 %v2022_v51  ;;  %v2030_v42 = vmul.f32 0.7978846, %v1982_v0  ;;  %v1985_v30 = vadd.f32 %v1937_v32, %v6845_v53  ;;  %v1931_v57 = vmul.f32 0.044715, %v1883_v31 }
 0x1b9   : > { %5468 = vtanh.f32 %v2029_v16  ;;  %v1978_v46 = vadd.f32 %v1930_v13, %v6850_v15  ;;  %v2032_v29 = vmul.f32 0.7978846, %v1984_v39  ;;  %v1977_v60 = vadd.f32 %v1929_v18, %v6857_v63 }
 0x1ba   : > { %5470 = vtanh.f32 %v2024_v22  ;;  %v2031_v5 = vmul.f32 0.7978846, %v1983_v50  ;;  %v2033_v48 = vmul.f32 0.7978846, %v1985_v30  ;;  %v1979_v54 = vadd.f32 %v1931_v57, %v6866_v4 }
 0x1bb   : > { %5472 = vtanh.f32 %v2028_v17  ;;  %v2026_v8 = vmul.f32 0.7978846, %v1978_v46  ;;  %v2025_v51 = vmul.f32 0.7978846, %v1977_v60 }
 0x1bc   : > { %5474 = vtanh.f32 %v2030_v42  ;;  %v2027_v32 = vmul.f32 0.7978846, %v1979_v54 }
 0x1bd   : > { %5476 = vtanh.f32 %v2032_v29 }
 0x1be   : > { %5478 = vtanh.f32 %v2031_v5 }
 0x1bf   : > { %2753 = vperm.xlu1 %5303, %v571_v2   ;;  %5480 = vtanh.f32 %v2033_v48 }
 0x1c0   : > { %5482 = vtanh.f32 %v2026_v8 }
 0x1c1   : > { %5484 = vtanh.f32 %v2025_v51 }
 0x1c2   : > { %2761 = vperm.xlu0 %5302, %v572_v43   ;;  %5486 = vtanh.f32 %v2027_v32 }
 0x1c4   : > { %v5465_v31 = vpop.eup %5464 }
 0x1c5   : > { %v5467_v13 = vpop.eup %5466  ;;  %v2119_v26 = vadd.f32 1.0, %v5465_v31 }
 0x1c6   : > { %v5469_v6 = vpop.eup %5468  ;;  %v2118_v16 = vadd.f32 1.0, %v5467_v13 }
 0x1c7   : > { %v5471_v47 = vpop.eup %5470  ;;  %v2125_v22 = vadd.f32 1.0, %v5469_v6  ;;  %v2167_v18 = vmul.f32 0.5, %v2119_v26 }
 0x1c8   : > { %v5473_v2 = vpop.eup %5472  ;;  %v2120_v39 = vadd.f32 1.0, %v5471_v47  ;;  %v2166_v57 = vmul.f32 0.5, %v2118_v16 }
 0x1c9   : > { %v5475_v0 = vpop.eup %5474  ;;  %v2124_v17 = vadd.f32 1.0, %v5473_v2  ;;  %v2173_v29 = vmul.f32 0.5, %v2125_v22  ;;  %v6895_v48 = vmul.f32 %v2167_v18, %v6786_v14 }
 0x1ca   : > { %v5477_v43 = vpop.eup %5476  ;;  %v2126_v42 = vadd.f32 1.0, %v5475_v0  ;;  %v2168_v46 = vmul.f32 0.5, %v2120_v39  ;;  %v6898_v6 = vmul.f32 %v2166_v57, %v6799_v45 }
 0x1cb   : > { %v5479_v50 = vpop.eup %5478  ;;  %v2128_v60 = vadd.f32 1.0, %v5477_v43  ;;  %v2172_v54 = vmul.f32 0.5, %v2124_v17  ;;  %v6904_v26 = vmul.f32 %v2173_v29, %v6803_v56 }
 0x1cc   : > { %v5481_v30 = vpop.eup %5480  ;;  %v2127_v8 = vadd.f32 1.0, %v5479_v50  ;;  %v2174_v32 = vmul.f32 0.5, %v2126_v42  ;;  %v6901_v47 = vmul.f32 %v2168_v46, %v6812_v11  ;;  %v2278_v14 = vadd.f32 %v6895_v48, %v6898_v6 }
 0x1cd   : > { %v5483_v5 = vpop.eup %5482  ;;  %v2129_v31 = vadd.f32 1.0, %v5481_v30  ;;  %v2176_v2 = vmul.f32 0.5, %v2128_v60  ;;  %v6909_v16 = vmul.f32 %v2172_v54, %v6818_v23  ;;  %v6942_v54 = vpop.permute.xlu1 %2705 }
 0x1ce   : > { %v5485_v51 = vpop.eup %5484  ;;  %v2122_v0 = vadd.f32 1.0, %v5483_v5  ;;  %v2175_v39 = vmul.f32 0.5, %v2127_v8  ;;  %v6912_v22 = vmul.f32 %v2174_v32, %v6824_v1  ;;  %v2279_v11 = vadd.f32 %v2278_v14, %v6901_v47 }
 0x1cf   : > { %v5487_v13 = vpop.eup %5486  ;;  %v2177_v45 = vmul.f32 0.5, %v2129_v31  ;;  %v2121_v43 = vadd.f32 1.0, %v5485_v51  ;;  %v2286_v56 = vadd.f32 %v6904_v26, %v6909_v16  ;;  %v6918_v17 = vmul.f32 %v2176_v2, %v6830_v10 }
 0x1d0   : > { %v2123_v18 = vadd.f32 1.0, %v5487_v13  ;;  %v2170_v50 = vmul.f32 0.5, %v2122_v0  ;;  %v6921_v42 = vmul.f32 %v2175_v39, %v6839_v37  ;;  %v8684_v39 = vld [vmem:[#allocation86_spill] sm:$0xff] }
 0x1d1   : > { %v2287_v23 = vadd.f32 %v2286_v56, %v6912_v22  ;;  %v6925_v1 = vmul.f32 %v2177_v45, %v6845_v53  ;;  %v2169_v30 = vmul.f32 0.5, %v2121_v43  ;;  %v6944_v8 = vpop.permute.xlu1 %2713 }
 0x1d2   : > { %v2171_v57 = vmul.f32 0.5, %v2123_v18  ;;  %v2290_v46 = vadd.f32 %v6918_v17, %v6921_v42  ;;  %v6930_v29 = vmul.f32 %v2170_v50, %v6850_v15  ;;  %v6946_v15 = vpop.permute.xlu0 %2697 }
 0x1d3   : > { %v6934_v37 = vmul.f32 %v2169_v30, %v6857_v63 }
 0x1d4   : > { %v2291_v10 = vadd.f32 %v2290_v46, %v6925_v1  ;;  %v6937_v60 = vmul.f32 %v2171_v57, %v6866_v4 }
 0x1d5   : > { %v2282_v53 = vadd.f32 %v6930_v29, %v6934_v37  ;;  %v6948_v51 = vpop.permute.xlu1 %2721 }
 0x1d6   : > { %v6950_v63 = vpop.permute.xlu0 %2729 }
 0x1d7   : > { %v2283_v5 = vadd.f32 %v2282_v53, %v6937_v60 }
 0x1d9   : > { %v6952_v32 = vpop.permute.xlu1 %2745 }
 0x1da   : > { %8683 = vst [vmem:[#allocation77_spill] sm:$0xff] %v6952_v32  ;;  %v6954_v4 = vpop.permute.xlu0 %2737 }
 0x1e1   : > { %2280 = vadd.xlane.f32.xlu0 %v2279_v11 }
 0x1e3   : > { %2288 = vadd.xlane.f32.xlu1 %v2287_v23 }
 0x1e7   : > { %2292 = vadd.xlane.f32.xlu1 %v2291_v10 }
 0x1eb   : > { %2284 = vadd.xlane.f32.xlu1 %v2283_v5 }
 0x218   : > { %v2241_v31 = vpop.xlane.xlu1 %2240 }
 0x219   : > { %v2297_v13 = vmul.f32 0.0026041667, %v2241_v31  ;;  %v2233_v2 = vpop.xlane.xlu0 %2232 }
 0x21a   : > { %v2295_v0 = vmul.f32 0.0026041667, %v2233_v2 }
 0x21b   : > { %v6957_v14 = vsub.f32 %v6631_v33, %v2297_v13  ;;  %v6960_v45 = vsub.f32 %v8684_v39, %v2297_v13  ;;  %v6963_v43 = vsub.f32 %v6659_v3, %v2297_v13 }
 0x21c   : > { %v6966_v18 = vsub.f32 %v6649_v49, %v2295_v0  ;;  %v6969_v11 = vsub.f32 %v6642_v41, %v2295_v0  ;;  %v2245_v56 = vpop.xlane.xlu1 %2244  ;;  %v6972_v50 = vsub.f32 %v6668_v59, %v2295_v0 }
 0x21d   : > { %v2298_v23 = vmul.f32 0.0026041667, %v2245_v56  ;;  %v2237_v30 = vpop.xlane.xlu0 %2236  ;;  %v2365_v33 = vmul.f32 %v6957_v14, %v6957_v14  ;;  %v2366_v57 = vmul.f32 %v6960_v45, %v6960_v45  ;;  %v2367_v49 = vmul.f32 %v6963_v43, %v6963_v43 }
 0x21e   : > { %v2296_v3 = vmul.f32 0.0026041667, %v2237_v30  ;;  %v2359_v41 = vmul.f32 %v6966_v18, %v6966_v18  ;;  %v2360_v46 = vmul.f32 %v6969_v11, %v6969_v11 }
 0x21f   : > { %v6985_v59 = vsub.f32 %v6662_v36, %v2298_v23  ;;  %v6988_v10 = vsub.f32 %v6653_v25, %v2298_v23  ;;  %v6991_v53 = vsub.f32 %v6680_v44, %v2298_v23  ;;  %v2415_v5 = vadd.f32 %v2366_v57, %v2365_v33 }
 0x220   : > { %v6994_v31 = vsub.f32 %v6674_v12, %v2296_v3  ;;  %v6997_v13 = vsub.f32 %v6665_v55, %v2296_v3  ;;  %v2407_v2 = vadd.f32 %v2360_v46, %v2359_v41  ;;  %v2361_v44 = vmul.f32 %v6972_v50, %v6972_v50 }
 0x221   : > { %v2416_v0 = vadd.f32 %v2415_v5, %v2367_v49  ;;  %v2368_v39 = vmul.f32 %v6985_v59, %v6985_v59  ;;  %v2369_v36 = vmul.f32 %v6988_v10, %v6988_v10  ;;  %v7010_v55 = vsub.f32 %v6691_v58, %v2296_v3 }
 0x222   : > { %v2257_v25 = vpop.xlane.xlu0 %2256  ;;  %v2362_v56 = vmul.f32 %v6994_v31, %v6994_v31  ;;  %v2363_v12 = vmul.f32 %v6997_v13, %v6997_v13  ;;  %v2370_v30 = vmul.f32 %v6991_v53, %v6991_v53  ;;  %v2408_v57 = vadd.f32 %v2407_v2, %v2361_v44 }
 0x223   : > { %v2301_v23 = vmul.f32 0.0026041667, %v2257_v25  ;;  %2417 = vadd.xlane.f32.xlu0 %v2416_v0  ;;  %v2419_v33 = vadd.f32 %v2369_v36, %v2368_v39  ;;  %v2364_v58 = vmul.f32 %v7010_v55, %v7010_v55 }
 0x224   : > { %v2411_v49 = vadd.f32 %v2363_v12, %v2362_v56 }
 0x225   : > { %v7015_v41 = vsub.f32 %v6698_v19, %v2301_v23  ;;  %v7018_v46 = vsub.f32 %v6687_v61, %v2301_v23  ;;  %v7021_v5 = vsub.f32 %v6705_v27, %v2301_v23  ;;  %v2420_v32 = vadd.f32 %v2419_v33, %v2370_v30 }
 0x226   : > { %v2412_v0 = vadd.f32 %v2411_v49, %v2364_v58 }
 0x227   : > { %8685 = vst [vmem:[#allocation75_spill] sm:$0xff] %v7021_v5  ;;  %2421 = vadd.xlane.f32.xlu1 %v2420_v32  ;;  %2409 = vadd.xlane.f32.xlu0 %v2408_v57  ;;  %v2377_v3 = vmul.f32 %v7015_v41, %v7015_v41  ;;  %v2378_v2 = vmul.f32 %v7018_v46, %v7018_v46 }
 0x228   : > { %v2261_v19 = vpop.xlane.xlu1 %2260  ;;  %v2379_v61 = vmul.f32 %v7021_v5, %v7021_v5 }
 0x229   : > { %v2431_v39 = vadd.f32 %v2378_v2, %v2377_v3  ;;  %v2302_v27 = vmul.f32 0.0026041667, %v2261_v19 }
 0x22b   : > { %2413 = vadd.xlane.f32.xlu0 %v2412_v0  ;;  %v2432_v36 = vadd.f32 %v2431_v39, %v2379_v61  ;;  %v7032_v32 = vsub.f32 %v6715_v28, %v2302_v27  ;;  %v7035_v25 = vsub.f32 %v6712_v7, %v2302_v27  ;;  %v7064_v19 = vsub.f32 %v6722_v52, %v2302_v27 }
 0x22c   : > { %v2249_v44 = vpop.xlane.xlu0 %2248 }
 0x22d   : > { %8686 = vst [vmem:[#allocation79_spill] sm:$0xff] %v7035_v25  ;;  %2433 = vadd.xlane.f32.xlu1 %v2432_v36  ;;  %v2299_v56 = vmul.f32 0.0026041667, %v2249_v44  ;;  %v2380_v28 = vmul.f32 %v7032_v32, %v7032_v32  ;;  %v2381_v7 = vmul.f32 %v7035_v25, %v7035_v25  ;;  %8687 = vst [vmem:[#allocation60_spill] sm:$0xff] %v7064_v19  ;;  %v8690_v25 = vld [vmem:[#allocation84_spill] sm:$0xff] }
 0x22f   : > { %v2253_v12 = vpop.xlane.xlu1 %2252  ;;  %v7038_v23 = vsub.f32 %v6727_v34, %v2299_v56  ;;  %v7041_v30 = vsub.f32 %v6718_v40, %v2299_v56  ;;  %v7044_v57 = vsub.f32 %v6741_v62, %v2299_v56  ;;  %v2435_v44 = vadd.f32 %v2381_v7, %v2380_v28  ;;  %v8691_v28 = vld [vmem:[#allocation85_spill] sm:$0xff] }
 0x230   : > { %v2300_v33 = vmul.f32 0.0026041667, %v2253_v12 }
 0x231   : > { %v2371_v40 = vmul.f32 %v7038_v23, %v7038_v23  ;;  %v2273_v62 = vpop.xlane.xlu0 %2272  ;;  %v2372_v3 = vmul.f32 %v7041_v30, %v7041_v30 }
 0x232   : > { %v7051_v49 = vsub.f32 %v6738_v9, %v2300_v33  ;;  %v7054_v58 = vsub.f32 %v6730_v20, %v2300_v33  ;;  %v7057_v34 = vsub.f32 %v6752_v35, %v2300_v33  ;;  %v2305_v2 = vmul.f32 0.0026041667, %v2273_v62 }
 0x233   : > { %v2277_v0 = vpop.xlane.xlu1 %2276  ;;  %v2373_v35 = vmul.f32 %v7044_v57, %v7044_v57  ;;  %v2423_v61 = vadd.f32 %v2372_v3, %v2371_v40 }
 0x234   : > { %v2374_v9 = vmul.f32 %v7051_v49, %v7051_v49  ;;  %v2375_v20 = vmul.f32 %v7054_v58, %v7054_v58  ;;  %v7073_v39 = vsub.f32 %v6755_v38, %v2305_v2  ;;  %v7076_v36 = vsub.f32 %v6748_v21, %v2305_v2 }
 0x235   : > { %v2376_v52 = vmul.f32 %v7057_v34, %v7057_v34  ;;  %v2306_v56 = vmul.f32 0.0026041667, %v2277_v0  ;;  %v2424_v12 = vadd.f32 %v2423_v61, %v2373_v35  ;;  %v7081_v33 = vsub.f32 %v6762_v24, %v2305_v2  ;;  %v2265_v62 = vpop.xlane.xlu0 %2264  ;;  %v8693_v35 = vld [vmem:[#allocation66_spill] sm:$0xff] }
 0x236   : > { %8688 = vst [vmem:[#allocation71_spill] sm:$0xff] %v7073_v39  ;;  %v2427_v27 = vadd.f32 %v2375_v20, %v2374_v9  ;;  %v2389_v40 = vmul.f32 %v7073_v39, %v7073_v39  ;;  %v2390_v38 = vmul.f32 %v7076_v36, %v7076_v36  ;;  %v2382_v21 = vmul.f32 %v7064_v19, %v7064_v19  ;;  %v8696_v19 = vld [vmem:[#allocation70_spill] sm:$0xff] }
 0x237   : > { %8689 = vst [vmem:[#allocation57_spill] sm:$0xff] %v7081_v33  ;;  %v7090_v5 = vsub.f32 %v8690_v25, %v2306_v56  ;;  %2425 = vadd.xlane.f32.xlu0 %v2424_v12  ;;  %v7093_v7 = vsub.f32 %v8691_v28, %v2306_v56  ;;  %v2303_v24 = vmul.f32 0.0026041667, %v2265_v62  ;;  %v2269_v2 = vpop.xlane.xlu1 %2268  ;;  %v2391_v25 = vmul.f32 %v7081_v33, %v7081_v33  ;;  %v8698_v12 = vld [vmem:[#allocation67_spill] sm:$0xff]  ;;  %v8699_v62 = vld [vmem:[#allocation65_spill] sm:$0xff] }
 0x238   : > { %v2428_v3 = vadd.f32 %v2427_v27, %v2376_v52  ;;  %v2447_v9 = vadd.f32 %v2390_v38, %v2389_v40  ;;  %v2436_v20 = vadd.f32 %v2435_v44, %v2382_v21  ;;  %v2304_v0 = vmul.f32 0.0026041667, %v2269_v2  ;;  %v8695_v52 = vld [vmem:[#allocation73_spill] sm:$0xff] }
 0x239   : > { %8692 = vst [vmem:[#allocation69_spill] sm:$0xff] %v7093_v7  ;;  %v7096_v61 = vsub.f32 %v8693_v35, %v2303_v24  ;;  %v7099_v27 = vsub.f32 %v8695_v52, %v2303_v24  ;;  %v7102_v39 = vsub.f32 %v8696_v19, %v2303_v24  ;;  %v8700_v44 = vld [vmem:[#allocation81_spill] sm:$0xff]  ;;  %v2393_v2 = vmul.f32 %v7093_v7, %v7093_v7  ;;  %v8701_v52 = vld [vmem:[#allocation72_spill] sm:$0xff] }
 0x23a   : > { %2429 = vadd.xlane.f32.xlu1 %v2428_v3  ;;  %v7107_v28 = vsub.f32 %v8698_v12, %v2304_v0  ;;  %v7110_v40 = vsub.f32 %v8699_v62, %v2304_v0  ;;  %v7113_v38 = vsub.f32 %v8700_v44, %v2304_v0  ;;  %v2392_v3 = vmul.f32 %v7090_v5, %v7090_v5 }
 0x23b   : > { %8694 = vst [vmem:[#allocation80_spill] sm:$0xff] %v7096_v61  ;;  %8697 = vst [vmem:[#allocation78_spill] sm:$0xff] %v7102_v39  ;;  %2437 = vadd.xlane.f32.xlu0 %v2436_v20  ;;  %v2448_v21 = vadd.f32 %v2447_v9, %v2391_v25  ;;  %v2383_v19 = vmul.f32 %v7096_v61, %v7096_v61  ;;  %v2384_v24 = vmul.f32 %v7099_v27, %v7099_v27  ;;  %v574_v61 = vld [vmem:[%s5914_s26 + $0x50] sm:$0xff] }
 0x23c   : > { %v2386_v35 = vmul.f32 %v7107_v28, %v7107_v28  ;;  %v2387_v0 = vmul.f32 %v7110_v40, %v7110_v40  ;;  %v7128_v12 = vsub.f32 %v8701_v52, %v2306_v56  ;;  %v2385_v9 = vmul.f32 %v7102_v39, %v7102_v39  ;;  %v573_v39 = vld [vmem:[%s5914_s26 + $0x48] sm:$0xff] }
 0x23d   : > { %v2439_v20 = vadd.f32 %v2384_v24, %v2383_v19  ;;  %v2388_v25 = vmul.f32 %v7113_v38, %v7113_v38  ;;  %v2451_v7 = vadd.f32 %v2393_v2, %v2392_v3  ;;  %v575_v19 = vld [vmem:[%s5914_s26 + $0x58] sm:$0xff]  ;;  %v576_v24 = vld [vmem:[%s5914_s26 + $0x60] sm:$0xff] }
 0x23e   : > { %v2443_v62 = vadd.f32 %v2387_v0, %v2386_v35  ;;  %v2394_v56 = vmul.f32 %v7128_v12, %v7128_v12  ;;  %v7140_v35 = vpop.permute.xlu1 %2753 }
 0x23f   : > { %2449 = vadd.xlane.f32.xlu0 %v2448_v21  ;;  %v2440_v44 = vadd.f32 %v2439_v20, %v2385_v9  ;;  %v7142_v21 = vpop.permute.xlu0 %2761 }
 0x240   : > { %v2444_v33 = vadd.f32 %v2443_v62, %v2388_v25  ;;  %v2452_v52 = vadd.f32 %v2451_v7, %v2394_v56 }
 0x241   : > { %2441 = vadd.xlane.f32.xlu1 %v2440_v44 }
 0x243   : > { %2445 = vadd.xlane.f32.xlu0 %v2444_v33 }
 0x245   : > { %2453 = vadd.xlane.f32.xlu1 %v2452_v52 }
 0x256   : > { %2777 = vperm.xlu1 %5303, %v574_v61  }
 0x259   : > { %2769 = vperm.xlu0 %5302, %v573_v39  }
 0x25a   : > { %2785 = vperm.xlu1 %5303, %v575_v19  }
 0x25e   : > { %2793 = vperm.xlu1 %5303, %v576_v24  }
 0x26a   : > { %v2281_v2 = vpop.xlane.xlu0 %2280 }
 0x26b   : > { %v2307_v39 = vmul.f32 0.0026041667, %v2281_v2 }
 0x26c   : > { %v2289_v3 = vpop.xlane.xlu1 %2288 }
 0x26d   : > { %v2309_v0 = vmul.f32 0.0026041667, %v2289_v3 }
 0x26f   : > { %v7145_v9 = vsub.f32 %v6909_v16, %v2309_v0  ;;  %v7148_v33 = vsub.f32 %v6904_v26, %v2309_v0  ;;  %v7151_v7 = vsub.f32 %v6912_v22, %v2309_v0  ;;  %v7160_v16 = vsub.f32 %v6898_v6, %v2307_v39 }
 0x270   : > { %v2293_v61 = vpop.xlane.xlu1 %2292  ;;  %v7163_v26 = vsub.f32 %v6895_v48, %v2307_v39 }
 0x271   : > { %8702 = vst [vmem:[#allocation83_spill] sm:$0xff] %v7151_v7  ;;  %v2401_v20 = vmul.f32 %v7145_v9, %v7145_v9  ;;  %v2402_v25 = vmul.f32 %v7148_v33, %v7148_v33  ;;  %v2403_v62 = vmul.f32 %v7151_v7, %v7151_v7  ;;  %8703 = vst [vmem:[#allocation82_spill] sm:$0xff] %v7160_v16  ;;  %v2310_v22 = vmul.f32 0.0026041667, %v2293_v61 }
 0x272   : > { %v2395_v48 = vmul.f32 %v7160_v16, %v7160_v16  ;;  %v7189_v61 = vsub.f32 %v6901_v47, %v2307_v39 }
 0x273   : > { %v2463_v44 = vadd.f32 %v2402_v25, %v2401_v20  ;;  %v7175_v0 = vsub.f32 %v6921_v42, %v2310_v22  ;;  %v7178_v6 = vsub.f32 %v6918_v17, %v2310_v22 }
 0x274   : > { %v2285_v56 = vpop.xlane.xlu1 %2284  ;;  %8706 = vst [vmem:[#allocation86_spill] sm:$0xff] %v7189_v61  ;;  %v2397_v47 = vmul.f32 %v7189_v61, %v7189_v61 }
 0x275   : > { %v2308_v52 = vmul.f32 0.0026041667, %v2285_v56  ;;  %v2464_v19 = vadd.f32 %v2463_v44, %v2403_v62  ;;  %8704 = vst [vmem:[#allocation76_spill] sm:$0xff] %v7175_v0  ;;  %8705 = vst [vmem:[#allocation74_spill] sm:$0xff] %v7178_v6  ;;  %v2404_v25 = vmul.f32 %v7175_v0, %v7175_v0  ;;  %v2405_v62 = vmul.f32 %v7178_v6, %v7178_v6  ;;  %v8710_v6 = vld [vmem:[#allocation36_spill] sm:$0xff] }
 0x276   : > { %v7198_v56 = vsub.f32 %v6925_v1, %v2310_v22  ;;  %v2876_v1 = vld [vmem:[%s2875_s28] sm:$0xff]  ;;  %s2228_s28 = scalar_lea.vmem %s8482_s7, %s6185_s14  ;;  %s4917_s14 = sshll.u32 %s5741_s16, 2 }
 0x277   : > { %v7166_v24 = vsub.f32 %v6934_v37, %v2308_v52  ;;  %v7169_v3 = vsub.f32 %v6930_v29, %v2308_v52  ;;  %v7172_v2 = vsub.f32 %v6937_v60, %v2308_v52  ;;  %v2396_v37 = vmul.f32 %v7163_v26, %v7163_v26  ;;  %s5665_s16 = scalar_lea.vmem %s8418_s29, 2048 }
 0x278   : > { %2465 = vadd.xlane.f32.xlu0 %v2464_v19  ;;  %8707 = vst [vmem:[#allocation84_spill] sm:$0xff] %v7198_v56  ;;  %v2467_v52 = vadd.f32 %v2405_v62, %v2404_v25  ;;  %v2406_v19 = vmul.f32 %v7198_v56, %v7198_v56  ;;  %p5666_p0 = scmp.ne.s32.totalorder %s8418_s29, %s5665_s16 }
 0x279   : > { %v2398_v29 = vmul.f32 %v7166_v24, %v7166_v24  ;;  %v2399_v60 = vmul.f32 %v7169_v3, %v7169_v3  ;;  %v2400_v17 = vmul.f32 %v7172_v2, %v7172_v2  ;;  %v2455_v20 = vadd.f32 %v2396_v37, %v2395_v48  ;;  %v577_v37 = vld [vmem:[%s5914_s26 + $0x68] sm:$0xff] }
 0x27a   : > { %v2468_v48 = vadd.f32 %v2467_v52, %v2406_v19  ;;  %p5667_p1 = pnand %p5666_p0, %p5887_p3 }
 0x27b   : > { %v2459_v42 = vadd.f32 %v2399_v60, %v2398_v29  ;;  %v2456_v39 = vadd.f32 %v2455_v20, %v2397_v47  ;;  %v578_v29 = vld [vmem:[%s5914_s26 + $0x70] sm:$0xff]  ;;  %v579_v60 = vld [vmem:[%s5914_s26 + $0x78] sm:$0xff]  ;;  %s5003_s26 = sshll.u32 %s5745_s17, 11  ;;  %s8424_s17 = scalar_lea.sflag [#allocation3], %s487_s22 }
 0x27c   : > { %p5668_p2 = pneg %p5667_p1 }
 0x27d   : > { %v2460_v44 = vadd.f32 %v2459_v42, %v2400_v17 }
 0x27f   : > { %2461 = vadd.xlane.f32.xlu0 %v2460_v44 }
 0x282   : > { %2457 = vadd.xlane.f32.xlu1 %v2456_v39 }
 0x286   : > { %2469 = vadd.xlane.f32.xlu1 %v2468_v48 }
 0x295   : > { %2801 = vperm.xlu0 %5302, %v577_v37  }
 0x297   : > { %2809 = vperm.xlu1 %5303, %v578_v29   ;;  %v2227_v29 = vld [vmem:[%s2226_s20] sm:$0x7]  ;;  %s2872_s20 = scalar_lea.vmem %s8483_s8, %s4917_s14 }
 0x29b   : > { %2817 = vperm.xlu1 %5303, %v579_v60  }
 0x29f   : > { %2879 = vperm.xlu1 %5303, %v2876_v1   ;;  %v8708_v1 = vld [vmem:[#allocation59_spill] sm:$0xff] }
 0x2ac   : > { %v2418_v22 = vpop.xlane.xlu0 %2417 }
 0x2ad   : > { %v2473_v17 = vmul.f32 0.0026041667, %v2418_v22  ;;  %v7220_v22 = vrot.slane %v2227_v29, %v8708_v1 }
 0x2af   : > { %v2489_v42 = vadd.f32 1e-05, %v2473_v17 }
 0x2b0   : > { %v2422_v20 = vpop.xlane.xlu1 %2421  ;;  %v2410_v25 = vpop.xlane.xlu0 %2409 }
 0x2b1   : > { %5488 = vrsqrt.f32 %v2489_v42  ;;  %v2474_v62 = vmul.f32 0.0026041667, %v2422_v20  ;;  %v2471_v44 = vmul.f32 0.0026041667, %v2410_v25  ;;  %v2229_v42 = vld [vmem:[%s2228_s28] sm:$0x7] }
 0x2b2   : > { %v8709_v25 = vld [vmem:[#allocation56_spill] sm:$0xff]  ;;  %s5669_s28 = sshll.u32 %s5760_s27, 4  ;;  %s5670_s28 = int_to_ptr.vmem [resolvable:$false] %s5669_s28 }
 0x2b3   : > { %v2490_v47 = vadd.f32 1e-05, %v2474_v62  ;;  %v2487_v39 = vadd.f32 1e-05, %v2471_v44  ;;  %v7223_v62 = vrot.slane %v2227_v29, %v8709_v25  ;;  %s5671_s14 = scalar_lea.vmem %s5670_s28, 4096  ;;  %p5672_p4 = scmp.lt.s32.totalorder %s8418_s29, %s5670_s28 }
 0x2b4   : > { %v2414_v52 = vpop.xlane.xlu0 %2413  ;;  %p5673_p5 = scmp.lt.s32.totalorder %s5671_s14, %s5665_s16 }
 0x2b5   : > { %5490 = vrsqrt.f32 %v2490_v47  ;;  %v2472_v19 = vmul.f32 0.0026041667, %v2414_v52 }
 0x2b6   : > { %5492 = vrsqrt.f32 %v2487_v39  ;;  %v2434_v37 = vpop.xlane.xlu1 %2433  ;;  %v7228_v39 = vrot.slane %v2229_v42, %v8708_v1  ;;  %p5674_p6 = por %p5673_p5, %p5672_p4 }
 0x2b7   : > { %v2488_v48 = vadd.f32 1e-05, %v2472_v19  ;;  %v2477_v60 = vmul.f32 0.0026041667, %v2434_v37  ;;  %v7234_v37 = vrot.slane %v2229_v42, %v8709_v25 }
 0x2b8   : > { %p5675_p7 = pnand %p5674_p6, %p5668_p2 }
 0x2b9   : > { %5494 = vrsqrt.f32 %v2488_v48  ;;  %v2493_v20 = vadd.f32 1e-05, %v2477_v60  ;;  %v7237_v60 = vrot.slane %v2227_v29, %v8710_v6 }
 0x2bb   : > { %5496 = vrsqrt.f32 %v2493_v20 }
 0x2be   : > { %v5489_v17 = vpop.eup %5488 }
 0x2bf   : > { %v2526_v44 = vmul.f32 %v5489_v17, %v6960_v45  ;;  %v2525_v47 = vmul.f32 %v5489_v17, %v6957_v14  ;;  %v7240_v14 = vrot.slane %v2229_v42, %v8710_v6 }
 0x2c0   : > { %v2426_v48 = vpop.xlane.xlu0 %2425 }
 0x2c1   : > { %v2590_v52 = vmul.f32 %v7220_v22, %v2526_v44  ;;  %v2475_v0 = vmul.f32 0.0026041667, %v2426_v48  ;;  %v2589_v1 = vmul.f32 %v7223_v62, %v2525_v47  ;;  %v2527_v48 = vmul.f32 %v5489_v17, %v6963_v43 }
 0x2c2   : > { %v7231_v19 = vpop.eup %5490 }
 0x2c3   : > { %v5493_v56 = vpop.eup %5492  ;;  %v2430_v45 = vpop.xlane.xlu1 %2429  ;;  %v2491_v16 = vadd.f32 1e-05, %v2475_v0  ;;  %v2654_v29 = vadd.f32 %v7228_v39, %v2590_v52  ;;  %v2528_v20 = vmul.f32 %v7231_v19, %v6985_v59  ;;  %v2653_v59 = vadd.f32 %v7234_v37, %v2589_v1 }
 0x2c4   : > { %v2476_v7 = vmul.f32 0.0026041667, %v2430_v45  ;;  %v2520_v44 = vmul.f32 %v5493_v56, %v6969_v11  ;;  %v2519_v61 = vmul.f32 %v5493_v56, %v6966_v18  ;;  %v2521_v25 = vmul.f32 %v5493_v56, %v6972_v50  ;;  %v2438_v47 = vpop.xlane.xlu0 %2437 }
 0x2c5   : > { %5498 = vrsqrt.f32 %v2491_v16 }
 0x2c6   : > { %v5495_v6 = vpop.eup %5494  ;;  %v2492_v42 = vadd.f32 1e-05, %v2476_v7  ;;  %v2584_v45 = vmul.f32 %v7220_v22, %v2520_v44  ;;  %v2583_v11 = vmul.f32 %v7223_v62, %v2519_v61  ;;  %v2585_v18 = vmul.f32 %v7237_v60, %v2521_v25 }
 0x2c7   : > { %v2522_v50 = vmul.f32 %v5495_v6, %v6994_v31  ;;  %v2524_v0 = vmul.f32 %v5495_v6, %v7010_v55  ;;  %v2523_v16 = vmul.f32 %v5495_v6, %v6997_v13  ;;  %v2592_v31 = vmul.f32 %v7223_v62, %v2528_v20 }
 0x2c8   : > { %5500 = vrsqrt.f32 %v2492_v42  ;;  %v2648_v43 = vadd.f32 %v7228_v39, %v2584_v45  ;;  %v2647_v7 = vadd.f32 %v7234_v37, %v2583_v11  ;;  %v2649_v56 = vadd.f32 %v7240_v14, %v2585_v18  ;;  %v2450_v55 = vpop.xlane.xlu0 %2449 }
 0x2c9   : > { %v2586_v61 = vmul.f32 %v7223_v62, %v2522_v50  ;;  %v2588_v17 = vmul.f32 %v7237_v60, %v2524_v0  ;;  %v2478_v25 = vmul.f32 0.0026041667, %v2438_v47  ;;  %v2481_v42 = vmul.f32 0.0026041667, %v2450_v55 }
 0x2ca   : > { %v2701_v1 = vmul.f32 %v6946_v15, %v2648_v43  ;;  %v2700_v52 = vmul.f32 %v6946_v15, %v2647_v7  ;;  %v2702_v44 = vmul.f32 %v6946_v15, %v2649_v56  ;;  %v2717_v18 = vmul.f32 %v6944_v8, %v2654_v29  ;;  %v2442_v13 = vpop.xlane.xlu1 %2441 }
 0x2cb   : > { %v2650_v45 = vadd.f32 %v7234_v37, %v2586_v61  ;;  %v2652_v11 = vadd.f32 %v7240_v14, %v2588_v17  ;;  %v2587_v20 = vmul.f32 %v7220_v22, %v2523_v16  ;;  %v2591_v6 = vmul.f32 %v7237_v60, %v2527_v48  ;;  %v7282_v48 = vld [vmem:[%s2872_s20] sm:$0xf] }
 0x2cc   : > { %v2824_v50 = vpack.c.bf16 %v2701_v1, %v2701_v1  ;;  %v2823_v0 = vpack.c.bf16 %v2700_v52, %v2700_v52  ;;  %v2825_v43 = vpack.c.bf16 %v2702_v44, %v2702_v44  ;;  %v2716_v7 = vmul.f32 %v6944_v8, %v2653_v59  ;;  %v2446_v55 = vpop.xlane.xlu0 %2445  ;;  %v7284_v44 = vpop.eup %5496 }
 0x2cd   : > { %v2708_v15 = vmul.f32 %v6942_v54, %v2650_v45  ;;  %v2710_v47 = vmul.f32 %v6942_v54, %v2652_v11  ;;  %v2494_v56 = vadd.f32 1e-05, %v2478_v25  ;;  %v2651_v61 = vadd.f32 %v7228_v39, %v2587_v20 }
 0x2ce   : > { %4919 = vmatprep.subr.msk.bf16.mxu0 %vm2886_vm0, %v2824_v50  ;;  %v2888_v29 = vsel %vm2886_vm0, %v2823_v0, 0  ;;  %v2656_v17 = vadd.f32 %v7234_v37, %v2592_v31  ;;  %v2497_v16 = vadd.f32 1e-05, %v2481_v42  ;;  %v2830_v45 = vpack.c.bf16 %v2717_v18, %v2717_v18  ;;  %v2454_v50 = vpop.xlane.xlu1 %2453 }
 0x2cf   : > { %3046 = vmatpush1.bf16.msra.mxu0 %v2888_v29  ;;  %v2826_v1 = vpack.c.bf16 %v2708_v15, %v2708_v15  ;;  %v2828_v52 = vpack.c.bf16 %v2710_v47, %v2710_v47  ;;  %v2479_v59 = vmul.f32 0.0026041667, %v2442_v13  ;;  %v2709_v25 = vmul.f32 %v6942_v54, %v2651_v61 }
 0x2d0   : > { %v2724_v11 = vmul.f32 %v6948_v51, %v2656_v17  ;;  %v2480_v0 = vmul.f32 0.0026041667, %v2446_v55  ;;  %v2894_v31 = vsel %vm2886_vm0, %v2825_v43, 0  ;;  %v2829_v42 = vpack.c.bf16 %v2716_v7, %v2716_v7 }
 0x2d1   : > { %4921 = vmatprep.subr.msk.bf16.mxu1 %vm2886_vm0, %v2826_v1  ;;  %4923 = vmatprep.subr.msk.bf16.mxu0 %vm2886_vm0, %v2828_v52  ;;  %v2530_v20 = vmul.f32 %v7231_v19, %v6991_v53  ;;  %v2655_v18 = vadd.f32 %v7240_v14, %v2591_v6  ;;  %5502 = vrsqrt.f32 %v2494_v56  ;;  %v2827_v54 = vpack.c.bf16 %v2709_v25, %v2709_v25 }
 0x2d2   : > { %4920 = vmatmul.mubr.msk.bf16.vlgmr.msra.gmra.mxu0 %vm2882_vm1, %v7282_v48  ;;  %3087 = vmatpush1.bf16.msra.mxu1 %v2894_v31  ;;  %v2482_v13 = vmul.f32 0.0026041667, %v2454_v50  ;;  %v2496_v15 = vadd.f32 1e-05, %v2480_v0  ;;  %5504 = vrsqrt.f32 %v2497_v16  ;;  %v8711_v43 = vmov 0   ;;  %v5499_v6 = vpop.eup %5498 }
 0x2d3   : > { %4925 = vmatprep.subr.msk.bf16.mxu1 %vm2886_vm0, %v2830_v45  ;;  %v2594_v47 = vmul.f32 %v7237_v60, %v2530_v20  ;;  %3145 = vmatprep.mubr.bf16.mxu0 %v8711_v43  ;;  %v2718_v7 = vmul.f32 %v6944_v8, %v2655_v18  ;;  %v2529_v53 = vmul.f32 %v7231_v19, %v6988_v10  ;;  %v2495_v56 = vadd.f32 1e-05, %v2479_v59 }
 0x2d4   : > { %v2900_v29 = vsel %vm2886_vm0, %v2827_v54, 0  ;;  %v2832_v61 = vpack.c.bf16 %v2724_v11, %v2724_v11  ;;  %5506 = vrsqrt.f32 %v2496_v15  ;;  %v2906_v55 = vsel %vm2886_vm0, %v2829_v42, 0 }
 0x2d5   : > { %v7303_v17 = vpop.eup %5500  ;;  %3128 = vmatpush1.bf16.msra.mxu0 %v2900_v29  ;;  %4922 = vmatmul.mubr.msk.bf16.vlgmr.msra.gmra.mxu1 %vm2882_vm1, %v7282_v48  ;;  %v2658_v16 = vadd.f32 %v7240_v14, %v2594_v47  ;;  %v2831_v8 = vpack.c.bf16 %v2718_v7, %v2718_v7  ;;  %v2532_v1 = vmul.f32 %v5499_v6, %v7041_v30  ;;  %v2498_v10 = vadd.f32 1e-05, %v2482_v13 }
 0x2d6   : > { %4927 = vmatprep.subr.msk.bf16.mxu0 %vm2886_vm0, %v2832_v61  ;;  %3169 = vmatpush1.bf16.msra.mxu1 %v2906_v55  ;;  %v2593_v19 = vmul.f32 %v7220_v22, %v2529_v53  ;;  %v2534_v52 = vmul.f32 %v7303_v17, %v7051_v49  ;;  %v2531_v45 = vmul.f32 %v5499_v6, %v7038_v23 }
 0x2d7   : > { %v2726_v59 = vmul.f32 %v6948_v51, %v2658_v16  ;;  %v2596_v25 = vmul.f32 %v7220_v22, %v2532_v1  ;;  %3186 = vmatprep.mubr.bf16.mxu1 %v8711_v43  ;;  %v2536_v30 = vmul.f32 %v7303_v17, %v7057_v34  ;;  %v2538_v11 = vmul.f32 %v7284_v44, %v7018_v46 }
 0x2d8   : > { %v2657_v50 = vadd.f32 %v7228_v39, %v2593_v19  ;;  %v2598_v0 = vmul.f32 %v7223_v62, %v2534_v52  ;;  %v2595_v49 = vmul.f32 %v7223_v62, %v2531_v45  ;;  %v2533_v23 = vmul.f32 %v5499_v6, %v7044_v57 }
 0x2d9   : > { %v2834_v31 = vpack.c.bf16 %v2726_v59, %v2726_v59  ;;  %v2912_v42 = vsel %vm2886_vm0, %v2831_v8, 0  ;;  %v2660_v20 = vadd.f32 %v7228_v39, %v2596_v25  ;;  %v2600_v18 = vmul.f32 %v7237_v60, %v2536_v30  ;;  %v8712_v30 = vld [vmem:[#allocation77_spill] sm:$0xff] }
 0x2da   : > { %4924 = vmatmul.mubr.msk.bf16.vlgmr.msra.gmra.mxu0 %vm2882_vm1, %v7282_v48  ;;  %v2725_v46 = vmul.f32 %v6948_v51, %v2657_v50  ;;  %v2662_v34 = vadd.f32 %v7234_v37, %v2598_v0  ;;  %v2659_v54 = vadd.f32 %v7234_v37, %v2595_v49  ;;  %v2597_v13 = vmul.f32 %v7237_v60, %v2533_v23 }
 0x2db   : > { %5508 = vrsqrt.f32 %v2498_v10  ;;  %4929 = vmatprep.subr.msk.bf16.mxu1 %vm2886_vm0, %v2834_v31  ;;  %3210 = vmatpush1.bf16.msra.mxu0 %v2912_v42  ;;  %v2733_v57 = vmul.f32 %v6950_v63, %v2660_v20  ;;  %v2664_v15 = vadd.f32 %v7240_v14, %v2600_v18  ;;  %v2602_v47 = vmul.f32 %v7220_v22, %v2538_v11 }
 0x2dc   : > { %v2833_v7 = vpack.c.bf16 %v2725_v46, %v2725_v46  ;;  %v2740_v53 = vmul.f32 %v6954_v4, %v2662_v34  ;;  %3227 = vmatprep.mubr.bf16.mxu0 %v8711_v43  ;;  %v2732_v51 = vmul.f32 %v6950_v63, %v2659_v54  ;;  %v2661_v6 = vadd.f32 %v7240_v14, %v2597_v13  ;;  %v8713_v46 = vld [vmem:[#allocation71_spill] sm:$0xff] }
 0x2dd   : > { %5510 = vrsqrt.f32 %v2495_v56  ;;  %v2836_v29 = vpack.c.bf16 %v2733_v57, %v2733_v57  ;;  %4926 = vmatmul.mubr.msk.bf16.vlgmr.msra.gmra.mxu1 %vm2882_vm1, %v7282_v48  ;;  %v2742_v8 = vmul.f32 %v6954_v4, %v2664_v15  ;;  %v2666_v10 = vadd.f32 %v7228_v39, %v2602_v47 }
 0x2de   : > { %v2918_v61 = vsel %vm2886_vm0, %v2833_v7, 0  ;;  %v2838_v55 = vpack.c.bf16 %v2740_v53, %v2740_v53  ;;  %v2835_v16 = vpack.c.bf16 %v2732_v51, %v2732_v51  ;;  %3268 = vmatprep.mubr.bf16.mxu1 %v8711_v43  ;;  %v5503_v1 = vpop.eup %5502  ;;  %v2734_v56 = vmul.f32 %v6950_v63, %v2661_v6  ;;  %v8715_v6 = vld [vmem:[#allocation75_spill] sm:$0xff] }
 0x2df   : > { %4931 = vmatprep.subr.msk.bf16.mxu0 %vm2886_vm0, %v2836_v29  ;;  %3251 = vmatpush1.bf16.msra.mxu1 %v2918_v61  ;;  %v7350_v19 = vpop.eup %5504  ;;  %v2840_v59 = vpack.c.bf16 %v2742_v8, %v2742_v8  ;;  %v2749_v11 = vmul.f32 %v8712_v30, %v2666_v10  ;;  %v2535_v63 = vmul.f32 %v7303_v17, %v7054_v58  ;;  %v8717_v10 = vld [vmem:[#allocation80_spill] sm:$0xff] }
 0x2e0   : > { %4933 = vmatprep.subr.msk.bf16.mxu1 %vm2886_vm0, %v2838_v55  ;;  %v2924_v45 = vsel %vm2886_vm0, %v2835_v16, 0  ;;  %v2837_v25 = vpack.c.bf16 %v2734_v56, %v2734_v56  ;;  %v2550_v49 = vmul.f32 %v7350_v19, %v7076_v36  ;;  %v2537_v58 = vmul.f32 %v7284_v44, %v7015_v41  ;;  %v8716_v16 = vld [vmem:[#allocation79_spill] sm:$0xff] }
 0x2e1   : > { %v5507_v52 = vpop.eup %5506  ;;  %v2842_v31 = vpack.c.bf16 %v2749_v11, %v2749_v11  ;;  %v2599_v36 = vmul.f32 %v7220_v22, %v2535_v63  ;;  %v2540_v17 = vmul.f32 %v5503_v1, %v7032_v32  ;;  %v2549_v34 = vmul.f32 %v7350_v19, %v8713_v46 }
 0x2e2   : > { %4928 = vmatmul.mubr.msk.bf16.vlgmr.msra.gmra.mxu0 %vm2882_vm1, %v7282_v48  ;;  %v2546_v50 = vmul.f32 %v5507_v52, %v7107_v28  ;;  %v2548_v0 = vmul.f32 %v5507_v52, %v7113_v38  ;;  %v2930_v23 = vsel %vm2886_vm0, %v2837_v25, 0  ;;  %v2547_v38 = vmul.f32 %v5507_v52, %v7110_v40 }
 0x2e3   : > { %3292 = vmatpush1.bf16.msra.mxu0 %v2924_v45  ;;  %3309 = vmatprep.mubr.bf16.mxu0 %v8711_v43  ;;  %v2614_v40 = vmul.f32 %v7220_v22, %v2550_v49  ;;  %v2663_v41 = vadd.f32 %v7228_v39, %v2599_v36  ;;  %v2604_v13 = vmul.f32 %v7223_v62, %v2540_v17  ;;  %v2770_v49 = vpop.permute.xlu0 %2769  ;;  %v8718_v17 = vld [vmem:[#allocation78_spill] sm:$0xff] }
 0x2e4   : > { %4935 = vmatprep.subr.msk.bf16.mxu0 %vm2886_vm0, %v2840_v59  ;;  %v2610_v42 = vmul.f32 %v7223_v62, %v2546_v50  ;;  %v2612_v20 = vmul.f32 %v7237_v60, %v2548_v0  ;;  %v2611_v32 = vmul.f32 %v7220_v22, %v2547_v38  ;;  %v2601_v47 = vmul.f32 %v7223_v62, %v2537_v58 }
 0x2e5   : > { %4930 = vmatmul.mubr.msk.bf16.vlgmr.msra.gmra.mxu1 %vm2882_vm1, %v7282_v48  ;;  %v2741_v7 = vmul.f32 %v6954_v4, %v2663_v41  ;;  %v2668_v53 = vadd.f32 %v7234_v37, %v2604_v13  ;;  %v2539_v29 = vmul.f32 %v7284_v44, %v8715_v6  ;;  %v2541_v8 = vmul.f32 %v5503_v1, %v8716_v16 }
 0x2e6   : > { %3350 = vmatprep.mubr.bf16.mxu1 %v8711_v43  ;;  %3333 = vmatpush1.bf16.msra.mxu1 %v2930_v23  ;;  %v2674_v57 = vadd.f32 %v7234_v37, %v2610_v42  ;;  %v2676_v15 = vadd.f32 %v7240_v14, %v2612_v20  ;;  %v2665_v61 = vadd.f32 %v7234_v37, %v2601_v47 }
 0x2e7   : > { %4937 = vmatprep.subr.msk.bf16.mxu1 %vm2886_vm0, %v2842_v31  ;;  %v2839_v56 = vpack.c.bf16 %v2741_v7, %v2741_v7  ;;  %v2756_v52 = vmul.f32 %v7140_v35, %v2668_v53  ;;  %v2603_v59 = vmul.f32 %v7237_v60, %v2539_v29  ;;  %v2605_v11 = vmul.f32 %v7220_v22, %v2541_v8 }
 0x2e8   : > { %v7370_v28 = vpop.eup %5508  ;;  %v2748_v25 = vmul.f32 %v8712_v30, %v2665_v61  ;;  %v2772_v20 = vmul.f32 %v2770_v49, %v2674_v57  ;;  %v2678_v6 = vadd.f32 %v7228_v39, %v2614_v40 }
 0x2e9   : > { %v2552_v54 = vmul.f32 %v7370_v28, %v7090_v5  ;;  %v8714_v5 = vld [vmem:[#allocation60_spill] sm:$0xff]  ;;  %v2936_v50 = vsel %vm2886_vm0, %v2839_v56, 0  ;;  %v2667_v63 = vadd.f32 %v7240_v14, %v2603_v59  ;;  %v2669_v38 = vadd.f32 %v7228_v39, %v2605_v11  ;;  %v2778_v56 = vpop.permute.xlu1 %2777 }
 0x2ea   : > { %v5511_v18 = vpop.eup %5510  ;;  %4932 = vmatmul.mubr.msk.bf16.vlgmr.msra.gmra.mxu0 %vm2882_vm1, %v7282_v48  ;;  %v2542_v51 = vmul.f32 %v5503_v1, %v8714_v5  ;;  %v2844_v1 = vpack.c.bf16 %v2756_v52, %v2756_v52  ;;  %v2841_v23 = vpack.c.bf16 %v2748_v25, %v2748_v25  ;;  %v2781_v52 = vmul.f32 %v2778_v56, %v2678_v6 }
 0x2eb   : > { %3391 = vmatprep.mubr.bf16.mxu0 %v8711_v43  ;;  %v2544_v55 = vmul.f32 %v5511_v18, %v7099_v27  ;;  %v2543_v4 = vmul.f32 %v5511_v18, %v8717_v10  ;;  %3374 = vmatpush1.bf16.msra.mxu0 %v2936_v50  ;;  %v2750_v36 = vmul.f32 %v8712_v30, %v2667_v63 }
 0x2ec   : > { %v2606_v45 = vmul.f32 %v7237_v60, %v2542_v51  ;;  %4939 = vmatprep.subr.msk.bf16.mxu0 %vm2886_vm0, %v2844_v1  ;;  %v2545_v46 = vmul.f32 %v5511_v18, %v8718_v17  ;;  %v2942_v41 = vsel %vm2886_vm0, %v2841_v23, 0  ;;  %v2757_v47 = vmul.f32 %v7140_v35, %v2669_v38  ;;  %v8719_v51 = vld [vmem:[#allocation57_spill] sm:$0xff] }
 0x2ed   : > { %4934 = vmatmul.mubr.msk.bf16.vlgmr.msra.gmra.mxu1 %vm2882_vm1, %v7282_v48  ;;  %v2608_v44 = vmul.f32 %v7220_v22, %v2544_v55  ;;  %v2607_v27 = vmul.f32 %v7223_v62, %v2543_v4  ;;  %v2843_v57 = vpack.c.bf16 %v2750_v36, %v2750_v36  ;;  %v2551_v30 = vmul.f32 %v7350_v19, %v8719_v51  ;;  %v2786_v63 = vpop.permute.xlu1 %2785 }
 0x2ee   : > { %3432 = vmatprep.mubr.bf16.mxu1 %v8711_v43  ;;  %v2670_v0 = vadd.f32 %v7240_v14, %v2606_v45  ;;  %3415 = vmatpush1.bf16.msra.mxu1 %v2942_v41  ;;  %v2609_v5 = vmul.f32 %v7237_v60, %v2545_v46  ;;  %v2613_v18 = vmul.f32 %v7223_v62, %v2549_v34  ;;  %v8720_v45 = vld [vmem:[#allocation69_spill] sm:$0xff] }
 0x2ef   : > { %v2672_v31 = vadd.f32 %v7228_v39, %v2608_v44  ;;  %v2671_v42 = vadd.f32 %v7234_v37, %v2607_v27  ;;  %v2845_v29 = vpack.c.bf16 %v2757_v47, %v2757_v47  ;;  %v2948_v61 = vsel %vm2886_vm0, %v2843_v57, 0 }
 0x2f0   : > { %v2758_v58 = vmul.f32 %v7140_v35, %v2670_v0  ;;  %v2554_v35 = vmul.f32 %v7370_v28, %v7128_v12  ;;  %v2673_v16 = vadd.f32 %v7240_v14, %v2609_v5  ;;  %v2616_v8 = vmul.f32 %v7223_v62, %v2552_v54 }
 0x2f1   : > { %v2765_v13 = vmul.f32 %v7142_v21, %v2672_v31  ;;  %v2764_v7 = vmul.f32 %v7142_v21, %v2671_v42  ;;  %v2675_v19 = vadd.f32 %v7228_v39, %v2611_v32  ;;  %v2850_v34 = vpack.c.bf16 %v2772_v20, %v2772_v20  ;;  %v7477_v51 = vpop.permute.xlu1 %2793 }
 0x2f2   : > { %v2846_v53 = vpack.c.bf16 %v2758_v58, %v2758_v58  ;;  %4936 = vmatmul.mubr.msk.bf16.vlgmr.msra.gmra.mxu0 %vm2882_vm1, %v7282_v48  ;;  %v2954_v40 = vsel %vm2886_vm0, %v2845_v29, 0  ;;  %v2774_v10 = vmul.f32 %v2770_v49, %v2676_v15  ;;  %v2766_v4 = vmul.f32 %v7142_v21, %v2673_v16 }
 0x2f3   : > { %3473 = vmatprep.mubr.bf16.mxu0 %v8711_v43  ;;  %v2848_v55 = vpack.c.bf16 %v2765_v13, %v2765_v13  ;;  %3456 = vmatpush1.bf16.msra.mxu0 %v2948_v61  ;;  %v2847_v12 = vpack.c.bf16 %v2764_v7, %v2764_v7  ;;  %v2615_v54 = vmul.f32 %v7237_v60, %v2551_v30 }
 0x2f4   : > { %4941 = vmatprep.subr.msk.bf16.mxu1 %vm2886_vm0, %v2846_v53  ;;  %v2677_v32 = vadd.f32 %v7234_v37, %v2613_v18  ;;  %v2553_v59 = vmul.f32 %v7370_v28, %v8720_v45  ;;  %v2618_v15 = vmul.f32 %v7237_v60, %v2554_v35  ;;  %v2849_v25 = vpack.c.bf16 %v2766_v4, %v2766_v4 }
 0x2f5   : > { %4938 = vmatmul.mubr.msk.bf16.vlgmr.msra.gmra.mxu1 %vm2882_vm1, %v7282_v48  ;;  %4943 = vmatprep.subr.msk.bf16.mxu0 %vm2886_vm0, %v2848_v55  ;;  %v2680_v44 = vadd.f32 %v7234_v37, %v2616_v8  ;;  %v2773_v11 = vmul.f32 %v2770_v49, %v2675_v19  ;;  %v2852_v21 = vpack.c.bf16 %v2774_v10, %v2774_v10  ;;  %v2960_v27 = vsel %vm2886_vm0, %v2847_v12, 0 }
 0x2f6   : > { %3497 = vmatpush1.bf16.msra.mxu1 %v2954_v40  ;;  %3514 = vmatprep.mubr.bf16.mxu1 %v8711_v43  ;;  %v2780_v50 = vmul.f32 %v2778_v56, %v2677_v32  ;;  %v2854_v1 = vpack.c.bf16 %v2781_v52, %v2781_v52  ;;  %v2617_v28 = vmul.f32 %v7220_v22, %v2553_v59  ;;  %v2966_v49 = vsel %vm2886_vm0, %v2849_v25, 0 }
 0x2f7   : > { %4945 = vmatprep.subr.msk.bf16.mxu1 %vm2886_vm0, %v2850_v34  ;;  %v2682_v0 = vadd.f32 %v7240_v14, %v2618_v15  ;;  %v2679_v23 = vadd.f32 %v7240_v14, %v2615_v54  ;;  %v2788_v31 = vmul.f32 %v2786_v63, %v2680_v44  ;;  %v2851_v38 = vpack.c.bf16 %v2773_v11, %v2773_v11 }
 0x2f8   : > { %v2853_v20 = vpack.c.bf16 %v2780_v50, %v2780_v50  ;;  %v2681_v58 = vadd.f32 %v7228_v39, %v2617_v28 }
 0x2f9   : > { %v2790_v36 = vmul.f32 %v2786_v63, %v2682_v0  ;;  %v2782_v46 = vmul.f32 %v2778_v56, %v2679_v23  ;;  %v2856_v41 = vpack.c.bf16 %v2788_v31, %v2788_v31  ;;  %v2972_v13 = vsel %vm2886_vm0, %v2851_v38, 0 }
 0x2fa   : > { %4940 = vmatmul.mubr.msk.bf16.vlgmr.msra.gmra.mxu0 %vm2882_vm1, %v7282_v48  ;;  %v2789_v7 = vmul.f32 %v2786_v63, %v2681_v58  ;;  %v2978_v57 = vsel %vm2886_vm0, %v2853_v20, 0  ;;  %v8724_v58 = vld [vmem:[#allocation76_spill] sm:$0xff] }
 0x2fb   : > { %3538 = vmatpush1.bf16.msra.mxu0 %v2960_v27  ;;  %3555 = vmatprep.mubr.bf16.mxu0 %v8711_v43  ;;  %v2858_v53 = vpack.c.bf16 %v2790_v36, %v2790_v36  ;;  %v2855_v5 = vpack.c.bf16 %v2782_v46, %v2782_v46 }
 0x2fc   : > { %4947 = vmatprep.subr.msk.bf16.mxu0 %vm2886_vm0, %v2852_v21  ;;  %v2857_v6 = vpack.c.bf16 %v2789_v7, %v2789_v7  ;;  %v8726_v7 = vld [vmem:[#allocation74_spill] sm:$0xff] }
 0x2fd   : > { %4942 = vmatmul.mubr.msk.bf16.vlgmr.msra.gmra.mxu1 %vm2882_vm1, %v7282_v48  ;;  %v2984_v29 = vsel %vm2886_vm0, %v2855_v5, 0 }
 0x2fe   : > { %3579 = vmatpush1.bf16.msra.mxu1 %v2966_v49  ;;  %3596 = vmatprep.mubr.bf16.mxu1 %v8711_v43  ;;  %v2990_v16 = vsel %vm2886_vm0, %v2857_v6, 0 }
 0x2ff   : > { %4949 = vmatprep.subr.msk.bf16.mxu1 %vm2886_vm0, %v2854_v1 }
 0x301   : > { %v2466_v42 = vpop.xlane.xlu0 %2465 }
 0x302   : > { %v2485_v17 = vmul.f32 0.0026041667, %v2466_v42  ;;  %4944 = vmatmul.mubr.msk.bf16.vlgmr.msra.gmra.mxu0 %vm2882_vm1, %v7282_v48 }
 0x303   : > { %3620 = vmatpush1.bf16.msra.mxu0 %v2972_v13  ;;  %3637 = vmatprep.mubr.bf16.mxu0 %v8711_v43 }
 0x304   : > { %4951 = vmatprep.subr.msk.bf16.mxu0 %vm2886_vm0, %v2856_v41  ;;  %v2501_v47 = vadd.f32 1e-05, %v2485_v17  ;;  %v8725_v17 = vld [vmem:[#allocation84_spill] sm:$0xff] }
 0x305   : > { %4946 = vmatmul.mubr.msk.bf16.vlgmr.msra.gmra.mxu1 %vm2882_vm1, %v7282_v48 }
 0x306   : > { %3661 = vmatpush1.bf16.msra.mxu1 %v2978_v57  ;;  %3678 = vmatprep.mubr.bf16.mxu1 %v8711_v43  ;;  %5512 = vrsqrt.f32 %v2501_v47 }
 0x307   : > { %4953 = vmatprep.subr.msk.bf16.mxu1 %vm2886_vm0, %v2858_v53 }
 0x308   : > { %v2462_v30 = vpop.xlane.xlu0 %2461 }
 0x309   : > { %v2484_v18 = vmul.f32 0.0026041667, %v2462_v30 }
 0x30a   : > { %4948 = vmatmul.mubr.msk.bf16.vlgmr.msra.gmra.mxu0 %vm2882_vm1, %v7282_v48 }
 0x30b   : > { %v2458_v35 = vpop.xlane.xlu1 %2457  ;;  %v2500_v61 = vadd.f32 1e-05, %v2484_v18  ;;  %3702 = vmatpush1.bf16.msra.mxu0 %v2984_v29  ;;  %3719 = vmatprep.mubr.bf16.mxu0 %v8711_v43 }
 0x30c   : > { %v2483_v55 = vmul.f32 0.0026041667, %v2458_v35 }
 0x30d   : > { %5514 = vrsqrt.f32 %v2500_v61  ;;  %4950 = vmatmul.mubr.msk.bf16.vlgmr.msra.gmra.mxu1 %vm2882_vm1, %v7282_v48 }
 0x30e   : > { %v2499_v8 = vadd.f32 1e-05, %v2483_v55  ;;  %3743 = vmatpush1.bf16.msra.mxu1 %v2990_v16  ;;  %3760 = vmatprep.mubr.bf16.mxu1 %v8711_v43 }
 0x30f   : > { %v2470_v19 = vpop.xlane.xlu1 %2469 }
 0x310   : > { %5516 = vrsqrt.f32 %v2499_v8  ;;  %v2486_v34 = vmul.f32 0.0026041667, %v2470_v19  ;;  %v2802_v28 = vpop.permute.xlu0 %2801 }
 0x312   : > { %v2502_v40 = vadd.f32 1e-05, %v2486_v34  ;;  %4952 = vmatmul.mubr.msk.bf16.vlgmr.msra.gmra.mxu0 %vm2882_vm1, %v7282_v48 }
 0x313   : > { %3801 = vmatprep.mubr.bf16.mxu0 %v8711_v43  ;;  %v5513_v10 = vpop.eup %5512  ;;  %v2810_v42 = vpop.permute.xlu1 %2809 }
 0x314   : > { %5518 = vrsqrt.f32 %v2502_v40  ;;  %v2561_v12 = vmul.f32 %v5513_v10, %v7145_v9  ;;  %v2562_v56 = vmul.f32 %v5513_v10, %v7148_v33  ;;  %v8721_v33 = vld [vmem:[#allocation82_spill] sm:$0xff] }
 0x315   : > { %4954 = vmatmul.mubr.msk.bf16.vlgmr.msra.gmra.mxu1 %vm2882_vm1, %v7282_v48 }
 0x316   : > { %3842 = vmatprep.mubr.bf16.mxu1 %v8711_v43  ;;  %v2625_v59 = vmul.f32 %v7223_v62, %v2561_v12  ;;  %v2626_v9 = vmul.f32 %v7220_v22, %v2562_v56 }
 0x318   : > { %v2689_v23 = vadd.f32 %v7234_v37, %v2625_v59  ;;  %v2690_v20 = vadd.f32 %v7228_v39, %v2626_v9 }
 0x31a   : > { %v5515_v4 = vpop.eup %5514  ;;  %v2812_v55 = vmul.f32 %v2810_v42, %v2689_v23  ;;  %v2813_v16 = vmul.f32 %v2810_v42, %v2690_v20  ;;  %v5385_v23 = vld [vmem:[%s6036_s18 + $0xa0] sm:$0xff]   ;;  %v5389_v20 = vld [vmem:[%s6036_s18 + $0x90] sm:$0xff]  }
 0x31b   : > { %v2558_v54 = vmul.f32 %v5515_v4, %v7166_v24  ;;  %v2559_v32 = vmul.f32 %v5515_v4, %v7169_v3  ;;  %v2560_v52 = vmul.f32 %v5515_v4, %v7172_v2  ;;  %v8722_v24 = vld [vmem:[#allocation86_spill] sm:$0xff]  ;;  %v8723_v3 = vld [vmem:[#allocation83_spill] sm:$0xff]  ;;  %v2818_v4 = vpop.permute.xlu1 %2817 }
 0x31c   : > { %v2563_v50 = vmul.f32 %v5513_v10, %v8723_v3 }
 0x31d   : > { %v5517_v45 = vpop.eup %5516  ;;  %v2622_v15 = vmul.f32 %v7223_v62, %v2558_v54  ;;  %v2623_v25 = vmul.f32 %v7220_v22, %v2559_v32  ;;  %v2624_v44 = vmul.f32 %v7237_v60, %v2560_v52 }
 0x31e   : > { %v2556_v11 = vmul.f32 %v5517_v45, %v7163_v26  ;;  %v2555_v21 = vmul.f32 %v5517_v45, %v8721_v33  ;;  %v2557_v27 = vmul.f32 %v5517_v45, %v8722_v24  ;;  %v2627_v13 = vmul.f32 %v7237_v60, %v2563_v50  ;;  %v5369_v50 = vld [vmem:[%s6036_s18 + $0x38] sm:$0xff]  }
 0x31f   : > { %v2686_v2 = vadd.f32 %v7234_v37, %v2622_v15  ;;  %v2687_v1 = vadd.f32 %v7228_v39, %v2623_v25  ;;  %v2688_v26 = vadd.f32 %v7240_v14, %v2624_v44  ;;  %v2866_v45 = vpack.c.bf16 %v2813_v16, %v2813_v16 }
 0x320   : > { %v2620_v0 = vmul.f32 %v7220_v22, %v2556_v11  ;;  %v2619_v63 = vmul.f32 %v7223_v62, %v2555_v21  ;;  %v2621_v38 = vmul.f32 %v7237_v60, %v2557_v27  ;;  %v2691_v10 = vadd.f32 %v7240_v14, %v2627_v13  ;;  %v5368_v21 = vld [vmem:[%s6036_s18 + $0x78] sm:$0xff]  }
 0x321   : > { %v5519_v49 = vpop.eup %5518  ;;  %v2804_v31 = vmul.f32 %v2802_v28, %v2686_v2  ;;  %v2805_v5 = vmul.f32 %v2802_v28, %v2687_v1  ;;  %v2806_v29 = vmul.f32 %v2802_v28, %v2688_v26  ;;  %v5376_v27 = vld [vmem:[%s6036_s18 + $0xb8] sm:$0xff]   ;;  %v5370_v2 = vld [vmem:[%s6036_s18 + $0x70] sm:$0xff]  }
 0x322   : > { %v2564_v36 = vmul.f32 %v5519_v49, %v8724_v58  ;;  %v2566_v46 = vmul.f32 %v5519_v49, %v8725_v17  ;;  %v2684_v41 = vadd.f32 %v7228_v39, %v2620_v0  ;;  %v2565_v53 = vmul.f32 %v5519_v49, %v8726_v7  ;;  %v5379_v1 = vld [vmem:[%s6036_s18 + $0xb0] sm:$0xff]   ;;  %v5372_v0 = vld [vmem:[%s6036_s18 + $0x68] sm:$0xff]   ;;  %v5374_v49 = vld [vmem:[%s6036_s18 + $0x60] sm:$0xff]  }
 0x323   : > { %v2862_v47 = vpack.c.bf16 %v2804_v31, %v2804_v31  ;;  %v2683_v57 = vadd.f32 %v7234_v37, %v2619_v63  ;;  %v2685_v61 = vadd.f32 %v7240_v14, %v2621_v38  ;;  %v2863_v12 = vpack.c.bf16 %v2805_v5, %v2805_v5  ;;  %v5371_v28 = vld [vmem:[%s6036_s18 + $0x30] sm:$0xff]   ;;  %v5373_v63 = vld [vmem:[%s6036_s18 + $0x28] sm:$0xff]   ;;  %v5377_v26 = vld [vmem:[%s6036_s18 + $0x58] sm:$0xff]  }
 0x324   : > { %v2628_v30 = vmul.f32 %v7223_v62, %v2564_v36  ;;  %v2630_v18 = vmul.f32 %v7237_v60, %v2566_v46  ;;  %v2797_v6 = vmul.f32 %v7477_v51, %v2684_v41  ;;  %v2629_v34 = vmul.f32 %v7220_v22, %v2565_v53  ;;  %v5388_v31 = vld [vmem:[%s6036_s18 + $0x98] sm:$0xff]   ;;  %v5648_v58 = vld [vmem:[%s6193_s24] sm:$0x7]  ;;  %v5381_v46 = vld [vmem:[%s6036_s18 + $0x10] sm:$0xff]   ;;  %s8812_s24 = sld [smem:[#allocation88_spill]] }
 0x325   : > { %4957 = vmatprep.subr.msk.bf16.mxu1 %vm2886_vm0, %v2862_v47  ;;  %v2796_v35 = vmul.f32 %v7477_v51, %v2683_v57  ;;  %v2798_v60 = vmul.f32 %v7477_v51, %v2685_v61  ;;  %v2864_v56 = vpack.c.bf16 %v2806_v29, %v2806_v29  ;;  %v3008_v25 = vsel %vm2886_vm0, %v2863_v12, 0  ;;  %v5378_v38 = vld [vmem:[%s6036_s18 + $0x18] sm:$0xff]   ;;  %v8727_v36 = vld [vmem:[#allocation56_spill] sm:$0xff]  ;;  %v5383_v41 = vld [vmem:[%s6036_s18 + $0x48] sm:$0xff]  }
 0x326   : > { %v2692_v8 = vadd.f32 %v7234_v37, %v2628_v30  ;;  %v2860_v19 = vpack.c.bf16 %v2797_v6, %v2797_v6  ;;  %v2694_v62 = vadd.f32 %v7240_v14, %v2630_v18  ;;  %v2865_v37 = vpack.c.bf16 %v2812_v55, %v2812_v55  ;;  %v8728_v13 = vld [vmem:[#allocation59_spill] sm:$0xff]  ;;  %v5390_v7 = vld [vmem:[%s6036_s18 + $0x88] sm:$0xff]   ;;  %v8729_v53 = vld [vmem:[#allocation12_spill] sm:$0xff] }
 0x327   : > { %v2859_v40 = vpack.c.bf16 %v2796_v35, %v2796_v35  ;;  %v2861_v52 = vpack.c.bf16 %v2798_v60, %v2798_v60  ;;  %v2693_v22 = vadd.f32 %v7228_v39, %v2629_v34  ;;  %v2814_v14 = vmul.f32 %v2810_v42, %v2691_v10  ;;  %v5380_v42 = vld [vmem:[%s6036_s18 + $0x50] sm:$0xff]   ;;  %v5384_v5 = vld [vmem:[%s6036_s18 + $0x8] sm:$0xff]   ;;  %v5386_v30 = vld [vmem:[%s6036_s18 + $0x40] sm:$0xff]  }
 0x328   : > { %4955 = vmatprep.subr.msk.bf16.mxu0 %vm2886_vm0, %v2860_v19  ;;  %v2820_v54 = vmul.f32 %v2818_v4, %v2692_v8  ;;  %v2822_v59 = vmul.f32 %v2818_v4, %v2694_v62  ;;  %v3014_v9 = vsel %vm2886_vm0, %v2865_v37, 0  ;;  %v7581_v17 = vrot.slane %v5648_v58, %v8727_v36  ;;  %v8730_v18 = vld [vmem:[#allocation38_spill] sm:$0xff]  ;;  %v8731_v6 = vld [vmem:[#allocation13_spill] sm:$0xff]  ;;  %v5391_v55 = vld [vmem:[%s6036_s18 + $0x80] sm:$0xff]  }
 0x329   : > { %v2996_v32 = vsel %vm2886_vm0, %v2859_v40, 0  ;;  %v3002_v15 = vsel %vm2886_vm0, %v2861_v52, 0  ;;  %v2821_v39 = vmul.f32 %v2818_v4, %v2693_v22  ;;  %v2867_v11 = vpack.c.bf16 %v2814_v14, %v2814_v14  ;;  %v8732_v35 = vld [vmem:[#allocation14_spill] sm:$0xff]  ;;  %v8733_v8 = vld [vmem:[#allocation15_spill] sm:$0xff]  ;;  %v5387_v34 = vld [vmem:[%s6036_s18] sm:$0xff]  }
 0x32a   : > { %3784 = vmatpush1.bf16.msra.mxu0 %v2996_v32  ;;  %3825 = vmatpush1.bf16.msra.mxu1 %v3002_v15  ;;  %v2868_v51 = vpack.c.bf16 %v2820_v54, %v2820_v54  ;;  %v2870_v44 = vpack.c.bf16 %v2822_v59, %v2822_v59  ;;  %v7586_v47 = vrot.slane %v5648_v58, %v8728_v13  ;;  %v8734_v62 = vld [vmem:[#allocation16_spill] sm:$0xff]  ;;  %v8737_v59 = vld [vmem:[#allocation18_spill] sm:$0xff] }
 0x32b   : > { %4959 = vmatprep.subr.msk.bf16.mxu0 %vm2886_vm0, %v2864_v56  ;;  %4961 = vmatprep.subr.msk.bf16.mxu1 %vm2886_vm0, %v2866_v45  ;;  %v2869_v33 = vpack.c.bf16 %v2821_v39, %v2821_v39  ;;  %v3020_v24 = vsel %vm2886_vm0, %v2867_v11, 0  ;;  %v7591_v57 = vadd.f32 %v8729_v53, %v7581_v17  ;;  %v7597_v29 = vadd.f32 %v8731_v6, %v8730_v18  ;;  %v8735_v56 = vld [vmem:[#allocation17_spill] sm:$0xff]  ;;  %v8736_v37 = vld [vmem:[#allocation20_spill] sm:$0xff]  ;;  %v8742_v58 = vld [vmem:[#allocation22_spill] sm:$0xff] }
 0x32c   : > { %v7601_v61 = vadd.f32 %v8732_v35, %v7586_v47  ;;  %v7608_v19 = vadd.f32 %v8733_v8, %v8730_v18  ;;  %v7613_v40 = vadd.f32 %v8734_v62, %v7581_v17  ;;  %v7624_v54 = vadd.f32 %v8735_v56, %v8730_v18  ;;  %v8743_v13 = vld [vmem:[#allocation26_spill] sm:$0xff] }
 0x32d   : > { %4956 = vmatmul.mubr.msk.bf16.vlgmr.msra.gmra.mxu0 %vm2882_vm1, %v7282_v48  ;;  %4958 = vmatmul.mubr.msk.bf16.vlgmr.msra.gmra.mxu1 %vm2882_vm1, %v7282_v48  ;;  %v3026_v3 = vsel %vm2886_vm0, %v2869_v33, 0  ;;  %v972_v16 = vmul.f32 %v7591_v57, %v7591_v57  ;;  %v980_v60 = vmul.f32 %v7597_v29, %v7597_v29  ;;  %v7631_v45 = vadd.f32 %v8736_v37, %v7581_v17 }
 0x32e   : > { %3866 = vmatpush1.bf16.msra.mxu0 %v3008_v25  ;;  %3883 = vmatprep.mubr.bf16.mxu0 %v8711_v43  ;;  %v973_v10 = vmul.f32 %v7601_v61, %v7601_v61  ;;  %v974_v4 = vmul.f32 %v7608_v19, %v7608_v19  ;;  %v975_v32 = vmul.f32 %v7613_v40, %v7613_v40 }
 0x32f   : > { %4963 = vmatprep.subr.msk.bf16.mxu0 %vm2886_vm0, %v2868_v51  ;;  %3907 = vmatpush1.bf16.msra.mxu1 %v3014_v9  ;;  %v1020_v12 = vmul.f32 %v972_v16, %v7591_v57  ;;  %v1028_v52 = vmul.f32 %v980_v60, %v7597_v29  ;;  %v7636_v15 = vadd.f32 %v8737_v59, %v7586_v47 }
 0x330   : > { %3924 = vmatprep.mubr.bf16.mxu1 %v8711_v43  ;;  %4965 = vmatprep.subr.msk.bf16.mxu1 %vm2886_vm0, %v2870_v44  ;;  %v1021_v22 = vmul.f32 %v973_v10, %v7601_v61  ;;  %v1022_v51 = vmul.f32 %v974_v4, %v7608_v19  ;;  %v983_v25 = vmul.f32 %v7624_v54, %v7624_v54  ;;  %v8738_v44 = vld [vmem:[#allocation19_spill] sm:$0xff] }
 0x331   : > { %v1068_v14 = vmul.f32 0.044715, %v1020_v12  ;;  %v1023_v39 = vmul.f32 %v975_v32, %v7613_v40  ;;  %v7644_v9 = vadd.f32 %v8738_v44, %v8730_v18  ;;  %v1076_v11 = vmul.f32 0.044715, %v1028_v52  ;;  %v8744_v12 = vld [vmem:[#allocation24_spill] sm:$0xff]  ;;  %v8746_v52 = vld [vmem:[#allocation29_spill] sm:$0xff] }
 0x332   : > { %v978_v33 = vmul.f32 %v7631_v45, %v7631_v45  ;;  %v7671_v36 = vadd.f32 %v8742_v58, %v8730_v18  ;;  %v7689_v4 = vadd.f32 %v8744_v12, %v8730_v18  ;;  %v7694_v37 = vadd.f32 %v8746_v52, %v7586_v47  ;;  %v8748_v44 = vld [vmem:[#allocation32_spill] sm:$0xff] }
 0x334   : > { %8745 = vst [vmem:[#allocation66_spill] sm:$0xff] %v7689_v4 }
 0x335   : > { %4960 = vmatmul.mubr.msk.bf16.vlgmr.msra.gmra.mxu0 %vm2882_vm1, %v7282_v48  ;;  %4962 = vmatmul.mubr.msk.bf16.vlgmr.msra.gmra.mxu1 %vm2882_vm1, %v7282_v48 }
 0x336   : > { %3948 = vmatpush1.bf16.msra.mxu0 %v3020_v24  ;;  %3965 = vmatprep.mubr.bf16.mxu0 %v8711_v43 }
 0x337   : > { %5036 = vmatprep.subr.bf16.mxu0 %v5368_v21  ;;  %3989 = vmatpush1.bf16.msra.mxu1 %v3026_v3  ;;  %v8739_v21 = vld [vmem:[#allocation21_spill] sm:$0xff]  ;;  %v976_v3 = vmul.f32 %v7636_v15, %v7636_v15 }
 0x338   : > { %4006 = vmatprep.mubr.bf16.mxu1 %v8711_v43  ;;  %5180 = vmatprep.subr.bf16.mxu1 %v5376_v27  ;;  %v5382_v43 = vld [vmem:[%s6036_s18 + $0xa8] sm:$0xff]   ;;  %v7650_v24 = vadd.f32 %v8739_v21, %v8730_v18 }
 0x33a   : > { %8740 = vst [vmem:[#allocation85_spill] sm:$0xff] %v7650_v24 }
 0x33d   : > { %4964 = vmatmul.mubr.msk.bf16.vlgmr.msra.gmra.mxu0 %vm2882_vm1, %v7282_v48  ;;  %4966 = vmatmul.mubr.msk.bf16.vlgmr.msra.gmra.mxu1 %vm2882_vm1, %v7282_v48  ;;  %v5375_v48 = vld [vmem:[%s6036_s18 + $0x20] sm:$0xff]  }
 0x33e   : > { %5037 = vmatpush3.bf16.msra.mxu0 %v5369_v50  ;;  %5181 = vmatpush3.bf16.msra.mxu1 %v5376_v27  ;;  %v1069_v27 = vmul.f32 0.044715, %v1021_v22  ;;  %v1116_v50 = vadd.f32 %v1068_v14, %v7591_v57  ;;  %v8747_v14 = vld [vmem:[#allocation25_spill] sm:$0xff] }
 0x33f   : > { %5038 = vmatprep.subr.bf16.mxu0 %v5370_v2  ;;  %5182 = vmatprep.subr.bf16.mxu1 %v5379_v1  ;;  %v1070_v2 = vmul.f32 0.044715, %v1022_v51  ;;  %v7700_v51 = vadd.f32 %v8747_v14, %v8730_v18 }
 0x342   : > { %5039 = vmatpush3.bf16.msra.mxu0 %v5371_v28  ;;  %5183 = vmatpush3.bf16.msra.mxu1 %v5379_v1  ;;  %v1031_v1 = vmul.f32 %v983_v25, %v7624_v54  ;;  %v1071_v28 = vmul.f32 0.044715, %v1023_v39 }
 0x343   : > { %5040 = vmatprep.subr.bf16.mxu0 %v5372_v0  ;;  %5184 = vmatprep.subr.bf16.mxu1 %v5382_v43  ;;  %v977_v0 = vmul.f32 %v7644_v9, %v7644_v9 }
 0x346   : > { %5041 = vmatpush3.bf16.msra.mxu0 %v5373_v63  ;;  %5185 = vmatpush3.bf16.msra.mxu1 %v5382_v43  ;;  %v1124_v43 = vadd.f32 %v1076_v11, %v7597_v29  ;;  %v1026_v63 = vmul.f32 %v978_v33, %v7631_v45  ;;  %v7705_v11 = vadd.f32 %v8748_v44, %v7581_v17  ;;  %v8760_v44 = vld [vmem:[#allocation37_spill] sm:$0xff] }
 0x347   : > { %5042 = vmatprep.subr.bf16.mxu0 %v5374_v49  ;;  %5186 = vmatprep.subr.bf16.mxu1 %v5385_v23  ;;  %v992_v49 = vmul.f32 %v7650_v24, %v7650_v24 }
 0x348   : > { %v1172_v53 = vmul.f32 0.7978846, %v1124_v43 }
 0x34a   : > { %5043 = vmatpush3.bf16.msra.mxu0 %v5375_v48  ;;  %5187 = vmatpush3.bf16.msra.mxu1 %v5385_v23  ;;  %v1117_v23 = vadd.f32 %v1069_v27, %v7601_v61  ;;  %v1024_v48 = vmul.f32 %v976_v3, %v7636_v15  ;;  %v995_v27 = vmul.f32 %v7689_v4, %v7689_v4 }
 0x34b   : > { %5044 = vmatprep.subr.bf16.mxu0 %v5377_v26  ;;  %5188 = vmatprep.subr.bf16.mxu1 %v5388_v31  ;;  %v8741_v26 = vld [vmem:[#allocation23_spill] sm:$0xff] }
 0x34c   : > { %v1165_v6 = vmul.f32 0.7978846, %v1117_v23  ;;  %v1072_v35 = vmul.f32 0.044715, %v1024_v48 }
 0x34e   : > { %5045 = vmatpush3.bf16.msra.mxu0 %v5378_v38  ;;  %5189 = vmatpush3.bf16.msra.mxu1 %v5388_v31  ;;  %v7666_v31 = vadd.f32 %v8741_v26, %v7586_v47  ;;  %v1164_v38 = vmul.f32 0.7978846, %v1116_v50  ;;  %v1120_v22 = vadd.f32 %v1072_v35, %v7636_v15  ;;  %v984_v26 = vmul.f32 %v7705_v11, %v7705_v11 }
 0x34f   : > { %5046 = vmatprep.subr.bf16.mxu0 %v5380_v42  ;;  %5190 = vmatprep.subr.bf16.mxu1 %v5389_v20  ;;  %v1118_v42 = vadd.f32 %v1070_v2, %v7608_v19  ;;  %v982_v2 = vmul.f32 %v7694_v37, %v7694_v37 }
 0x350   : > { %5520 = vtanh.f32 %v1164_v38  ;;  %v8752_v38 = vld [vmem:[#allocation28_spill] sm:$0xff] }
 0x351   : > { %v1166_v16 = vmul.f32 0.7978846, %v1118_v42  ;;  %5522 = vtanh.f32 %v1172_v53  ;;  %v7730_v42 = vadd.f32 %v8752_v38, %v8730_v18 }
 0x352   : > { %5047 = vmatpush3.bf16.msra.mxu0 %v5381_v46  ;;  %5191 = vmatpush3.bf16.msra.mxu1 %v5389_v20  ;;  %v1079_v20 = vmul.f32 0.044715, %v1031_v1  ;;  %v1119_v46 = vadd.f32 %v1071_v28, %v7613_v40  ;;  %5524 = vtanh.f32 %v1165_v6  ;;  %v8749_v1 = vld [vmem:[#allocation27_spill] sm:$0xff] }
 0x353   : > { %5048 = vmatprep.subr.bf16.mxu0 %v5383_v41  ;;  %5192 = vmatprep.subr.bf16.mxu1 %v5390_v7  ;;  %v1025_v41 = vmul.f32 %v977_v0, %v7644_v9  ;;  %5526 = vtanh.f32 %v1166_v16  ;;  %v7716_v28 = vadd.f32 %v8749_v1, %v8730_v18  ;;  %v7718_v0 = vmul.f32 0.7978846, %v1120_v22  ;;  %8753 = vst [vmem:[#allocation70_spill] sm:$0xff] %v7730_v42  ;;  %v8755_v16 = vld [vmem:[#allocation30_spill] sm:$0xff] }
 0x354   : > { %v1127_v8 = vadd.f32 %v1079_v20, %v7624_v54  ;;  %v1167_v62 = vmul.f32 0.7978846, %v1119_v46  ;;  %v1043_v46 = vmul.f32 %v995_v27, %v7689_v4 }
 0x355   : > { %v1073_v60 = vmul.f32 0.044715, %v1025_v41  ;;  %8750 = vst [vmem:[#allocation73_spill] sm:$0xff] %v7716_v28  ;;  %v8754_v41 = vld [vmem:[#allocation34_spill] sm:$0xff] }
 0x356   : > { %5049 = vmatpush3.bf16.msra.mxu0 %v5384_v5  ;;  %5193 = vmatpush3.bf16.msra.mxu1 %v5390_v7  ;;  %v7677_v7 = vadd.f32 %v8743_v13, %v7581_v17  ;;  %v1074_v5 = vmul.f32 0.044715, %v1026_v63  ;;  %v1175_v25 = vmul.f32 0.7978846, %v1127_v8  ;;  %5528 = vtanh.f32 %v1167_v62 }
 0x357   : > { %5050 = vmatprep.subr.bf16.mxu0 %v5386_v30  ;;  %5194 = vmatprep.subr.bf16.mxu1 %v5391_v55  ;;  %v1040_v30 = vmul.f32 %v992_v49, %v7650_v24  ;;  %v1121_v33 = vadd.f32 %v1073_v60, %v7644_v9  ;;  %v989_v63 = vmul.f32 %v7700_v51, %v7700_v51  ;;  %v8751_v49 = vld [vmem:[#allocation33_spill] sm:$0xff]  ;;  %v1091_v52 = vmul.f32 0.044715, %v1043_v46 }
 0x358   : > { %v981_v10 = vmul.f32 %v7677_v7, %v7677_v7  ;;  %v1122_v56 = vadd.f32 %v1074_v5, %v7631_v45  ;;  %v7724_v23 = vadd.f32 %v8751_v49, %v7586_v47  ;;  %5530 = vtanh.f32 %v1175_v25  ;;  %v8762_v49 = vld [vmem:[#allocation40_spill] sm:$0xff] }
 0x359   : > { %v1088_v32 = vmul.f32 0.044715, %v1040_v30  ;;  %v7732_v20 = vmul.f32 0.7978846, %v1121_v33  ;;  %v7737_v13 = vadd.f32 %v8754_v41, %v7581_v17  ;;  %v1030_v5 = vmul.f32 %v982_v2, %v7694_v37  ;;  %v8764_v41 = vld [vmem:[#allocation42_spill] sm:$0xff] }
 0x35a   : > { %5051 = vmatpush3.bf16.msra.mxu0 %v5387_v34  ;;  %5195 = vmatpush3.bf16.msra.mxu1 %v5391_v55  ;;  %v979_v55 = vmul.f32 %v7666_v31, %v7666_v31  ;;  %v986_v34 = vmul.f32 %v7671_v36, %v7671_v36  ;;  %v1029_v21 = vmul.f32 %v981_v10, %v7677_v7  ;;  %v1170_v3 = vmul.f32 0.7978846, %v1122_v56  ;;  %v8757_v10 = vld [vmem:[#allocation35_spill] sm:$0xff] }
 0x35b   : > { %v1136_v50 = vadd.f32 %v1088_v32, %v7650_v24  ;;  %v1004_v30 = vmul.f32 %v7716_v28, %v7716_v28  ;;  %v1037_v35 = vmul.f32 %v989_v63, %v7700_v51  ;;  %v7748_v8 = vadd.f32 %v8755_v16, %v8730_v18 }
 0x35c   : > { %v1027_v59 = vmul.f32 %v979_v55, %v7666_v31  ;;  %v1034_v39 = vmul.f32 %v986_v34, %v7671_v36  ;;  %v1077_v58 = vmul.f32 0.044715, %v1029_v21  ;;  %5532 = vtanh.f32 %v1170_v3 }
 0x35d   : > { %v1184_v53 = vmul.f32 0.7978846, %v1136_v50  ;;  %v985_v55 = vmul.f32 %v7724_v23, %v7724_v23  ;;  %8756 = vst [vmem:[#allocation67_spill] sm:$0xff] %v7748_v8  ;;  %v1032_v62 = vmul.f32 %v984_v26, %v7705_v11  ;;  %v998_v60 = vmul.f32 %v7730_v42, %v7730_v42  ;;  %v7758_v56 = vpop.eup %5520 }
 0x35e   : > { %v1075_v43 = vmul.f32 0.044715, %v1027_v59  ;;  %v1082_v48 = vmul.f32 0.044715, %v1034_v39  ;;  %v7756_v12 = vadd.f32 %v8757_v10, %v7586_v47  ;;  %v1125_v32 = vadd.f32 %v1077_v58, %v7677_v7  ;;  %v8758_v59 = vld [vmem:[#allocation31_spill] sm:$0xff]  ;;  %v7772_v21 = vpop.eup %5522 }
 0x35f   : > { %v987_v22 = vmul.f32 %v7737_v13, %v7737_v13  ;;  %v7765_v14 = vadd.f32 %v8758_v59, %v8730_v18  ;;  %5534 = vtanh.f32 %v1184_v53  ;;  %v1078_v25 = vmul.f32 0.044715, %v1030_v5  ;;  %v7779_v18 = vpop.eup %5524 }
 0x360   : > { %v1123_v6 = vadd.f32 %v1075_v43, %v7666_v31  ;;  %v1130_v34 = vadd.f32 %v1082_v48, %v7671_v36  ;;  %v1052_v39 = vmul.f32 %v1004_v30, %v7716_v28  ;;  %v7770_v33 = vadd.f32 %v8760_v44, %v7581_v17  ;;  %v7788_v26 = vpop.eup %5526 }
 0x361   : > { %8759 = vst [vmem:[#allocation65_spill] sm:$0xff] %v7765_v14  ;;  %v7774_v3 = vmul.f32 0.044715, %v1037_v35  ;;  %v1033_v50 = vmul.f32 %v985_v55, %v7724_v23  ;;  %v1007_v2 = vmul.f32 %v7748_v8, %v7748_v8  ;;  %v1080_v1 = vmul.f32 0.044715, %v1032_v62  ;;  %v8766_v55 = vld [vmem:[#allocation45_spill] sm:$0xff] }
 0x362   : > { %8761 = vst [vmem:[#allocation81_spill] sm:$0xff] %v7770_v33  ;;  %v1171_v27 = vmul.f32 0.7978846, %v1123_v6  ;;  %v1046_v43 = vmul.f32 %v998_v60, %v7730_v42  ;;  %v988_v63 = vmul.f32 %v7756_v12, %v7756_v12  ;;  %v7786_v48 = vadd.f32 %v8762_v49, %v7586_v47 }
 0x363   : > { %v1178_v38 = vmul.f32 0.7978846, %v1130_v34  ;;  %v1035_v58 = vmul.f32 %v987_v22, %v7737_v13  ;;  %v1001_v46 = vmul.f32 %v7765_v14, %v7765_v14  ;;  %v7795_v53 = vadd.f32 %v8764_v41, %v7581_v17  ;;  %v7797_v5 = vpop.eup %5528 }
 0x364   : > { %8763 = vst [vmem:[#allocation72_spill] sm:$0xff] %v7786_v48  ;;  %v1173_v30 = vmul.f32 0.7978846, %v1125_v32  ;;  %v1100_v6 = vmul.f32 0.044715, %v1052_v39  ;;  %v990_v35 = vmul.f32 %v7770_v33, %v7770_v33  ;;  %v7803_v16 = vadd.f32 %v8766_v55, %v7586_v47 }
 0x365   : > { %8765 = vst [vmem:[#allocation36_spill] sm:$0xff] %v7795_v53  ;;  %v1139_v34 = vadd.f32 %v1091_v52, %v7689_v4  ;;  %v1126_v62 = vadd.f32 %v1078_v25, %v7694_v37  ;;  %v1081_v60 = vmul.f32 0.044715, %v1033_v50  ;;  %v1055_v10 = vmul.f32 %v1007_v2, %v7748_v8  ;;  %v7812_v44 = vpop.eup %5530 }
 0x366   : > { %8767 = vst [vmem:[#allocation77_spill] sm:$0xff] %v7803_v16  ;;  %v1128_v22 = vadd.f32 %v1080_v1, %v7705_v11  ;;  %v1094_v59 = vmul.f32 0.044715, %v1046_v43  ;;  %v1036_v32 = vmul.f32 %v988_v63, %v7756_v12  ;;  %v991_v39 = vmul.f32 %v7786_v48, %v7786_v48 }
 0x367   : > { %5536 = vtanh.f32 %v1171_v27  ;;  %v1083_v49 = vmul.f32 0.044715, %v1035_v58  ;;  %v1049_v41 = vmul.f32 %v1001_v46, %v7765_v14  ;;  %v993_v52 = vmul.f32 %v7795_v53, %v7795_v53 }
 0x368   : > { %5538 = vtanh.f32 %v1178_v38  ;;  %v1148_v25 = vadd.f32 %v1100_v6, %v7716_v28  ;;  %v1038_v50 = vmul.f32 %v990_v35, %v7770_v33  ;;  %v994_v2 = vmul.f32 %v7803_v16, %v7803_v16 }
 0x369   : > { %v7821_v1 = vpop.eup %5532  ;;  %v1187_v43 = vmul.f32 0.7978846, %v1139_v34  ;;  %v1129_v63 = vadd.f32 %v1081_v60, %v7724_v23  ;;  %v1103_v27 = vmul.f32 0.044715, %v1055_v10  ;;  %5540 = vtanh.f32 %v7718_v0 }
 0x36a   : > { %v1176_v58 = vmul.f32 0.7978846, %v1128_v22  ;;  %v1142_v46 = vadd.f32 %v1094_v59, %v7730_v42  ;;  %v1084_v55 = vmul.f32 0.044715, %v1036_v32  ;;  %v1039_v38 = vmul.f32 %v991_v39, %v7786_v48  ;;  %v8768_v59 = vld [vmem:[#allocation46_spill] sm:$0xff] }
 0x36b   : > { %v1131_v6 = vadd.f32 %v1083_v49, %v7737_v13  ;;  %v1097_v35 = vmul.f32 0.044715, %v1049_v41  ;;  %v1041_v28 = vmul.f32 %v993_v52, %v7795_v53  ;;  %5542 = vtanh.f32 %v7732_v20 }
 0x36c   : > { %v1174_v4 = vmul.f32 0.7978846, %v1126_v62  ;;  %v1196_v34 = vmul.f32 0.7978846, %v1148_v25  ;;  %v1086_v24 = vmul.f32 0.044715, %v1038_v50  ;;  %v1042_v60 = vmul.f32 %v994_v2, %v7803_v16  ;;  %v7831_v10 = vpop.eup %5534 }
 0x36d   : > { %5544 = vtanh.f32 %v1173_v30  ;;  %v1177_v0 = vmul.f32 0.7978846, %v1129_v63  ;;  %v1151_v22 = vadd.f32 %v1103_v27, %v7748_v8  ;;  %v7836_v32 = vadd.f32 %v8768_v59, %v7581_v17  ;;  %v8770_v25 = vld [vmem:[#allocation39_spill] sm:$0xff]  ;;  %v8772_v59 = vld [vmem:[#allocation48_spill] sm:$0xff] }
 0x36e   : > { %5546 = vtanh.f32 %v1187_v43  ;;  %v1190_v39 = vmul.f32 0.7978846, %v1142_v46  ;;  %v1132_v49 = vadd.f32 %v1084_v55, %v7756_v12  ;;  %v1087_v20 = vmul.f32 0.044715, %v1039_v38  ;;  %v8771_v27 = vld [vmem:[#allocation47_spill] sm:$0xff] }
 0x36f   : > { %8769 = vst [vmem:[#allocation71_spill] sm:$0xff] %v7836_v32  ;;  %5548 = vtanh.f32 %v1176_v58  ;;  %v1179_v62 = vmul.f32 0.7978846, %v1131_v6  ;;  %v1145_v41 = vadd.f32 %v1097_v35, %v7765_v14  ;;  %v1089_v52 = vmul.f32 0.044715, %v1041_v28 }
 0x370   : > { %5550 = vtanh.f32 %v1196_v34  ;;  %v1134_v30 = vadd.f32 %v1086_v24, %v7770_v33  ;;  %v1016_v50 = vmul.f32 %v8770_v25, %v8770_v25  ;;  %v1090_v2 = vmul.f32 0.044715, %v1042_v60 }
 0x371   : > { %5552 = vtanh.f32 %v1177_v0  ;;  %v1199_v63 = vmul.f32 0.7978846, %v1151_v22  ;;  %v996_v43 = vmul.f32 %v7836_v32, %v7836_v32  ;;  %v7847_v46 = vadd.f32 %v8771_v27, %v7586_v47 }
 0x372   : > { %5554 = vtanh.f32 %v1190_v39  ;;  %v1180_v58 = vmul.f32 0.7978846, %v1132_v49  ;;  %v1135_v28 = vadd.f32 %v1087_v20, %v7786_v48  ;;  %v1133_v24 = vadd.f32 %v7774_v3, %v7700_v51 }
 0x373   : > { %5556 = vtanh.f32 %v1179_v62  ;;  %v1193_v55 = vmul.f32 0.7978846, %v1145_v41  ;;  %v1137_v38 = vadd.f32 %v1089_v52, %v7795_v53  ;;  %v1182_v35 = vmul.f32 0.7978846, %v1134_v30  ;;  %v8773_v52 = vld [vmem:[#allocation41_spill] sm:$0xff] }
 0x374   : > { %v7853_v6 = vpop.eup %5536  ;;  %v1064_v34 = vmul.f32 %v1016_v50, %v8770_v25  ;;  %v1138_v60 = vadd.f32 %v1090_v2, %v7803_v16  ;;  %5558 = vtanh.f32 %v1174_v4  ;;  %v1044_v22 = vmul.f32 %v996_v43, %v7836_v32 }
 0x375   : > { %v7857_v0 = vpop.eup %5538  ;;  %5560 = vtanh.f32 %v1199_v63  ;;  %v997_v3 = vmul.f32 %v7847_v46, %v7847_v46  ;;  %v7864_v39 = vadd.f32 %v8772_v59, %v7581_v17  ;;  %v1183_v20 = vmul.f32 0.7978846, %v1135_v28 }
 0x376   : > { %v5541_v49 = vpop.eup %5540  ;;  %5562 = vtanh.f32 %v1180_v58  ;;  %v1260_v62 = vadd.f32 1.0, %v7758_v56  ;;  %v1263_v41 = vadd.f32 1.0, %v7797_v5  ;;  %v7868_v4 = vmul.f32 0.7978846, %v1133_v24 }
 0x377   : > { %5564 = vtanh.f32 %v1193_v55  ;;  %v1010_v30 = vmul.f32 %v8773_v52, %v8773_v52  ;;  %v1185_v50 = vmul.f32 0.7978846, %v1137_v38  ;;  %v7872_v63 = vmul.f32 0.044715, %v1064_v34 }
 0x378   : > { %v5543_v2 = vpop.eup %5542  ;;  %5566 = vtanh.f32 %v1182_v35  ;;  %v1186_v43 = vmul.f32 0.7978846, %v1138_v60  ;;  %v1261_v58 = vadd.f32 1.0, %v7779_v18  ;;  %v1092_v28 = vmul.f32 0.044715, %v1044_v22  ;;  %v8776_v18 = vld [vmem:[#allocation49_spill] sm:$0xff] }
 0x379   : > { %8774 = vst [vmem:[#allocation60_spill] sm:$0xff] %v7872_v63  ;;  %v1045_v56 = vmul.f32 %v997_v3, %v7847_v46  ;;  %v999_v5 = vmul.f32 %v7864_v39, %v7864_v39  ;;  %v1264_v24 = vadd.f32 1.0, %v5541_v49  ;;  %5568 = vtanh.f32 %v1183_v20  ;;  %v7888_v3 = vpop.permute.xlu1 %2879 }
 0x37a   : > { %v5545_v55 = vpop.eup %5544  ;;  %v1308_v59 = vmul.f32 0.5, %v1260_v62  ;;  %v1262_v38 = vadd.f32 1.0, %v7788_v26  ;;  %v1311_v35 = vmul.f32 0.5, %v1263_v41  ;;  %v7882_v60 = vmul.f32 %v1010_v30, %v8773_v52  ;;  %v8777_v62 = vld [vmem:[#allocation43_spill] sm:$0xff] }
 0x37b   : > { %v7879_v34 = vpop.eup %5546  ;;  %5570 = vtanh.f32 %v1185_v50  ;;  %v7886_v22 = vadd.f32 %v8776_v18, %v7586_v47  ;;  %v1265_v63 = vadd.f32 1.0, %v5543_v2  ;;  %v7894_v26 = vmul.f32 %v8777_v62, %v8777_v62 }
 0x37c   : > { %8775 = vst [vmem:[#allocation75_spill] sm:$0xff] %v7879_v34  ;;  %v7890_v20 = vpop.eup %5548  ;;  %5572 = vtanh.f32 %v1186_v43  ;;  %v1309_v30 = vmul.f32 0.5, %v1261_v58  ;;  %v1140_v18 = vadd.f32 %v1092_v28, %v7836_v32  ;;  %v7900_v14 = vmul.f32 0.044715, %v1045_v56  ;;  %v8781_v56 = vld [vmem:[#allocation50_spill] sm:$0xff] }
 0x37d   : > { %8778 = vst [vmem:[#allocation79_spill] sm:$0xff] %v7894_v26  ;;  %v7897_v50 = vpop.eup %5550  ;;  %v7903_v42 = vmul.f32 %v999_v5, %v7864_v39  ;;  %v1312_v16 = vmul.f32 0.5, %v1264_v24  ;;  %v1356_v26 = vmul.f32 %v1308_v59, %v7591_v57  ;;  %v1310_v43 = vmul.f32 0.5, %v1262_v38  ;;  %v8782_v59 = vld [vmem:[#allocation51_spill] sm:$0xff] }
 0x37e   : > { %8779 = vst [vmem:[#allocation80_spill] sm:$0xff] %v7897_v50  ;;  %v7905_v53 = vpop.eup %5552  ;;  %v1000_v28 = vmul.f32 %v7886_v22, %v7886_v22  ;;  %v7916_v5 = vadd.f32 %v8781_v56, %v7581_v17  ;;  %v1313_v32 = vmul.f32 0.5, %v1265_v63  ;;  %v1266_v63 = vadd.f32 1.0, %v7821_v1 }
 0x37f   : > { %v7910_v58 = vpop.eup %5554  ;;  %v1360_v56 = vmul.f32 %v1312_v16, %v7636_v15  ;;  %5574 = vtanh.f32 %v7868_v4 }
 0x380   : > { %8780 = vst [vmem:[#allocation78_spill] sm:$0xff] %v7910_v58  ;;  %v7919_v57 = vpop.eup %5556  ;;  %v1361_v15 = vmul.f32 %v1313_v32, %v7644_v9  ;;  %v1048_v1 = vmul.f32 %v1000_v28, %v7886_v22  ;;  %v7951_v28 = vmul.f32 0.7978846, %v1140_v18 }
 0x381   : > { %v5559_v58 = vpop.eup %5558 }
 0x382   : > { %v7930_v33 = vpop.eup %5560  ;;  %v1096_v18 = vmul.f32 0.044715, %v1048_v1  ;;  %5576 = vtanh.f32 %v7951_v28 }
 0x392   : > { %v3065_v27 = vpop.f32.mrf.mxu0 }
 0x393   : > { %v3066_v41 = vadd.f32 %v3065_v27, %v7888_v3  ;;  %v1359_v27 = vmul.f32 %v1311_v35, %v7613_v40  ;;  %v7923_v40 = vadd.f32 %v8782_v59, %v7586_v47  ;;  %v1357_v35 = vmul.f32 %v1309_v30, %v7601_v61  ;;  %v7934_v30 = vpop.eup %5562 }
 0x394   : > { %v3067_v25 = vpop.f32.mrf.mxu0  ;;  %v1358_v59 = vmul.f32 %v1310_v43, %v7608_v19  ;;  %v1267_v61 = vadd.f32 1.0, %v7853_v6  ;;  %v1002_v19 = vmul.f32 %v7916_v5, %v7916_v5  ;;  %v1270_v43 = vadd.f32 1.0, %v5559_v58 }
 0x395   : > { %v3106_v49 = vpop.f32.mrf.mxu1  ;;  %v3068_v24 = vadd.f32 %v3067_v25, %v7888_v3  ;;  %v4015_v38 = vmul.f32 %v3066_v41, %v1356_v26  ;;  %v1269_v41 = vadd.f32 1.0, %v5545_v55  ;;  %v1003_v6 = vmul.f32 %v7923_v40, %v7923_v40 }
 0x396   : > { %v3069_v8 = vpop.f32.mrf.mxu0  ;;  %v3107_v48 = vadd.f32 %v3106_v49, %v7888_v3  ;;  %v1314_v58 = vmul.f32 0.5, %v1266_v63  ;;  %v1050_v63 = vmul.f32 %v1002_v19, %v7916_v5 }
 0x397   : > { %v3108_v2 = vpop.f32.mrf.mxu1 }
 0x398   : > { %v3070_v62 = vpop.f32.mrf.mxu0  ;;  %v3109_v8 = vadd.f32 %v3108_v2, %v7888_v3  ;;  %v1362_v19 = vmul.f32 %v1314_v58, %v7631_v45 }
 0x399   : > { %v3110_v50 = vpop.f32.mrf.mxu1 }
 0x39a   : > { %v4018_v62 = vmul.f32 %v3109_v8, %v1359_v27  ;;  %v3147_v2 = vpop.f32.mrf.mxu0  ;;  %v4016_v27 = vmul.f32 %v3068_v24, %v1357_v35  ;;  %v4017_v24 = vmul.f32 %v3107_v48, %v1358_v59 }
 0x39b   : > { %v3148_v25 = vadd.f32 %v3147_v2, %v7888_v3  ;;  %v3111_v50 = vpop.f32.mrf.mxu1  ;;  %v7938_v2 = vpop.eup %5564 }
 0x39c   : > { %v4063_v34 = vpack.c.bf16 %v4018_v62, %v4015_v38  ;;  %v3149_v26 = vpop.f32.mrf.mxu0  ;;  %v7945_v38 = vpop.eup %5566  ;;  %v1268_v62 = vadd.f32 1.0, %v7772_v21  ;;  %v1271_v50 = vadd.f32 1.0, %v7812_v44  ;;  %v1141_v21 = vadd.f32 %v7900_v14, %v7847_v46 }
 0x39d   : > { %v4019_v49 = vmul.f32 %v3148_v25, %v1360_v56  ;;  %v3150_v16 = vadd.f32 %v3149_v26, %v7888_v3  ;;  %v3188_v8 = vpop.f32.mrf.mxu1  ;;  %v7949_v56 = vmul.f32 0.044715, %v7882_v60  ;;  %v7955_v26 = vpop.eup %5568  ;;  %v1095_v60 = vmul.f32 0.044715, %v7903_v42  ;;  %v8784_v42 = vld [vmem:[#allocation53_spill] sm:$0xff] }
 0x39e   : > { %v3151_v55 = vpop.f32.mrf.mxu0  ;;  %v1318_v44 = vmul.f32 0.5, %v1270_v43  ;;  %v7973_v1 = vadd.f32 %v8784_v42, %v7586_v47 }
 0x39f   : > { %v4020_v35 = vmul.f32 %v3150_v16, %v1361_v15  ;;  %v3190_v9 = vpop.f32.mrf.mxu1  ;;  %v4064_v32 = vpack.c.bf16 %v4019_v49, %v4016_v27  ;;  %v1315_v55 = vmul.f32 0.5, %v1267_v61  ;;  %v1317_v27 = vmul.f32 0.5, %v1269_v41  ;;  %v7957_v49 = vpop.eup %5570 }
 0x3a0   : > { %v3152_v25 = vpop.f32.mrf.mxu0  ;;  %v7962_v4 = vpop.eup %5572  ;;  %v1051_v61 = vmul.f32 %v1003_v6, %v7923_v40  ;;  %v3189_v16 = vadd.f32 %v3188_v8, %v7888_v3  ;;  %v1316_v41 = vmul.f32 0.5, %v1268_v62 }
 0x3a1   : > { %4321 = vmatprep.mubr.bf16.mxu0 %v4064_v32  ;;  %v3192_v48 = vpop.f32.mrf.mxu1  ;;  %v4065_v59 = vpack.c.bf16 %v4020_v35, %v4017_v24  ;;  %v8783_v35 = vld [vmem:[#allocation52_spill] sm:$0xff]  ;;  %v1319_v32 = vmul.f32 0.5, %v1271_v50  ;;  %v1363_v6 = vmul.f32 %v1315_v55, %v7666_v31  ;;  %v1365_v8 = vmul.f32 %v1317_v27, %v7677_v7 }
 0x3a2   : > { %v3229_v15 = vpop.f32.mrf.mxu0  ;;  %4322 = vmatmul.mubr.bf16.vlgmr.msra.gmra.mxu0 %v4063_v34  ;;  %v7969_v14 = vadd.f32 %v8783_v35, %v7581_v17  ;;  %v3191_v34 = vadd.f32 %v3190_v9, %v7888_v3  ;;  %v1272_v9 = vadd.f32 1.0, %v7890_v20  ;;  %v4021_v42 = vmul.f32 %v3189_v16, %v1362_v19 }
 0x3a3   : > { %5196 = vmatprep.mubr.bf16.mxu1 %v4065_v59  ;;  %v3193_v24 = vpop.f32.mrf.mxu1  ;;  %v3230_v48 = vadd.f32 %v3229_v15, %v7888_v3  ;;  %v1364_v50 = vmul.f32 %v1316_v41, %v7597_v29  ;;  %v1275_v31 = vadd.f32 1.0, %v7919_v57  ;;  %v1006_v20 = vmul.f32 %v7973_v1, %v7973_v1 }
 0x3a4   : > { %v3231_v43 = vpop.f32.mrf.mxu0  ;;  %v1366_v24 = vmul.f32 %v1318_v44, %v7694_v37  ;;  %v4022_v7 = vmul.f32 %v3191_v34, %v1363_v6  ;;  %v1143_v37 = vadd.f32 %v1095_v60, %v7864_v39  ;;  %v1005_v44 = vmul.f32 %v7969_v14, %v7969_v14 }
 0x3a5   : > { %v3232_v62 = vadd.f32 %v3231_v43, %v7888_v3  ;;  %v3270_v25 = vpop.f32.mrf.mxu1  ;;  %v1367_v43 = vmul.f32 %v1319_v32, %v7624_v54  ;;  %v1189_v41 = vmul.f32 0.7978846, %v1141_v21  ;;  %v4023_v19 = vmul.f32 %v3230_v48, %v1364_v50  ;;  %v5575_v48 = vpop.eup %5574 }
 0x3a6   : > { %v3233_v59 = vpop.f32.mrf.mxu0  ;;  %v3271_v35 = vadd.f32 %v3270_v25, %v7888_v3  ;;  %v1144_v32 = vadd.f32 %v1096_v18, %v7886_v22  ;;  %v1099_v60 = vmul.f32 0.044715, %v1051_v61  ;;  %v1323_v21 = vmul.f32 0.5, %v1275_v31 }
 0x3a7   : > { %v4024_v45 = vmul.f32 %v3232_v62, %v1365_v8  ;;  %v3272_v58 = vpop.f32.mrf.mxu1  ;;  %v8785_v8 = vld [vmem:[#allocation44_spill] sm:$0xff]  ;;  %v1098_v62 = vmul.f32 0.044715, %v1050_v63  ;;  %v7998_v59 = vadd.f32 %v7949_v56, %v8773_v52  ;;  %v1191_v50 = vmul.f32 0.7978846, %v1143_v37 }
 0x3a8   : > { %v4025_v55 = vmul.f32 %v3271_v35, %v1366_v24  ;;  %v3234_v27 = vpop.f32.mrf.mxu0  ;;  %v3273_v15 = vadd.f32 %v3272_v58, %v7888_v3  ;;  %v1013_v54 = vmul.f32 %v8785_v8, %v8785_v8  ;;  %v1320_v35 = vmul.f32 0.5, %v1272_v9 }
 0x3a9   : > { %v3274_v29 = vpop.f32.mrf.mxu1  ;;  %v4066_v16 = vpack.c.bf16 %v4024_v45, %v4021_v42  ;;  %v1053_v45 = vmul.f32 %v1005_v44, %v7969_v14  ;;  %v1054_v18 = vmul.f32 %v1006_v20, %v7973_v1  ;;  %5578 = vtanh.f32 %v1189_v41 }
 0x3aa   : > { %v4026_v57 = vmul.f32 %v3273_v15, %v1367_v43  ;;  %v3311_v34 = vpop.f32.mrf.mxu0  ;;  %v4067_v6 = vpack.c.bf16 %v4025_v55, %v4022_v7  ;;  %v1273_v56 = vadd.f32 1.0, %v7905_v53  ;;  %v1276_v9 = vadd.f32 1.0, %v7934_v30  ;;  %v8786_v30 = vld [vmem:[#allocation54_spill] sm:$0xff] }
 0x3ab   : > { %v3275_v25 = vpop.f32.mrf.mxu1  ;;  %v3312_v61 = vadd.f32 %v3311_v34, %v7888_v3  ;;  %v1192_v31 = vmul.f32 0.7978846, %v1144_v32  ;;  %v1146_v7 = vadd.f32 %v1098_v62, %v7916_v5  ;;  %v1147_v28 = vadd.f32 %v1099_v60, %v7923_v40 }
 0x3ac   : > { %v4068_v24 = vpack.c.bf16 %v4026_v57, %v4023_v19  ;;  %v3313_v42 = vpop.f32.mrf.mxu0  ;;  %4329 = vmatprep.mubr.bf16.mxu0 %v4067_v6  ;;  %v1274_v55 = vadd.f32 1.0, %v7857_v0  ;;  %v1368_v43 = vmul.f32 %v1320_v35, %v7705_v11  ;;  %v1371_v37 = vmul.f32 %v1323_v21, %v7737_v13 }
 0x3ad   : > { %v3352_v63 = vpop.f32.mrf.mxu1  ;;  %4330 = vmatmul.mubr.bf16.gmra.mxu0 %v4066_v16  ;;  %v1277_v53 = vadd.f32 1.0, %v5575_v48  ;;  %5580 = vtanh.f32 %v1191_v50  ;;  %v1101_v20 = vmul.f32 0.044715, %v1053_v45  ;;  %v1102_v29 = vmul.f32 0.044715, %v1054_v18  ;;  %v8787_v50 = vld [vmem:[#allocation55_spill] sm:$0xff] }
 0x3ae   : > { %v3315_v58 = vpop.f32.mrf.mxu0  ;;  %5197 = vmatmul.mubr.bf16.vlgmr.msra.gmra.mxu1 %v4068_v24  ;;  %v8014_v16 = vadd.f32 %v8786_v30, %v7581_v17  ;;  %v4027_v19 = vmul.f32 %v3312_v61, %v1368_v43  ;;  %v1321_v57 = vmul.f32 0.5, %v1273_v56  ;;  %v1324_v34 = vmul.f32 0.5, %v1276_v9 }
 0x3af   : > { %v3354_v27 = vpop.f32.mrf.mxu1  ;;  %v1061_v11 = vmul.f32 %v1013_v54, %v8785_v8  ;;  %5582 = vtanh.f32 %v1192_v31  ;;  %v1194_v6 = vmul.f32 0.7978846, %v1146_v7  ;;  %v1322_v13 = vmul.f32 0.5, %v1274_v55 }
 0x3b0   : > { %v3316_v15 = vpop.f32.mrf.mxu0  ;;  %v3355_v44 = vadd.f32 %v3354_v27, %v7888_v3  ;;  %v1195_v62 = vmul.f32 0.7978846, %v1147_v28  ;;  %v3314_v60 = vadd.f32 %v3313_v42, %v7888_v3  ;;  %v1325_v25 = vmul.f32 0.5, %v1277_v53 }
 0x3b1   : > { %v3356_v41 = vpop.f32.mrf.mxu1  ;;  %v1149_v35 = vadd.f32 %v1101_v20, %v7969_v14  ;;  %v1150_v21 = vadd.f32 %v1102_v29, %v7973_v1  ;;  %v1008_v48 = vmul.f32 %v8014_v16, %v8014_v16  ;;  %v8024_v45 = vadd.f32 %v8787_v50, %v7586_v47  ;;  %v8788_v29 = vld [vmem:[#allocation75_spill] sm:$0xff] }
 0x3b2   : > { %v4030_v0 = vmul.f32 %v3355_v44, %v1371_v37  ;;  %v3393_v54 = vpop.f32.mrf.mxu0  ;;  %v1369_v18 = vmul.f32 %v1321_v57, %v7724_v23  ;;  %v3353_v61 = vadd.f32 %v3352_v63, %v7888_v3  ;;  %v1372_v42 = vmul.f32 %v1324_v34, %v7756_v12  ;;  %v8789_v57 = vld [vmem:[#allocation58_spill] sm:$0xff] }
 0x3b3   : > { %v3357_v32 = vpop.f32.mrf.mxu1  ;;  %v3394_v56 = vadd.f32 %v3393_v54, %v7888_v3  ;;  %v1370_v58 = vmul.f32 %v1322_v13, %v7671_v36  ;;  %v1278_v31 = vadd.f32 1.0, %v7945_v38  ;;  %v1279_v7 = vadd.f32 1.0, %v7955_v26  ;;  %v5577_v38 = vpop.eup %5576 }
 0x3b4   : > { %v4069_v24 = vpack.c.bf16 %v4030_v0, %v4027_v19  ;;  %v3395_v9 = vpop.f32.mrf.mxu0  ;;  %v1281_v28 = vadd.f32 1.0, %v7957_v49  ;;  %v4028_v55 = vmul.f32 %v3314_v60, %v1369_v18  ;;  %v1373_v43 = vmul.f32 %v1325_v25, %v7700_v51 }
 0x3b5   : > { %v4031_v27 = vmul.f32 %v3394_v56, %v1372_v42  ;;  %v3396_v23 = vadd.f32 %v3395_v9, %v7888_v3  ;;  %v3434_v63 = vpop.f32.mrf.mxu1  ;;  %v1197_v15 = vmul.f32 0.7978846, %v1149_v35  ;;  %v1056_v12 = vmul.f32 %v1008_v48, %v8014_v16 }
 0x3b6   : > { %v3397_v37 = vpop.f32.mrf.mxu0  ;;  %v1280_v36 = vadd.f32 1.0, %v7831_v10  ;;  %v1282_v44 = vadd.f32 1.0, %v7962_v4  ;;  %v4029_v53 = vmul.f32 %v3353_v61, %v1370_v58  ;;  %v1283_v30 = vadd.f32 1.0, %v8788_v29  ;;  %v5579_v41 = vpop.eup %5578 }
 0x3b7   : > { %v4032_v26 = vmul.f32 %v3396_v23, %v1373_v43  ;;  %v3436_v20 = vpop.f32.mrf.mxu1  ;;  %v4070_v49 = vpack.c.bf16 %v4031_v27, %v4028_v55  ;;  %5584 = vtanh.f32 %v1194_v6  ;;  %v1198_v51 = vmul.f32 0.7978846, %v1150_v21  ;;  %v8793_v23 = vld [vmem:[#allocation85_spill] sm:$0xff] }
 0x3b8   : > { %v1009_v19 = vmul.f32 %v8024_v45, %v8024_v45  ;;  %v8044_v0 = vadd.f32 %v8789_v57, %v7581_v17  ;;  %v3398_v10 = vpop.f32.mrf.mxu0  ;;  %v1326_v34 = vmul.f32 0.5, %v1278_v31  ;;  %v1327_v4 = vmul.f32 0.5, %v1279_v7  ;;  %v8791_v31 = vld [vmem:[#allocation72_spill] sm:$0xff]  ;;  %v8794_v37 = vld [vmem:[#allocation77_spill] sm:$0xff] }
 0x3b9   : > { %4337 = vmatprep.mubr.bf16.mxu0 %v4070_v49  ;;  %v3438_v13 = vpop.f32.mrf.mxu1  ;;  %v4071_v32 = vpack.c.bf16 %v4032_v26, %v4029_v53  ;;  %v1329_v60 = vmul.f32 0.5, %v1281_v28  ;;  %v1109_v25 = vmul.f32 0.044715, %v1061_v11  ;;  %5586 = vtanh.f32 %v1195_v62  ;;  %v8792_v28 = vld [vmem:[#allocation36_spill] sm:$0xff] }
 0x3ba   : > { %v1328_v35 = vmul.f32 0.5, %v1280_v36  ;;  %v3475_v48 = vpop.f32.mrf.mxu0  ;;  %4338 = vmatmul.mubr.bf16.gmra.mxu0 %v4069_v24  ;;  %v1330_v6 = vmul.f32 0.5, %v1282_v44  ;;  %v5581_v21 = vpop.eup %5580  ;;  %5588 = vtanh.f32 %v1197_v15  ;;  %v1104_v50 = vmul.f32 0.044715, %v1056_v12  ;;  %v8790_v24 = vld [vmem:[#allocation81_spill] sm:$0xff] }
 0x3bb   : > { %v3435_v54 = vadd.f32 %v3434_v63, %v7888_v3  ;;  %5200 = vmatprep.mubr.bf16.mxu1 %v4071_v32  ;;  %v3439_v18 = vpop.f32.mrf.mxu1  ;;  %v1331_v61 = vmul.f32 0.5, %v1283_v30  ;;  %5590 = vtanh.f32 %v1198_v51  ;;  %v1057_v42 = vmul.f32 %v1009_v19, %v8024_v45  ;;  %v8796_v32 = vld [vmem:[#allocation61_spill] sm:$0xff] }
 0x3bc   : > { %v1011_v56 = vmul.f32 %v8044_v0, %v8044_v0  ;;  %v3437_v11 = vadd.f32 %v3436_v20, %v7888_v3  ;;  %v3477_v62 = vpop.f32.mrf.mxu0  ;;  %v5583_v58 = vpop.eup %5582  ;;  %v1374_v9 = vmul.f32 %v1326_v34, %v8790_v24  ;;  %v1375_v7 = vmul.f32 %v1327_v4, %v8791_v31  ;;  %v8795_v20 = vld [vmem:[#allocation66_spill] sm:$0xff] }
 0x3bd   : > { %v1377_v55 = vmul.f32 %v1329_v60, %v8792_v28  ;;  %v3478_v27 = vadd.f32 %v3477_v62, %v7888_v3  ;;  %v3516_v43 = vpop.f32.mrf.mxu1  ;;  %v1376_v63 = vmul.f32 %v1328_v35, %v8793_v23  ;;  %v3476_v15 = vadd.f32 %v3475_v48, %v7888_v3 }
 0x3be   : > { %v3479_v12 = vpop.f32.mrf.mxu0  ;;  %v1378_v36 = vmul.f32 %v1330_v6, %v8794_v37  ;;  %v3517_v44 = vadd.f32 %v3516_v43, %v7888_v3  ;;  %v4033_v53 = vmul.f32 %v3435_v54, %v1374_v9  ;;  %v1379_v49 = vmul.f32 %v1331_v61, %v8795_v20  ;;  %v8798_v43 = vld [vmem:[#allocation43_spill] sm:$0xff] }
 0x3bf   : > { %v4036_v26 = vmul.f32 %v3478_v27, %v1377_v55  ;;  %v3518_v29 = vpop.f32.mrf.mxu1  ;;  %v1284_v30 = vadd.f32 1.0, %v5577_v38  ;;  %v4034_v51 = vmul.f32 %v3437_v11, %v1375_v7  ;;  %v1287_v34 = vadd.f32 1.0, %v5581_v21  ;;  %v8797_v21 = vld [vmem:[#allocation78_spill] sm:$0xff] }
 0x3c0   : > { %v4037_v19 = vmul.f32 %v3517_v44, %v1378_v36  ;;  %v3480_v57 = vpop.f32.mrf.mxu0  ;;  %v3519_v10 = vadd.f32 %v3518_v29, %v7888_v3  ;;  %v1157_v4 = vadd.f32 %v1109_v25, %v8785_v8  ;;  %v1059_v13 = vmul.f32 %v1011_v56, %v8044_v0 }
 0x3c1   : > { %v8065_v60 = vadd.f32 %v8796_v32, %v7586_v47  ;;  %v3520_v35 = vpop.f32.mrf.mxu1  ;;  %v4072_v48 = vpack.c.bf16 %v4036_v26, %v4033_v53  ;;  %v1152_v6 = vadd.f32 %v1104_v50, %v8014_v16  ;;  %v4035_v54 = vmul.f32 %v3476_v15, %v1376_v63  ;;  %v8799_v50 = vld [vmem:[#allocation79_spill] sm:$0xff] }
 0x3c2   : > { %v4038_v38 = vmul.f32 %v3519_v10, %v1379_v49  ;;  %v3557_v18 = vpop.f32.mrf.mxu0  ;;  %v4073_v61 = vpack.c.bf16 %v4037_v19, %v4034_v51  ;;  %v1105_v11 = vmul.f32 0.044715, %v1057_v42  ;;  %v1285_v24 = vadd.f32 1.0, %v5579_v41  ;;  %v8800_v41 = vld [vmem:[#allocation62_spill] sm:$0xff]  ;;  %v8801_v19 = vld [vmem:[#allocation71_spill] sm:$0xff] }
 0x3c3   : > { %v3521_v62 = vpop.f32.mrf.mxu1  ;;  %v1286_v9 = vadd.f32 1.0, %v8797_v21  ;;  %v1288_v25 = vadd.f32 1.0, %v5583_v58  ;;  %v1332_v31 = vmul.f32 0.5, %v1284_v30  ;;  %v1335_v28 = vmul.f32 0.5, %v1287_v34 }
 0x3c4   : > { %v3559_v56 = vpop.f32.mrf.mxu0  ;;  %4345 = vmatprep.mubr.bf16.mxu0 %v4073_v61  ;;  %v4074_v7 = vpack.c.bf16 %v4038_v38, %v4035_v54  ;;  %v1289_v55 = vadd.f32 1.0, %v7938_v2  ;;  %v5585_v27 = vpop.eup %5584  ;;  %v8072_v23 = vmul.f32 %v8799_v50, %v8798_v43  ;;  %v1107_v63 = vmul.f32 0.044715, %v1059_v13  ;;  %v8802_v38 = vld [vmem:[#allocation63_spill] sm:$0xff] }
 0x3c5   : > { %v1012_v42 = vmul.f32 %v8065_v60, %v8065_v60  ;;  %v8078_v15 = vadd.f32 %v8800_v41, %v7581_v17  ;;  %v3598_v58 = vpop.f32.mrf.mxu1  ;;  %4346 = vmatmul.mubr.bf16.gmra.mxu0 %v4072_v48  ;;  %v8081_v12 = vmul.f32 0.7978846, %v7998_v59  ;;  %v8083_v37 = vmul.f32 0.7978846, %v1157_v4 }
 0x3c6   : > { %v1200_v2 = vmul.f32 0.7978846, %v1152_v6  ;;  %v3558_v36 = vadd.f32 %v3557_v18, %v7888_v3  ;;  %v3561_v44 = vpop.f32.mrf.mxu0  ;;  %5201 = vmatmul.mubr.bf16.gmra.mxu1 %v4074_v7  ;;  %v5587_v53 = vpop.eup %5586  ;;  %v1153_v26 = vadd.f32 %v1105_v11, %v8024_v45  ;;  %v1333_v20 = vmul.f32 0.5, %v1285_v24  ;;  %v8804_v7 = vld [vmem:[#allocation70_spill] sm:$0xff] }
 0x3c7   : > { %v1334_v49 = vmul.f32 0.5, %v1286_v9  ;;  %v3600_v29 = vpop.f32.mrf.mxu1  ;;  %v1336_v30 = vmul.f32 0.5, %v1288_v25  ;;  %v5589_v51 = vpop.eup %5588  ;;  %v1380_v57 = vmul.f32 %v1332_v31, %v8801_v19  ;;  %v1383_v59 = vmul.f32 %v1335_v28, %v7864_v39  ;;  %v8803_v39 = vld [vmem:[#allocation68_spill] sm:$0xff] }
 0x3c8   : > { %v3562_v10 = vpop.f32.mrf.mxu0  ;;  %v3601_v34 = vadd.f32 %v3600_v29, %v7888_v3  ;;  %v1337_v4 = vmul.f32 0.5, %v1289_v55  ;;  %v5591_v13 = vpop.eup %5590  ;;  %v1155_v32 = vadd.f32 %v1107_v63, %v8044_v0  ;;  %v1060_v35 = vmul.f32 %v1012_v42, %v8065_v60  ;;  %v8805_v55 = vld [vmem:[#allocation65_spill] sm:$0xff] }
 0x3c9   : > { %v1014_v48 = vmul.f32 %v8078_v15, %v8078_v15  ;;  %v3560_v6 = vadd.f32 %v3559_v56, %v7888_v3  ;;  %v3602_v54 = vpop.f32.mrf.mxu1  ;;  %v8097_v18 = vadd.f32 %v8802_v38, %v7586_v47  ;;  %v8101_v61 = vadd.f32 %v8803_v39, %v7586_v47 }
 0x3ca   : > { %v4039_v11 = vmul.f32 %v3558_v36, %v1380_v57  ;;  %v4042_v62 = vmul.f32 %v3601_v34, %v1383_v59  ;;  %v3639_v24 = vpop.f32.mrf.mxu0  ;;  %v1381_v21 = vmul.f32 %v1333_v20, %v7847_v46  ;;  %v3599_v9 = vadd.f32 %v3598_v58, %v7888_v3  ;;  %v8806_v58 = vld [vmem:[#allocation64_spill] sm:$0xff] }
 0x3cb   : > { %v1384_v25 = vmul.f32 %v1336_v30, %v7886_v22  ;;  %v3640_v31 = vadd.f32 %v3639_v24, %v7888_v3  ;;  %v3603_v56 = vpop.f32.mrf.mxu1  ;;  %v1382_v28 = vmul.f32 %v1334_v49, %v8804_v7  ;;  %v1385_v50 = vmul.f32 %v1337_v4, %v8805_v55 }
 0x3cc   : > { %v3641_v63 = vpop.f32.mrf.mxu0  ;;  %v1290_v42 = vadd.f32 1.0, %v5585_v27  ;;  %v4075_v47 = vpack.c.bf16 %v4042_v62, %v4039_v11  ;;  %v4040_v41 = vmul.f32 %v3560_v6, %v1381_v21  ;;  %v1293_v46 = vadd.f32 1.0, %v5589_v51  ;;  %v8807_v27 = vld [vmem:[#allocation80_spill] sm:$0xff] }
 0x3cd   : > { %v4043_v36 = vmul.f32 %v3640_v31, %v1384_v25  ;;  %v3642_v44 = vadd.f32 %v3641_v63, %v7888_v3  ;;  %v3680_v29 = vpop.f32.mrf.mxu1  ;;  %v1108_v20 = vmul.f32 0.044715, %v1060_v35  ;;  %v8112_v22 = vadd.f32 %v8806_v58, %v7581_v17 }
 0x3ce   : > { %v3643_v30 = vpop.f32.mrf.mxu0  ;;  %v1291_v19 = vadd.f32 1.0, %v5587_v53  ;;  %v1294_v57 = vadd.f32 1.0, %v5591_v13  ;;  %v4041_v49 = vmul.f32 %v3599_v9, %v1382_v28  ;;  %v1292_v4 = vadd.f32 1.0, %v8807_v27 }
 0x3cf   : > { %v4044_v10 = vmul.f32 %v3642_v44, %v1385_v50  ;;  %v3682_v59 = vpop.f32.mrf.mxu1  ;;  %v4076_v34 = vpack.c.bf16 %v4043_v36, %v4040_v41  ;;  %5592 = vtanh.f32 %v1200_v2  ;;  %v1062_v6 = vmul.f32 %v1014_v48, %v8078_v15  ;;  %v8808_v30 = vld [vmem:[#allocation73_spill] sm:$0xff] }
 0x3d0   : > { %v1015_v51 = vmul.f32 %v8097_v18, %v8097_v18  ;;  %v3644_v35 = vpop.f32.mrf.mxu0  ;;  %v1295_v54 = vadd.f32 1.0, %v7930_v33  ;;  %v1018_v17 = vmul.f32 %v8101_v61, %v8101_v61  ;;  %v1338_v53 = vmul.f32 0.5, %v1290_v42 }
 0x3d1   : > { %4353 = vmatprep.mubr.bf16.mxu0 %v4076_v34  ;;  %v3684_v13 = vpop.f32.mrf.mxu1  ;;  %v4077_v38 = vpack.c.bf16 %v4044_v10, %v4041_v49  ;;  %v1341_v39 = vmul.f32 0.5, %v1293_v46  ;;  %v1201_v11 = vmul.f32 0.7978846, %v1153_v26  ;;  %v1203_v62 = vmul.f32 0.7978846, %v1155_v32  ;;  %v8809_v10 = vld [vmem:[#allocation67_spill] sm:$0xff] }
 0x3d2   : > { %v1339_v24 = vmul.f32 0.5, %v1291_v19  ;;  %v3721_v2 = vpop.f32.mrf.mxu0  ;;  %4354 = vmatmul.mubr.bf16.gmra.mxu0 %v4075_v47  ;;  %v1342_v48 = vmul.f32 0.5, %v1294_v57  ;;  %v1156_v21 = vadd.f32 %v1108_v20, %v8065_v60  ;;  %v1017_v9 = vmul.f32 %v8112_v22, %v8112_v22  ;;  %v8811_v13 = vld [vmem:[#allocation60_spill] sm:$0xff] }
 0x3d3   : > { %v3681_v33 = vadd.f32 %v3680_v29, %v7888_v3  ;;  %v1340_v25 = vmul.f32 0.5, %v1292_v4  ;;  %5204 = vmatprep.mubr.bf16.mxu1 %v4077_v38  ;;  %v3685_v31 = vpop.f32.mrf.mxu1  ;;  %v1110_v56 = vmul.f32 0.044715, %v1062_v6  ;;  %v1063_v7 = vmul.f32 %v1015_v51, %v8097_v18 }
 0x3d4   : > { %v3683_v26 = vadd.f32 %v3682_v59, %v7888_v3  ;;  %v3723_v32 = vpop.f32.mrf.mxu0  ;;  %v1343_v28 = vmul.f32 0.5, %v1295_v54  ;;  %v1066_v55 = vmul.f32 %v1018_v17, %v8101_v61  ;;  %v1386_v50 = vmul.f32 %v1338_v53, %v7916_v5  ;;  %v8810_v53 = vld [vmem:[#allocation39_spill] sm:$0xff] }
 0x3d5   : > { %v1389_v63 = vmul.f32 %v1341_v39, %v7969_v14  ;;  %v3724_v42 = vadd.f32 %v3723_v32, %v7888_v3  ;;  %v3762_v47 = vpop.f32.mrf.mxu1  ;;  %v1387_v41 = vmul.f32 %v1339_v24, %v7923_v40  ;;  %v3722_v36 = vadd.f32 %v3721_v2, %v7888_v3 }
 0x3d6   : > { %v1390_v44 = vmul.f32 %v1342_v48, %v7973_v1  ;;  %v3763_v29 = vadd.f32 %v3762_v47, %v7888_v3  ;;  %v3725_v46 = vpop.f32.mrf.mxu0  ;;  %v1065_v20 = vmul.f32 %v1017_v9, %v8112_v22  ;;  %v4045_v58 = vmul.f32 %v3681_v33, %v1386_v50 }
 0x3d7   : > { %v1388_v19 = vmul.f32 %v1340_v25, %v8808_v30  ;;  %v4048_v5 = vmul.f32 %v3724_v42, %v1389_v63  ;;  %v3764_v57 = vpop.f32.mrf.mxu1  ;;  %v4046_v14 = vmul.f32 %v3683_v26, %v1387_v41  ;;  %v1391_v59 = vmul.f32 %v1343_v28, %v8809_v10 }
 0x3d8   : > { %v4049_v49 = vmul.f32 %v3763_v29, %v1390_v44  ;;  %v3765_v40 = vadd.f32 %v3764_v57, %v7888_v3  ;;  %v3726_v34 = vpop.f32.mrf.mxu0  ;;  %5594 = vtanh.f32 %v1203_v62  ;;  %v1204_v27 = vmul.f32 0.7978846, %v1156_v21 }
 0x3d9   : > { %v1111_v1 = vmul.f32 0.044715, %v1063_v7  ;;  %v4078_v4 = vpack.c.bf16 %v4048_v5, %v4045_v58  ;;  %v3766_v6 = vpop.f32.mrf.mxu1  ;;  %v1114_v51 = vmul.f32 0.044715, %v1066_v55  ;;  %v4047_v35 = vmul.f32 %v3722_v36, %v1388_v19 }
 0x3da   : > { %v4050_v54 = vmul.f32 %v3765_v40, %v1391_v59  ;;  %v4079_v17 = vpack.c.bf16 %v4049_v49, %v4046_v14  ;;  %v1160_v38 = vadd.f32 %v8811_v13, %v8810_v53  ;;  %5596 = vtanh.f32 %v8081_v12 }
 0x3db   : > { %v1113_v39 = vmul.f32 0.044715, %v1065_v20  ;;  %v3767_v24 = vpop.f32.mrf.mxu1  ;;  %v1115_v2 = vmul.f32 0.044715, %v8072_v23  ;;  %5598 = vtanh.f32 %v1201_v11  ;;  %v1158_v62 = vadd.f32 %v1110_v56, %v8078_v15 }
 0x3dc   : > { %v4080_v48 = vpack.c.bf16 %v4050_v54, %v4047_v35  ;;  %4361 = vmatprep.mubr.bf16.mxu0 %v4079_v17  ;;  %v5593_v21 = vpop.eup %5592  ;;  %5600 = vtanh.f32 %v1204_v27  ;;  %v1159_v9 = vadd.f32 %v1111_v1, %v8097_v18  ;;  %v1162_v33 = vadd.f32 %v1114_v51, %v8101_v61 }
 0x3dd   : > { %4362 = vmatmul.mubr.bf16.gmra.mxu0 %v4078_v4  ;;  %5602 = vtanh.f32 %v8083_v37  ;;  %v1208_v12 = vmul.f32 0.7978846, %v1160_v38  ;;  %v1161_v25 = vadd.f32 %v1113_v39, %v8112_v22  ;;  %v1163_v23 = vadd.f32 %v1115_v2, %v8798_v43 }
 0x3de   : > { %5205 = vmatmul.mubr.bf16.gmra.mxu1 %v4080_v48  ;;  %v1206_v11 = vmul.f32 0.7978846, %v1158_v62  ;;  %v1207_v31 = vmul.f32 0.7978846, %v1159_v9  ;;  %v1210_v56 = vmul.f32 0.7978846, %v1162_v33 }
 0x3df   : > { %5604 = vtanh.f32 %v1208_v12  ;;  %v1209_v7 = vmul.f32 0.7978846, %v1161_v25  ;;  %v1211_v26 = vmul.f32 0.7978846, %v1163_v23  ;;  %v1296_v55 = vadd.f32 1.0, %v5593_v21 }
 0x3e0   : > { %5606 = vtanh.f32 %v1206_v11 }
 0x3e1   : > { %5608 = vtanh.f32 %v1207_v31  ;;  %v1344_v44 = vmul.f32 0.5, %v1296_v55 }
 0x3e2   : > { %5610 = vtanh.f32 %v1210_v56 }
 0x3e3   : > { %5612 = vtanh.f32 %v1209_v7  ;;  %v1392_v40 = vmul.f32 %v1344_v44, %v8014_v16 }
 0x3e4   : > { %5614 = vtanh.f32 %v1211_v26 }
 0x3e5   : > { %v5595_v32 = vpop.eup %5594 }
 0x3e6   : > { %v1299_v50 = vadd.f32 1.0, %v5595_v32 }
 0x3e7   : > { %v5597_v37 = vpop.eup %5596 }
 0x3e8   : > { %v5599_v28 = vpop.eup %5598  ;;  %v1298_v41 = vadd.f32 1.0, %v5597_v37  ;;  %v1347_v29 = vmul.f32 0.5, %v1299_v50 }
 0x3e9   : > { %v5601_v63 = vpop.eup %5600  ;;  %v1297_v36 = vadd.f32 1.0, %v5599_v28 }
 0x3ea   : > { %v5603_v42 = vpop.eup %5602  ;;  %v1300_v46 = vadd.f32 1.0, %v5601_v63  ;;  %v1346_v57 = vmul.f32 0.5, %v1298_v41  ;;  %v1395_v34 = vmul.f32 %v1347_v29, %v8044_v0 }
 0x3eb   : > { %v1301_v30 = vadd.f32 1.0, %v5603_v42  ;;  %v1345_v14 = vmul.f32 0.5, %v1297_v36 }
 0x3ec   : > { %v5605_v5 = vpop.eup %5604  ;;  %v1348_v1 = vmul.f32 0.5, %v1300_v46  ;;  %v1394_v24 = vmul.f32 %v1346_v57, %v8773_v52 }
 0x3ed   : > { %v3803_v47 = vpop.f32.mrf.mxu0  ;;  %v3844_v20 = vpop.f32.mrf.mxu1  ;;  %v1349_v35 = vmul.f32 0.5, %v1301_v30  ;;  %v1393_v2 = vmul.f32 %v1345_v14, %v8024_v45  ;;  %v1304_v28 = vadd.f32 1.0, %v5605_v5 }
 0x3ee   : > { %v3804_v19 = vadd.f32 %v3803_v47, %v7888_v3  ;;  %v5607_v59 = vpop.eup %5606  ;;  %v3845_v48 = vadd.f32 %v3844_v20, %v7888_v3  ;;  %v1396_v9 = vmul.f32 %v1348_v1, %v8065_v60 }
 0x3ef   : > { %v3805_v58 = vpop.f32.mrf.mxu0  ;;  %v3846_v49 = vpop.f32.mrf.mxu1  ;;  %v1302_v12 = vadd.f32 1.0, %v5607_v59  ;;  %v1397_v23 = vmul.f32 %v1349_v35, %v8785_v8 }
 0x3f0   : > { %v3847_v27 = vadd.f32 %v3846_v49, %v7888_v3  ;;  %v5609_v4 = vpop.eup %5608  ;;  %v4051_v17 = vmul.f32 %v3804_v19, %v1392_v40  ;;  %v3806_v13 = vadd.f32 %v3805_v58, %v7888_v3  ;;  %v4053_v50 = vmul.f32 %v3845_v48, %v1394_v24 }
 0x3f1   : > { %v3807_v10 = vpop.f32.mrf.mxu0  ;;  %v3848_v6 = vpop.f32.mrf.mxu1  ;;  %v1303_v31 = vadd.f32 1.0, %v5609_v4  ;;  %v1350_v42 = vmul.f32 0.5, %v1302_v12  ;;  %v1352_v58 = vmul.f32 0.5, %v1304_v28 }
 0x3f2   : > { %v5611_v54 = vpop.eup %5610  ;;  %v4054_v38 = vmul.f32 %v3847_v27, %v1395_v34  ;;  %v4052_v52 = vmul.f32 %v3806_v13, %v1393_v2 }
 0x3f3   : > { %v3808_v51 = vpop.f32.mrf.mxu0  ;;  %v5613_v39 = vpop.eup %5612  ;;  %v1306_v56 = vadd.f32 1.0, %v5611_v54  ;;  %v1351_v47 = vmul.f32 0.5, %v1303_v31  ;;  %v1398_v57 = vmul.f32 %v1350_v42, %v8078_v15  ;;  %v1400_v6 = vmul.f32 %v1352_v58, %v8810_v53 }
 0x3f4   : > { %v3849_v16 = vpop.f32.mrf.mxu1  ;;  %v5615_v0 = vpop.eup %5614  ;;  %v4081_v21 = vpack.c.bf16 %v4054_v38, %v4051_v17  ;;  %v1305_v26 = vadd.f32 1.0, %v5613_v39 }
 0x3f5   : > { %v3885_v62 = vpop.f32.mrf.mxu0  ;;  %v1307_v55 = vadd.f32 1.0, %v5615_v0  ;;  %v1354_v8 = vmul.f32 0.5, %v1306_v56  ;;  %v1399_v14 = vmul.f32 %v1351_v47, %v8097_v18 }
 0x3f6   : > { %v3886_v33 = vadd.f32 %v3885_v62, %v7888_v3  ;;  %v3926_v25 = vpop.f32.mrf.mxu1  ;;  %v1353_v29 = vmul.f32 0.5, %v1305_v26 }
 0x3f7   : > { %v3887_v11 = vpop.f32.mrf.mxu0  ;;  %v3927_v46 = vadd.f32 %v3926_v25, %v7888_v3  ;;  %v1355_v19 = vmul.f32 0.5, %v1307_v55  ;;  %v1402_v49 = vmul.f32 %v1354_v8, %v8101_v61 }
 0x3f8   : > { %v4055_v7 = vmul.f32 %v3886_v33, %v1396_v9  ;;  %v3888_v45 = vadd.f32 %v3887_v11, %v7888_v3  ;;  %v3928_v32 = vpop.f32.mrf.mxu1  ;;  %v1401_v27 = vmul.f32 %v1353_v29, %v8112_v22 }
 0x3f9   : > { %v3889_v37 = vpop.f32.mrf.mxu0  ;;  %v3929_v5 = vadd.f32 %v3928_v32, %v7888_v3  ;;  %v4057_v4 = vmul.f32 %v3927_v46, %v1398_v57  ;;  %v1403_v51 = vmul.f32 %v1355_v19, %v8798_v43 }
 0x3fa   : > { %v4056_v60 = vmul.f32 %v3888_v45, %v1397_v23  ;;  %v4082_v63 = vpack.c.bf16 %v4055_v7, %v4052_v52  ;;  %v3930_v41 = vpop.f32.mrf.mxu1 }
 0x3fb   : > { %v3890_v36 = vpop.f32.mrf.mxu0  ;;  %v4058_v18 = vmul.f32 %v3929_v5, %v1399_v14 }
 0x3fc   : > { %4369 = vmatprep.mubr.bf16.mxu0 %v4082_v63  ;;  %v4083_v44 = vpack.c.bf16 %v4056_v60, %v4053_v50  ;;  %v3931_v20 = vpop.f32.mrf.mxu1 }
 0x3fd   : > { %v3967_v30 = vpop.f32.mrf.mxu0  ;;  %4370 = vmatmul.mubr.bf16.gmra.mxu0 %v4081_v21  ;;  %v8177_v21 = vld [vmem:[%s4137_s23] ss:$0 sm:$0xff]  ;;  %s8416_s23 = scalar_lea.hbm %s8812_s24, %s5003_s26 }
 0x3fe   : > { %5208 = vmatprep.mubr.bf16.mxu1 %v4083_v44  ;;  %v4008_v10 = vpop.f32.mrf.mxu1  ;;  %v3968_v40 = vadd.f32 %v3967_v30, %v7888_v3 }
 0x3ff   : > { %v3969_v59 = vpop.f32.mrf.mxu0  ;;  %v4009_v34 = vadd.f32 %v4008_v10, %v7888_v3 }
 0x400   : > { %v3970_v1 = vadd.f32 %v3969_v59, %v7888_v3  ;;  %v4010_v15 = vpop.f32.mrf.mxu1  ;;  %v4059_v39 = vmul.f32 %v3968_v40, %v1400_v6 }
 0x401   : > { %v3971_v35 = vpop.f32.mrf.mxu0  ;;  %v4061_v54 = vmul.f32 %v4009_v34, %v1402_v49  ;;  %v4011_v17 = vadd.f32 %v4010_v15, %v7888_v3 }
 0x402   : > { %v4060_v61 = vmul.f32 %v3970_v1, %v1401_v27  ;;  %v4012_v13 = vpop.f32.mrf.mxu1 }
 0x403   : > { %v3972_v38 = vpop.f32.mrf.mxu0  ;;  %v4062_v22 = vmul.f32 %v4011_v17, %v1403_v51  ;;  %v4085_v2 = vpack.c.bf16 %v4061_v54, %v4058_v18 }
 0x404   : > { %v4084_v24 = vpack.c.bf16 %v4060_v61, %v4057_v4  ;;  %v4013_v16 = vpop.f32.mrf.mxu1 }
 0x405   : > { %v4086_v62 = vpack.c.bf16 %v4062_v22, %v4059_v39  ;;  %4377 = vmatprep.mubr.bf16.mxu0 %v4085_v2 }
 0x406   : > { %4378 = vmatmul.mubr.bf16.gmra.mxu0 %v4084_v24 }
 0x407   : > { %5209 = vmatmul.mubr.bf16.gmra.mxu1 %v4086_v62 }
 0x462   : > { %v5052_v43 = vpop.f32.mrf.mxu0 }
 0x464   : > { %v5053_v53 = vpop.f32.mrf.mxu0 }
 0x465   : > { %v5054_v48 = vadd.f32 %v5053_v53, %v5052_v43 }
 0x466   : > { %v5055_v0 = vpop.f32.mrf.mxu0 }
 0x467   : > { %v4324_v23 = vadd.f32 %v5054_v48, %v8177_v21 }
 0x468   : > { %v5056_v3 = vpop.f32.mrf.mxu0 }
 0x469   : > { %v5057_v12 = vadd.f32 %v5056_v3, %v5055_v0 }
 0x46b   : > { %v4327_v32 = vadd.f32 %v5057_v12, %v8177_v21 }
 0x46d   : > { %v5058_v9 = vpop.f32.mrf.mxu0 }
 0x46e   : > { %v5198_v33 = vpop.f32.mrf.mxu1 }
 0x46f   : > { %v5059_v25 = vpop.f32.mrf.mxu0 }
 0x470   : > { %v5060_v11 = vadd.f32 %v5059_v25, %v5058_v9  ;;  %v4420_v31 = vpop.f32.mrf.mxu1 }
 0x471   : > { %v8180_v56 = vadd.f32 %v4420_v31, %v4324_v23  ;;  %v5061_v52 = vpop.f32.mrf.mxu0 }
 0x472   : > { %v4332_v7 = vadd.f32 %v5060_v11, %v8177_v21  ;;  %v5199_v45 = vpop.f32.mrf.mxu1 }
 0x473   : > { %v5062_v26 = vpop.f32.mrf.mxu0  ;;  %4485 = vadd.xlane.f32.xlu1 %v8180_v56 }
 0x474   : > { %v5063_v37 = vadd.f32 %v5062_v26, %v5061_v52  ;;  %v4423_v28 = vpop.f32.mrf.mxu1  ;;  %v8185_v55 = vadd.f32 %v5198_v33, %v4332_v7 }
 0x475   : > { %v8187_v50 = vadd.f32 %v4423_v28, %v4327_v32 }
 0x476   : > { %v4335_v60 = vadd.f32 %v5063_v37, %v8177_v21 }
 0x477   : > { %4487 = vadd.xlane.f32.xlu0 %v8187_v50  ;;  %4489 = vadd.xlane.f32.xlu1 %v8185_v55 }
 0x478   : > { %v8192_v63 = vadd.f32 %v5199_v45, %v4335_v60 }
 0x47a   : > { %v5064_v42 = vpop.f32.mrf.mxu0 }
 0x47b   : > { %4491 = vadd.xlane.f32.xlu0 %v8192_v63 }
 0x47c   : > { %v5065_v47 = vpop.f32.mrf.mxu0 }
 0x47d   : > { %v5066_v36 = vadd.f32 %v5065_v47, %v5064_v42 }
 0x47e   : > { %v5067_v41 = vpop.f32.mrf.mxu0 }
 0x47f   : > { %v4340_v58 = vadd.f32 %v5066_v36, %v8177_v21 }
 0x480   : > { %v5068_v8 = vpop.f32.mrf.mxu0 }
 0x481   : > { %v5069_v46 = vadd.f32 %v5068_v8, %v5067_v41 }
 0x483   : > { %v4343_v59 = vadd.f32 %v5069_v46, %v8177_v21 }
 0x485   : > { %v5070_v44 = vpop.f32.mrf.mxu0 }
 0x486   : > { %v5202_v29 = vpop.f32.mrf.mxu1 }
 0x487   : > { %v5071_v20 = vpop.f32.mrf.mxu0 }
 0x488   : > { %v5072_v30 = vadd.f32 %v5071_v20, %v5070_v44  ;;  %v4436_v19 = vpop.f32.mrf.mxu1 }
 0x489   : > { %v8196_v5 = vadd.f32 %v4436_v19, %v4340_v58  ;;  %v5073_v57 = vpop.f32.mrf.mxu0 }
 0x48a   : > { %v4348_v14 = vadd.f32 %v5072_v30, %v8177_v21  ;;  %v5203_v49 = vpop.f32.mrf.mxu1 }
 0x48b   : > { %v5074_v10 = vpop.f32.mrf.mxu0  ;;  %4493 = vadd.xlane.f32.xlu1 %v8196_v5 }
 0x48c   : > { %v5075_v40 = vadd.f32 %v5074_v10, %v5073_v57  ;;  %v4439_v34 = vpop.f32.mrf.mxu1  ;;  %v8201_v27 = vadd.f32 %v5202_v29, %v4348_v14 }
 0x48d   : > { %v8203_v1 = vadd.f32 %v4439_v34, %v4343_v59 }
 0x48e   : > { %v4351_v4 = vadd.f32 %v5075_v40, %v8177_v21 }
 0x48f   : > { %4495 = vadd.xlane.f32.xlu0 %v8203_v1  ;;  %4497 = vadd.xlane.f32.xlu1 %v8201_v27 }
 0x490   : > { %v8208_v6 = vadd.f32 %v5203_v49, %v4351_v4 }
 0x492   : > { %v5076_v51 = vpop.f32.mrf.mxu0 }
 0x493   : > { %4499 = vadd.xlane.f32.xlu0 %v8208_v6 }
 0x494   : > { %v5077_v15 = vpop.f32.mrf.mxu0 }
 0x495   : > { %v5078_v18 = vadd.f32 %v5077_v15, %v5076_v51 }
 0x496   : > { %v5079_v35 = vpop.f32.mrf.mxu0 }
 0x497   : > { %v4356_v39 = vadd.f32 %v5078_v18, %v8177_v21 }
 0x498   : > { %v5080_v54 = vpop.f32.mrf.mxu0 }
 0x499   : > { %v5081_v13 = vadd.f32 %v5080_v54, %v5079_v35 }
 0x49b   : > { %v4359_v0 = vadd.f32 %v5081_v13, %v8177_v21 }
 0x49d   : > { %v5082_v61 = vpop.f32.mrf.mxu0 }
 0x49e   : > { %v5206_v17 = vpop.f32.mrf.mxu1 }
 0x49f   : > { %v5083_v38 = vpop.f32.mrf.mxu0 }
 0x4a0   : > { %v5084_v24 = vadd.f32 %v5083_v38, %v5082_v61  ;;  %v4452_v22 = vpop.f32.mrf.mxu1 }
 0x4a1   : > { %v8212_v2 = vadd.f32 %v4452_v22, %v4356_v39  ;;  %v5085_v16 = vpop.f32.mrf.mxu0 }
 0x4a2   : > { %v4364_v62 = vadd.f32 %v5084_v24, %v8177_v21  ;;  %v5207_v43 = vpop.f32.mrf.mxu1 }
 0x4a3   : > { %v5086_v53 = vpop.f32.mrf.mxu0  ;;  %4501 = vadd.xlane.f32.xlu1 %v8212_v2 }
 0x4a4   : > { %v5087_v48 = vadd.f32 %v5086_v53, %v5085_v16  ;;  %v4455_v3 = vpop.f32.mrf.mxu1  ;;  %v8217_v9 = vadd.f32 %v5206_v17, %v4364_v62 }
 0x4a5   : > { %v8219_v33 = vadd.f32 %v4455_v3, %v4359_v0 }
 0x4a6   : > { %v4367_v12 = vadd.f32 %v5087_v48, %v8177_v21 }
 0x4a7   : > { %4503 = vadd.xlane.f32.xlu0 %v8219_v33  ;;  %4505 = vadd.xlane.f32.xlu1 %v8217_v9 }
 0x4a8   : > { %v8224_v25 = vadd.f32 %v5207_v43, %v4367_v12 }
 0x4ab   : > { %4507 = vadd.xlane.f32.xlu0 %v8224_v25 }
 0x4bd   : > { %v5088_v23 = vpop.f32.mrf.mxu0 }
 0x4bf   : > { %v5089_v11 = vpop.f32.mrf.mxu0 }
 0x4c0   : > { %v5090_v7 = vadd.f32 %v5089_v11, %v5088_v23 }
 0x4c1   : > { %v5091_v31 = vpop.f32.mrf.mxu0 }
 0x4c2   : > { %v4372_v28 = vadd.f32 %v5090_v7, %v8177_v21 }
 0x4c3   : > { %v5092_v52 = vpop.f32.mrf.mxu0 }
 0x4c4   : > { %v5093_v32 = vadd.f32 %v5092_v52, %v5091_v31 }
 0x4c6   : > { %v5094_v45 = vpop.f32.mrf.mxu0  ;;  %v4375_v29 = vadd.f32 %v5093_v32, %v8177_v21 }
 0x4c7   : > { %v5210_v26 = vpop.f32.mrf.mxu1 }
 0x4c8   : > { %v5095_v37 = vpop.f32.mrf.mxu0 }
 0x4c9   : > { %v5096_v60 = vadd.f32 %v5095_v37, %v5094_v45  ;;  %v4468_v42 = vpop.f32.mrf.mxu1 }
 0x4ca   : > { %v8228_v47 = vadd.f32 %v4468_v42, %v4372_v28  ;;  %v5097_v41 = vpop.f32.mrf.mxu0 }
 0x4cb   : > { %v4380_v36 = vadd.f32 %v5096_v60, %v8177_v21  ;;  %v5211_v8 = vpop.f32.mrf.mxu1 }
 0x4cc   : > { %4509 = vadd.xlane.f32.xlu1 %v8228_v47  ;;  %v5098_v44 = vpop.f32.mrf.mxu0 }
 0x4cd   : > { %v5099_v46 = vadd.f32 %v5098_v44, %v5097_v41  ;;  %v4471_v20 = vpop.f32.mrf.mxu1  ;;  %v8233_v58 = vadd.f32 %v5210_v26, %v4380_v36 }
 0x4ce   : > { %v8235_v30 = vadd.f32 %v4471_v20, %v4375_v29 }
 0x4cf   : > { %v4383_v19 = vadd.f32 %v5099_v46, %v8177_v21 }
 0x4d0   : > { %4511 = vadd.xlane.f32.xlu0 %v8235_v30  ;;  %4513 = vadd.xlane.f32.xlu1 %v8233_v58 }
 0x4d1   : > { %v8240_v57 = vadd.f32 %v5211_v8, %v4383_v19 }
 0x4d4   : > { %4515 = vadd.xlane.f32.xlu0 %v8240_v57 }
 0x4fc   : > { %v4486_v14 = vpop.xlane.xlu1 %4485 }
 0x4fd   : > { %v4518_v49 = vmul.f32 0.0078125, %v4486_v14 }
 0x4ff   : > { %v8244_v10 = vsub.f32 %v8180_v56, %v4518_v49 }
 0x500   : > { %v4488_v59 = vpop.xlane.xlu0 %4487  ;;  %v4490_v40 = vpop.xlane.xlu1 %4489 }
 0x501   : > { %v4519_v34 = vmul.f32 0.0078125, %v4488_v59  ;;  %v4520_v4 = vmul.f32 0.0078125, %v4490_v40  ;;  %v4550_v21 = vmul.f32 %v8244_v10, %v8244_v10 }
 0x503   : > { %v8249_v51 = vsub.f32 %v8187_v50, %v4519_v34  ;;  %v8252_v15 = vsub.f32 %v8185_v55, %v4520_v4  ;;  %4566 = vadd.xlane.f32.xlu1 %v4550_v21 }
 0x504   : > { %v4492_v35 = vpop.xlane.xlu0 %4491 }
 0x505   : > { %v4521_v18 = vmul.f32 0.0078125, %v4492_v35  ;;  %v4551_v56 = vmul.f32 %v8249_v51, %v8249_v51  ;;  %v4552_v54 = vmul.f32 %v8252_v15, %v8252_v15 }
 0x507   : > { %v8259_v61 = vsub.f32 %v8192_v63, %v4521_v18  ;;  %4568 = vadd.xlane.f32.xlu0 %v4551_v56  ;;  %4570 = vadd.xlane.f32.xlu1 %v4552_v54 }
 0x509   : > { %v4553_v50 = vmul.f32 %v8259_v61, %v8259_v61 }
 0x50b   : > { %4572 = vadd.xlane.f32.xlu0 %v4553_v50 }
 0x514   : > { %v4494_v55 = vpop.xlane.xlu1 %4493 }
 0x515   : > { %v4522_v17 = vmul.f32 0.0078125, %v4494_v55 }
 0x517   : > { %v8264_v13 = vsub.f32 %v8196_v5, %v4522_v17  ;;  %v8326_v17 = vld [vmem:[%s8487_s12] ss:$0 sm:$0xff] }
 0x518   : > { %v4496_v38 = vpop.xlane.xlu0 %4495  ;;  %v4498_v39 = vpop.xlane.xlu1 %4497 }
 0x519   : > { %v4523_v24 = vmul.f32 0.0078125, %v4496_v38  ;;  %v4524_v22 = vmul.f32 0.0078125, %v4498_v39  ;;  %v4554_v16 = vmul.f32 %v8264_v13, %v8264_v13  ;;  %v8332_v39 = vld [vmem:[%s8488_s13] ss:$0 sm:$0xff] }
 0x51b   : > { %v8269_v63 = vsub.f32 %v8203_v1, %v4523_v24  ;;  %v8272_v62 = vsub.f32 %v8201_v27, %v4524_v22  ;;  %4574 = vadd.xlane.f32.xlu1 %v4554_v16 }
 0x51c   : > { %v4500_v43 = vpop.xlane.xlu0 %4499 }
 0x51d   : > { %v4525_v53 = vmul.f32 0.0078125, %v4500_v43  ;;  %v4555_v5 = vmul.f32 %v8269_v63, %v8269_v63  ;;  %v4556_v0 = vmul.f32 %v8272_v62, %v8272_v62 }
 0x51f   : > { %v8279_v48 = vsub.f32 %v8208_v6, %v4525_v53  ;;  %4576 = vadd.xlane.f32.xlu0 %v4555_v5  ;;  %4578 = vadd.xlane.f32.xlu1 %v4556_v0  ;;  %v5649_v0 = vld [vmem:[%s5921_s19] sm:$0xff] }
 0x521   : > { %v4557_v1 = vmul.f32 %v8279_v48, %v8279_v48 }
 0x523   : > { %4580 = vadd.xlane.f32.xlu0 %v4557_v1 }
 0x52c   : > { %v4502_v27 = vpop.xlane.xlu1 %4501 }
 0x52d   : > { %v4526_v3 = vmul.f32 0.0078125, %v4502_v27 }
 0x52f   : > { %v8284_v12 = vsub.f32 %v8212_v2, %v4526_v3 }
 0x530   : > { %v4504_v23 = vpop.xlane.xlu0 %4503  ;;  %v4506_v11 = vpop.xlane.xlu1 %4505 }
 0x531   : > { %v4527_v31 = vmul.f32 0.0078125, %v4504_v23  ;;  %v4528_v52 = vmul.f32 0.0078125, %v4506_v11  ;;  %v4558_v7 = vmul.f32 %v8284_v12, %v8284_v12 }
 0x533   : > { %v8289_v6 = vsub.f32 %v8219_v33, %v4527_v31  ;;  %v8292_v45 = vsub.f32 %v8217_v9, %v4528_v52  ;;  %4582 = vadd.xlane.f32.xlu1 %v4558_v7 }
 0x534   : > { %v4508_v26 = vpop.xlane.xlu0 %4507 }
 0x535   : > { %v4529_v32 = vmul.f32 0.0078125, %v4508_v26  ;;  %v4559_v2 = vmul.f32 %v8289_v6, %v8289_v6  ;;  %v4560_v37 = vmul.f32 %v8292_v45, %v8292_v45 }
 0x537   : > { %v8299_v28 = vsub.f32 %v8224_v25, %v4529_v32  ;;  %4584 = vadd.xlane.f32.xlu0 %v4559_v2  ;;  %4586 = vadd.xlane.f32.xlu1 %v4560_v37  ;;  %v5651_v32 = vld [vmem:[%s5921_s19 + $0x10] sm:$0xff] }
 0x539   : > { %v4561_v33 = vmul.f32 %v8299_v28, %v8299_v28 }
 0x53b   : > { %4588 = vadd.xlane.f32.xlu0 %v4561_v33 }
 0x555   : > { %v4510_v9 = vpop.xlane.xlu1 %4509 }
 0x556   : > { %v4530_v60 = vmul.f32 0.0078125, %v4510_v9 }
 0x558   : > { %v8304_v42 = vsub.f32 %v8228_v47, %v4530_v60 }
 0x559   : > { %v4512_v41 = vpop.xlane.xlu0 %4511  ;;  %v4514_v36 = vpop.xlane.xlu1 %4513 }
 0x55a   : > { %v4531_v8 = vmul.f32 0.0078125, %v4512_v41  ;;  %v4532_v44 = vmul.f32 0.0078125, %v4514_v36  ;;  %v4562_v29 = vmul.f32 %v8304_v42, %v8304_v42  ;;  %v5652_v36 = vld [vmem:[%s5921_s19 + $0x18] sm:$0xff] }
 0x55c   : > { %v8309_v25 = vsub.f32 %v8235_v30, %v4531_v8  ;;  %v8312_v46 = vsub.f32 %v8233_v58, %v4532_v44  ;;  %4590 = vadd.xlane.f32.xlu1 %v4562_v29 }
 0x55d   : > { %v4516_v20 = vpop.xlane.xlu0 %4515 }
 0x55e   : > { %v4533_v19 = vmul.f32 0.0078125, %v4516_v20  ;;  %v4563_v47 = vmul.f32 %v8309_v25, %v8309_v25  ;;  %v4564_v14 = vmul.f32 %v8312_v46, %v8312_v46 }
 0x560   : > { %v8319_v49 = vsub.f32 %v8240_v57, %v4533_v19  ;;  %4592 = vadd.xlane.f32.xlu0 %v4563_v47  ;;  %4594 = vadd.xlane.f32.xlu1 %v4564_v14 }
 0x562   : > { %v4565_v30 = vmul.f32 %v8319_v49, %v8319_v49 }
 0x564   : > { %4596 = vadd.xlane.f32.xlu0 %v4565_v30 }
 0x58c   : > { %v4567_v58 = vpop.xlane.xlu1 %4566 }
 0x58d   : > { %v4598_v59 = vmul.f32 0.0078125, %v4567_v58 }
 0x58f   : > { %v4614_v40 = vadd.f32 1e-05, %v4598_v59 }
 0x590   : > { %v4569_v34 = vpop.xlane.xlu0 %4568  ;;  %v4571_v4 = vpop.xlane.xlu1 %4570 }
 0x591   : > { %5616 = vrsqrt.f32 %v4614_v40  ;;  %v4599_v21 = vmul.f32 0.0078125, %v4569_v34  ;;  %v4600_v35 = vmul.f32 0.0078125, %v4571_v4 }
 0x593   : > { %v4615_v18 = vadd.f32 1e-05, %v4599_v21  ;;  %v4616_v56 = vadd.f32 1e-05, %v4600_v35 }
 0x594   : > { %v4573_v54 = vpop.xlane.xlu0 %4572 }
 0x595   : > { %5618 = vrsqrt.f32 %v4615_v18  ;;  %v4601_v57 = vmul.f32 0.0078125, %v4573_v54  ;;  %v5653_v18 = vld [vmem:[%s5921_s19 + $0x20] sm:$0xff] }
 0x596   : > { %5620 = vrsqrt.f32 %v4616_v56 }
 0x597   : > { %v4617_v50 = vadd.f32 1e-05, %v4601_v57 }
 0x599   : > { %5622 = vrsqrt.f32 %v4617_v50 }
 0x59e   : > { %v5617_v55 = vpop.eup %5616 }
 0x59f   : > { %v4646_v38 = vmul.f32 %v5617_v55, %v8244_v10 }
 0x5a1   : > { %v4668_v24 = vmul.f32 %v8326_v17, %v4646_v38 }
 0x5a2   : > { %v5619_v22 = vpop.eup %5618 }
 0x5a3   : > { %v5621_v16 = vpop.eup %5620  ;;  %v4690_v43 = vadd.f32 %v8332_v39, %v4668_v24  ;;  %v4647_v53 = vmul.f32 %v5619_v22, %v8249_v51 }
 0x5a4   : > { %v4648_v5 = vmul.f32 %v5621_v16, %v8252_v15  ;;  %v4575_v31 = vpop.xlane.xlu1 %4574  ;;  %v5650_v15 = vld [vmem:[%s5921_s19 + $0x8] sm:$0xff] }
 0x5a5   : > { %v4706_v1 = vadd.f32 %v5649_v0, %v4690_v43  ;;  %v4669_v10 = vmul.f32 %v8326_v17, %v4647_v53  ;;  %v4602_v52 = vmul.f32 0.0078125, %v4575_v31  ;;  %v5654_v16 = vld [vmem:[%s5921_s19 + $0x28] sm:$0xff]  ;;  %v5655_v0 = vld [vmem:[%s5921_s19 + $0x30] sm:$0xff] }
 0x5a6   : > { %v5623_v27 = vpop.eup %5622  ;;  %v4670_v3 = vmul.f32 %v8326_v17, %v4648_v5 }
 0x5a7   : > { %4722 = vst [vmem:[%s5921_s19] sm:$0xff] %v4706_v1  ;;  %v4691_v23 = vadd.f32 %v8332_v39, %v4669_v10  ;;  %v4649_v11 = vmul.f32 %v5623_v27, %v8259_v61  ;;  %v4618_v37 = vadd.f32 1e-05, %v4602_v52 }
 0x5a8   : > { %v4692_v51 = vadd.f32 %v8332_v39, %v4670_v3  ;;  %v4577_v9 = vpop.xlane.xlu0 %4576  ;;  %v4579_v60 = vpop.xlane.xlu1 %4578 }
 0x5a9   : > { %v4707_v7 = vadd.f32 %v5650_v15, %v4691_v23  ;;  %v4671_v26 = vmul.f32 %v8326_v17, %v4649_v11  ;;  %5624 = vrsqrt.f32 %v4618_v37  ;;  %v4603_v61 = vmul.f32 0.0078125, %v4577_v9  ;;  %v5656_v11 = vld [vmem:[%s5921_s19 + $0x38] sm:$0xff] }
 0x5aa   : > { %v4708_v2 = vadd.f32 %v5651_v32, %v4692_v51  ;;  %v4604_v41 = vmul.f32 0.0078125, %v4579_v60  ;;  %v5657_v60 = vld [vmem:[%s5921_s19 + $0x40] sm:$0xff] }
 0x5ab   : > { %4723 = vst [vmem:[%s5921_s19 + $0x8] sm:$0xff] %v4707_v7  ;;  %v4693_v33 = vadd.f32 %v8332_v39, %v4671_v26  ;;  %v4619_v44 = vadd.f32 1e-05, %v4603_v61 }
 0x5ac   : > { %4724 = vst [vmem:[%s5921_s19 + $0x10] sm:$0xff] %v4708_v2  ;;  %v4620_v29 = vadd.f32 1e-05, %v4604_v41  ;;  %v4581_v20 = vpop.xlane.xlu0 %4580 }
 0x5ad   : > { %v4709_v8 = vadd.f32 %v5652_v36, %v4693_v33  ;;  %5626 = vrsqrt.f32 %v4619_v44  ;;  %v4605_v19 = vmul.f32 0.0078125, %v4581_v20 }
 0x5ae   : > { %5628 = vrsqrt.f32 %v4620_v29  ;;  %v5658_v29 = vld [vmem:[%s5921_s19 + $0x48] sm:$0xff] }
 0x5af   : > { %4725 = vst [vmem:[%s5921_s19 + $0x18] sm:$0xff] %v4709_v8  ;;  %v4621_v47 = vadd.f32 1e-05, %v4605_v19  ;;  %v5659_v19 = vld [vmem:[%s5921_s19 + $0x50] sm:$0xff] }
 0x5b1   : > { %5630 = vrsqrt.f32 %v4621_v47 }
 0x5b6   : > { %v5625_v14 = vpop.eup %5624 }
 0x5b7   : > { %v4650_v30 = vmul.f32 %v5625_v14, %v8264_v13 }
 0x5b9   : > { %v4672_v58 = vmul.f32 %v8326_v17, %v4650_v30  ;;  %v5660_v30 = vld [vmem:[%s5921_s19 + $0x58] sm:$0xff] }
 0x5ba   : > { %v5627_v59 = vpop.eup %5626 }
 0x5bb   : > { %v5629_v40 = vpop.eup %5628  ;;  %v4694_v34 = vadd.f32 %v8332_v39, %v4672_v58  ;;  %v4651_v4 = vmul.f32 %v5627_v59, %v8269_v63 }
 0x5bc   : > { %v4652_v21 = vmul.f32 %v5629_v40, %v8272_v62  ;;  %v4583_v35 = vpop.xlane.xlu1 %4582 }
 0x5bd   : > { %v4710_v56 = vadd.f32 %v5653_v18, %v4694_v34  ;;  %v4673_v54 = vmul.f32 %v8326_v17, %v4651_v4  ;;  %v4606_v57 = vmul.f32 0.0078125, %v4583_v35 }
 0x5be   : > { %v5631_v50 = vpop.eup %5630  ;;  %v4674_v13 = vmul.f32 %v8326_v17, %v4652_v21 }
 0x5bf   : > { %4726 = vst [vmem:[%s5921_s19 + $0x20] sm:$0xff] %v4710_v56  ;;  %v4695_v55 = vadd.f32 %v8332_v39, %v4673_v54  ;;  %v4653_v38 = vmul.f32 %v5631_v50, %v8279_v48  ;;  %v4622_v63 = vadd.f32 1e-05, %v4606_v57 }
 0x5c0   : > { %v4696_v62 = vadd.f32 %v8332_v39, %v4674_v13  ;;  %v4585_v24 = vpop.xlane.xlu0 %4584  ;;  %v4587_v22 = vpop.xlane.xlu1 %4586 }
 0x5c1   : > { %v4711_v43 = vadd.f32 %v5654_v16, %v4695_v55  ;;  %v4675_v53 = vmul.f32 %v8326_v17, %v4653_v38  ;;  %5632 = vrsqrt.f32 %v4622_v63  ;;  %v4607_v5 = vmul.f32 0.0078125, %v4585_v24 }
 0x5c2   : > { %v4712_v1 = vadd.f32 %v5655_v0, %v4696_v62  ;;  %v4608_v10 = vmul.f32 0.0078125, %v4587_v22 }
 0x5c3   : > { %4727 = vst [vmem:[%s5921_s19 + $0x28] sm:$0xff] %v4711_v43  ;;  %v4697_v48 = vadd.f32 %v8332_v39, %v4675_v53  ;;  %v4623_v27 = vadd.f32 1e-05, %v4607_v5  ;;  %v5661_v43 = vld [vmem:[%s5921_s19 + $0x60] sm:$0xff] }
 0x5c4   : > { %4728 = vst [vmem:[%s5921_s19 + $0x30] sm:$0xff] %v4712_v1  ;;  %v4624_v3 = vadd.f32 1e-05, %v4608_v10  ;;  %v4589_v23 = vpop.xlane.xlu0 %4588 }
 0x5c5   : > { %v4713_v31 = vadd.f32 %v5656_v11, %v4697_v48  ;;  %5634 = vrsqrt.f32 %v4623_v27  ;;  %v4609_v51 = vmul.f32 0.0078125, %v4589_v23 }
 0x5c6   : > { %5636 = vrsqrt.f32 %v4624_v3  ;;  %v5663_v3 = vld [vmem:[%s5921_s19 + $0x70] sm:$0xff] }
 0x5c7   : > { %4729 = vst [vmem:[%s5921_s19 + $0x38] sm:$0xff] %v4713_v31  ;;  %v4625_v52 = vadd.f32 1e-05, %v4609_v51 }
 0x5c9   : > { %5638 = vrsqrt.f32 %v4625_v52 }
 0x5ce   : > { %v5633_v15 = vpop.eup %5632 }
 0x5cf   : > { %v4654_v7 = vmul.f32 %v5633_v15, %v8284_v12 }
 0x5d1   : > { %v4676_v26 = vmul.f32 %v8326_v17, %v4654_v7 }
 0x5d2   : > { %v5635_v32 = vpop.eup %5634 }
 0x5d3   : > { %v5637_v2 = vpop.eup %5636  ;;  %v4698_v37 = vadd.f32 %v8332_v39, %v4676_v26  ;;  %v4655_v33 = vmul.f32 %v5635_v32, %v8289_v6 }
 0x5d4   : > { %v4656_v9 = vmul.f32 %v5637_v2, %v8292_v45 }
 0x5d5   : > { %v4714_v61 = vadd.f32 %v5657_v60, %v4698_v37  ;;  %v4677_v41 = vmul.f32 %v8326_v17, %v4655_v33 }
 0x5d6   : > { %v5639_v12 = vpop.eup %5638  ;;  %v4678_v36 = vmul.f32 %v8326_v17, %v4656_v9 }
 0x5d7   : > { %4730 = vst [vmem:[%s5921_s19 + $0x40] sm:$0xff] %v4714_v61  ;;  %v4699_v8 = vadd.f32 %v8332_v39, %v4677_v41  ;;  %v4657_v44 = vmul.f32 %v5639_v12, %v8299_v28 }
 0x5d8   : > { %v4700_v6 = vadd.f32 %v8332_v39, %v4678_v36 }
 0x5d9   : > { %v4715_v20 = vadd.f32 %v5658_v29, %v4699_v8  ;;  %v4679_v45 = vmul.f32 %v8326_v17, %v4657_v44 }
 0x5da   : > { %v4716_v47 = vadd.f32 %v5659_v19, %v4700_v6 }
 0x5db   : > { %4731 = vst [vmem:[%s5921_s19 + $0x48] sm:$0xff] %v4715_v20  ;;  %v4701_v14 = vadd.f32 %v8332_v39, %v4679_v45 }
 0x5dc   : > { %4732 = vst [vmem:[%s5921_s19 + $0x50] sm:$0xff] %v4716_v47 }
 0x5dd   : > { %v4717_v58 = vadd.f32 %v5660_v30, %v4701_v14 }
 0x5df   : > { %4733 = vst [vmem:[%s5921_s19 + $0x58] sm:$0xff] %v4717_v58 }
 0x5e5   : > { %v4591_v59 = vpop.xlane.xlu1 %4590 }
 0x5e6   : > { %v4610_v40 = vmul.f32 0.0078125, %v4591_v59 }
 0x5e8   : > { %v4626_v34 = vadd.f32 1e-05, %v4610_v40 }
 0x5e9   : > { %v4593_v4 = vpop.xlane.xlu0 %4592  ;;  %v4595_v28 = vpop.xlane.xlu1 %4594 }
 0x5ea   : > { %5640 = vrsqrt.f32 %v4626_v34  ;;  %v4611_v21 = vmul.f32 0.0078125, %v4593_v4  ;;  %v4612_v35 = vmul.f32 0.0078125, %v4595_v28 }
 0x5ec   : > { %v4627_v18 = vadd.f32 1e-05, %v4611_v21  ;;  %v4628_v56 = vadd.f32 1e-05, %v4612_v35 }
 0x5ed   : > { %v4597_v54 = vpop.xlane.xlu0 %4596 }
 0x5ee   : > { %5642 = vrsqrt.f32 %v4627_v18  ;;  %v4613_v57 = vmul.f32 0.0078125, %v4597_v54 }
 0x5ef   : > { %5644 = vrsqrt.f32 %v4628_v56 }
 0x5f0   : > { %v4629_v50 = vadd.f32 1e-05, %v4613_v57 }
 0x5f2   : > { %5646 = vrsqrt.f32 %v4629_v50 }
 0x5f7   : > { %v5641_v13 = vpop.eup %5640 }
 0x5f8   : > { %v4658_v55 = vmul.f32 %v5641_v13, %v8304_v42 }
 0x5fa   : > { %v4680_v38 = vmul.f32 %v8326_v17, %v4658_v55 }
 0x5fb   : > { %v5643_v63 = vpop.eup %5642 }
 0x5fc   : > { %v5645_v62 = vpop.eup %5644  ;;  %v4702_v24 = vadd.f32 %v8332_v39, %v4680_v38  ;;  %v4659_v22 = vmul.f32 %v5643_v63, %v8309_v25 }
 0x5fd   : > { %v4660_v16 = vmul.f32 %v5645_v62, %v8312_v46  ;;  %v5662_v46 = vld [vmem:[%s5921_s19 + $0x68] sm:$0xff] }
 0x5fe   : > { %v4718_v53 = vadd.f32 %v5661_v43, %v4702_v24  ;;  %v4681_v5 = vmul.f32 %v8326_v17, %v4659_v22 }
 0x5ff   : > { %v5647_v42 = vpop.eup %5646  ;;  %v4682_v0 = vmul.f32 %v8326_v17, %v4660_v16 }
 0x600   : > { %4734 = vst [vmem:[%s5921_s19 + $0x60] sm:$0xff] %v4718_v53  ;;  %v4703_v1 = vadd.f32 %v8332_v39, %v4681_v5  ;;  %v4661_v10 = vmul.f32 %v5647_v42, %v8319_v49  ;;  %v5664_v49 = vld [vmem:[%s5921_s19 + $0x78] sm:$0xff] }
 0x601   : > { %v4704_v25 = vadd.f32 %v8332_v39, %v4682_v0 }
 0x602   : > { %v4719_v48 = vadd.f32 %v5662_v46, %v4703_v1  ;;  %v4683_v27 = vmul.f32 %v8326_v17, %v4661_v10 }
 0x603   : > { %v4720_v23 = vadd.f32 %v5663_v3, %v4704_v25 }
 0x604   : > { %4735 = vst [vmem:[%s5921_s19 + $0x68] sm:$0xff] %v4719_v48  ;;  %v4705_v11 = vadd.f32 %v8332_v39, %v4683_v27 }
 0x605   : > { %4736 = vst [vmem:[%s5921_s19 + $0x70] sm:$0xff] %v4720_v23 }
 0x606   : > { %v4721_v17 = vadd.f32 %v5664_v49, %v4705_v11 }
 0x608   : > { %4737 = vst [vmem:[%s5921_s19 + $0x78] sm:$0xff] %v4721_v17 }
 0x609   : > { %5678 = shalt.err (!%p5675_p7)
}
 0x60a   : > { %s5679_s19 = scalar_lea.hbm %s8416_s23, 2048  ;;  %s5683_s20 = scalar_lea.hbm %s8812_s24, 4096 }
 0x60b   : > { %p5680_p8 = scmp.ne.s32.totalorder %s8416_s23, %s5679_s19  ;;  %p5684_p12 = scmp.lt.s32.totalorder %s8416_s23, %s8812_s24 }
 0x60c   : > { %p5685_p13 = scmp.lt.s32.totalorder %s5683_s20, %s5679_s19 }
 0x60d   : > { %p5681_p10 = pnand %p5680_p8, %p5887_p3 }
 0x60e   : > { %p5686_p0 = por %p5685_p13, %p5684_p12 }
 0x60f   : > { %p5682_p11 = pneg %p5681_p10 }
 0x611   : > { %p5687_p1 = pnand %p5686_p0, %p5682_p11 }
 0x613   : > { %5690 = shalt.err (!%p5687_p1)
}
 0x614   : > { %s5761_s16 = smov 128   ;;  %s5762_s28 = smov 8  }
 0x615   : > { %5228 = dma.vmem_to_hbm [thread:$0]  (%p5887_p3), %s8418_s29, 2048, %s8416_s23, %s8424_s17, %s5761_s16, %s5761_s16, %s5762_s28  }
 0x616 PF: > { %s8813_s14 = sld [smem:[#allocation8_spill]] }
 0x617   : > { %s8814_s22 = sld [smem:[#allocation5_spill]] }
 0x61c   : > { %p5234_p2 = scmp.ge.s32.totalorder %s8813_s14, 2 }
 0x61d   : > { %s4767_s0 = sand.u32 1, %s8814_s22  }
 0x61e   : > { %p5231_p4 = pnand %p5234_p2, %p5897_p9  ;;  %s4768_s19 = scalar_lea.sflag [#allocation3], %s4767_s0 }
 0x620   : > { %p5232_p5 = pneg %p5231_p4 }
 0x622   : > { %5724 = dma.done.wait (%p5232_p5), %s4768_s19, 2048  }
 0x623   : > { %5726 = vsyncadd (%p5232_p5), %s4768_s19, 4294965248  ;;  %s27_s20 = sadd.s32 1, %s8813_s14   ;;  %s8816_s16 = sld [smem:[#allocation6_spill]] }
 0x624   : > { %p24_p6 = scmp.ge.s32.totalorder %s27_s20, 6   ;;  %s8817_s17 = sld [smem:[#allocation7_spill]] }
 0x625   : > { %s8818_s18 = sld [smem:[#allocation9_spill]]  ;;  %s8820_s29 = smov %s5733_s30 }
 0x626   : > { %s8819_s19 = sld [smem:[#allocation10_spill]]  ;;  %s8821_s30 = smov %s5737_s15 }
 0x627   : > { %s8822_s15 = smov %s5905_s21  ;;  %26 = sbr.rel (!%p24_p6) target bundleno = 8 (0x8), region = 128 }
 0x62c   :  { %4773 = vsyncpa [#allocation3], 1 }
 0x62d   :  { %4775 = vsyncpa [#allocation3 + $0x1], 1 }

</bundles_post_ra>
